<compile_context>
chip_gen: v5e
topology: v5e:2x2
jax: 0.10.0
libtpu: 0.0.40
codegen_flags: <defaults>
</compile_context>

<pallas_src>
import numpy as np
import jax
import jax.numpy as jnp
from jax import lax
from jax.experimental import pallas as pl
from jax.experimental.pallas import tpu as pltpu

# Module constants (from the PyTorch source)
L_FIELD = 0.004
LMBDA = 5.25e-07
Z_DIST = 0.08


def _prop_kernel(x_ref,    # (2, Bt*P, P)  bf16 : field [re, im], batch row-stacked
                 dft_ref,  # (4, 2, P, P)  bf16 : [A, Bf, C, D] x [re, im]
                 h_ref,    # (2, P, P)     f32  : fftshifted transfer function H
                 o_ref,    # (2, Bt*P, P)  bf16 : output field [re, im]
                 y_re, y_im, z_re, z_im):   # VMEM scratch, (Bt*P, P) bf16 each
    P = dft_ref.shape[-1]
    Bt = x_ref.shape[-2] // P

    def mm(a, b):
        return jnp.dot(a, b, preferred_element_type=jnp.float32)

    # Stage 1 (batched over the whole tile): Y = u1 @ Bf   (right-multiply)
    xr, xi = x_ref[0], x_ref[1]
    bfr, bfi = dft_ref[1, 0], dft_ref[1, 1]
    y_re[...] = (mm(xr, bfr) - mm(xi, bfi)).astype(jnp.bfloat16)
    y_im[...] = (mm(xr, bfi) + mm(xi, bfr)).astype(jnp.bfloat16)

    ar, ai = dft_ref[0, 0], dft_ref[0, 1]
    cr, ci = dft_ref[2, 0], dft_ref[2, 1]
    hr, hi = h_ref[0], h_ref[1]            # hoisted: loop-invariant f32 planes

    # Stage 2 (per sample): U1 = A @ Y ; U2 = H * U1 ; Z = C @ U2
    def body(b, carry):
        off = pl.multiple_of(b * P, 128)
        yr = y_re[pl.ds(off, P), :]
        yi = y_im[pl.ds(off, P), :]
        ur = mm(ar, yr) - mm(ai, yi)
        ui = mm(ar, yi) + mm(ai, yr)
        p_r = (hr * ur - hi * ui).astype(jnp.bfloat16)
        p_i = (hr * ui + hi * ur).astype(jnp.bfloat16)
        z_re[pl.ds(off, P), :] = (mm(cr, p_r) - mm(ci, p_i)).astype(jnp.bfloat16)
        z_im[pl.ds(off, P), :] = (mm(cr, p_i) + mm(ci, p_r)).astype(jnp.bfloat16)
        return carry

    lax.fori_loop(0, Bt, body, 0, unroll=Bt <= 4)

    # Stage 3 (batched): out = Z @ D   (right-multiply), lane-dense bf16 stores
    zr, zi = z_re[...], z_im[...]
    dr, di = dft_ref[3, 0], dft_ref[3, 1]
    o_ref[0] = (mm(zr, dr) - mm(zi, di)).astype(o_ref.dtype)
    o_ref[1] = (mm(zr, di) + mm(zi, dr)).astype(o_ref.dtype)


def propagation_layer_forward(u1, L=L_FIELD, lmbda=LMBDA, z=Z_DIST):
    """u1: complex64 (B, M, N) with M == N.  Returns complex64 (B, M, N)."""
    u1 = jnp.asarray(u1, dtype=jnp.complex64)
    B, M, N = u1.shape
    assert M == N, "propagation_layer assumes a square field (M == N)"

    # ---- host-side constants (numpy float64: phase args ~1e6 rad need f64) ----
    dx = L / M
    k = 2.0 * np.pi / lmbda
    fx = np.linspace(-1.0 / (2.0 * dx), 1.0 / (2.0 * dx) - 1.0 / L, M)
    FX, FY = np.meshgrid(fx, fx, indexing="ij")
    H = np.exp(-1j * np.pi * lmbda * z * (FX ** 2 + FY ** 2)) * np.exp(1j * k * z)
    H = np.fft.fftshift(H, axes=(-2, -1))

    n_idx = np.arange(M)
    ang = np.outer(n_idx, n_idx) * (2.0 * np.pi / M)
    W = np.exp(-1j * ang)           # forward DFT matrix (symmetric)
    Winv = np.exp(1j * ang) / M     # inverse DFT matrix (1/M per axis, M == N)
    pinv = np.fft.ifftshift(n_idx)  # inverse-fftshift permutation

    # fftshift / ifftshift folded into the DFT factors:
    #   fft2(fftshift(u))   = A @ u @ Bf        ifftshift(ifft2(U)) = C @ U @ D
    A_m = W[:, pinv]
    B_m = W[pinv, :]
    C_m = Winv[pinv, :]
    D_m = Winv[:, pinv]

    # ---- zero-pad spatial dims to a lane-dense multiple of 128 ----
    P = ((N + 127) // 128) * 128

    dft = np.zeros((4, 2, P, P), dtype=np.float32)
    for i, mat in enumerate((A_m, B_m, C_m, D_m)):
        dft[i, 0, :M, :M] = mat.real
        dft[i, 1, :M, :M] = mat.imag
    dft_packed = jnp.asarray(dft, dtype=jnp.bfloat16)            # (4, 2, P, P)

    h = np.zeros((2, P, P), dtype=np.float32)
    h[0, :M, :N] = H.real
    h[1, :M, :N] = H.imag
    h_packed = jnp.asarray(h)                                    # (2, P, P) f32

    # field packed re/im-first, batch row-stacked: (2, B*P, P) bf16
    x_st = jnp.stack([jnp.real(u1), jnp.imag(u1)], axis=0)       # (2, B, M, N)
    x_pad = jnp.pad(x_st, ((0, 0), (0, 0), (0, P - M), (0, P - N)))
    x_packed = x_pad.reshape(2, B * P, P).astype(jnp.bfloat16)

    # ---- batch tile: largest divisor of B, capped at 8 and at B//2 so the
    #      grid has >= 2 steps (v7x megacore: 2 TensorCores per chip) ----
    cap = min(8, max(1, B // 2))
    Bt = 1
    for cand in range(min(B, cap), 0, -1):
        if B % cand == 0:
            Bt = cand
            break
    grid = (B // Bt,)

    field_spec = pl.BlockSpec((2, Bt * P, P), lambda i: (0, i, 0))
    dft_spec = pl.BlockSpec((4, 2, P, P), lambda i: (0, 0, 0, 0))
    h_spec = pl.BlockSpec((2, P, P), lambda i: (0, 0, 0))

    out = pl.pallas_call(
        _prop_kernel,
        out_shape=jax.ShapeDtypeStruct((2, B * P, P), jnp.bfloat16),
        grid_spec=pltpu.PrefetchScalarGridSpec(
            num_scalar_prefetch=0,
            grid=grid,
            in_specs=[field_spec, dft_spec, h_spec],
            out_specs=field_spec,
            scratch_shapes=[pltpu.VMEM((Bt * P, P), jnp.bfloat16)
                            for _ in range(4)],
        ),
        compiler_params=pltpu.CompilerParams(
            dimension_semantics=("parallel",),
            vmem_limit_bytes=48 * 1024 * 1024),
    )(x_packed, dft_packed, h_packed)

    out = out.reshape(2, B, P, P)[:, :, :M, :N].astype(jnp.float32)
    return jax.lax.complex(out[0], out[1])


def _reference_forward(u1, L=L_FIELD, lmbda=LMBDA, z=Z_DIST):
    """Pure-JAX reference mirroring the PyTorch forward (complex64)."""
    u1 = jnp.asarray(u1, dtype=jnp.complex64)
    M = u1.shape[-2]
    dx = L / M
    k = 2.0 * np.pi / lmbda
    fx = np.linspace(-1.0 / (2.0 * dx), 1.0 / (2.0 * dx) - 1.0 / L, M)
    FX, FY = np.meshgrid(fx, fx, indexing="ij")
    H = np.exp(-1j * np.pi * lmbda * z * (FX ** 2 + FY ** 2)) * np.exp(1j * k * z)
    H = jnp.asarray(np.fft.fftshift(H, axes=(-2, -1)), dtype=jnp.complex64)
    U1 = jnp.fft.fft2(jnp.fft.fftshift(u1, axes=(-2, -1)))
    U2 = H * U1
    u2 = jnp.fft.ifftshift(jnp.fft.ifft2(U2), axes=(-2, -1))
    return u2


if __name__ == "__main__":
    key = jax.random.PRNGKey(0)
    kr, ki = jax.random.split(key)
    B, M, N = 4, 16, 16
    u1 = (jax.random.normal(kr, (B, M, N), dtype=jnp.float32)
          + 1j * jax.random.normal(ki, (B, M, N), dtype=jnp.float32)).astype(jnp.complex64)

    u2 = jax.block_until_ready(propagation_layer_forward(u1))

    # relative-error check against the pure-JAX FFT reference (bf16 MXU operands)
    u2_ref = jax.block_until_ready(_reference_forward(u1))
    rel_err = float(jnp.max(jnp.abs(u2 - u2_ref)) / jnp.max(jnp.abs(u2_ref)))
    assert rel_err < 5e-2, f"mismatch vs reference: rel_err={rel_err}"

    print("KERNEL_OK")
</pallas_src>

<mosaic_0001>
module attributes {stable_mosaic.version = 11 : i64} {
  func.func @_prop_kernel(%arg0: i32, %arg1: memref<2x256x128xbf16, #tpu.memory_space<vmem>>, %arg2: memref<4x2x128x128xbf16, #tpu.memory_space<vmem>>, %arg3: memref<2x128x128xf32, #tpu.memory_space<vmem>>, %arg4: memref<2x256x128xbf16, #tpu.memory_space<vmem>>, %arg5: memref<256x128xbf16, #tpu.memory_space<vmem>>, %arg6: memref<256x128xbf16, #tpu.memory_space<vmem>>, %arg7: memref<256x128xbf16, #tpu.memory_space<vmem>>, %arg8: memref<256x128xbf16, #tpu.memory_space<vmem>>) attributes {dimension_semantics = [#tpu.dimension_semantics<parallel>], iteration_bounds = array<i64: 2>, scalar_prefetch = 0 : i64, scratch_operands = 4 : i64, tpu.core_type = #tpu.core_type<tc>, window_params = [{transform_indices = @transform_0, window_bounds = array<i64: 2, 256, 128>}, {pipeline_mode = #tpu.pipeline_mode<synchronous>, transform_indices = @transform_1, window_bounds = array<i64: 4, 2, 128, 128>}, {pipeline_mode = #tpu.pipeline_mode<synchronous>, transform_indices = @transform_2, window_bounds = array<i64: 2, 128, 128>}, {transform_indices = @transform_3, window_bounds = array<i64: 2, 256, 128>}]} {
    %c0 = arith.constant 0 : index
    %c0_0 = arith.constant 0 : index
    %c0_1 = arith.constant 0 : index
    %0 = vector.load %arg1[%c0, %c0_0, %c0_1] : memref<2x256x128xbf16, #tpu.memory_space<vmem>>, vector<1x256x128xbf16>
    %1 = vector.shape_cast %0 : vector<1x256x128xbf16> to vector<256x128xbf16>
    %c1 = arith.constant 1 : index
    %c0_2 = arith.constant 0 : index
    %c0_3 = arith.constant 0 : index
    %2 = vector.load %arg1[%c1, %c0_2, %c0_3] : memref<2x256x128xbf16, #tpu.memory_space<vmem>>, vector<1x256x128xbf16>
    %3 = vector.shape_cast %2 : vector<1x256x128xbf16> to vector<256x128xbf16>
    %c1_4 = arith.constant 1 : index
    %c0_5 = arith.constant 0 : index
    %c0_6 = arith.constant 0 : index
    %c0_7 = arith.constant 0 : index
    %4 = vector.load %arg2[%c1_4, %c0_5, %c0_6, %c0_7] : memref<4x2x128x128xbf16, #tpu.memory_space<vmem>>, vector<1x1x128x128xbf16>
    %5 = vector.shape_cast %4 : vector<1x1x128x128xbf16> to vector<128x128xbf16>
    %c1_8 = arith.constant 1 : index
    %c1_9 = arith.constant 1 : index
    %c0_10 = arith.constant 0 : index
    %c0_11 = arith.constant 0 : index
    %6 = vector.load %arg2[%c1_8, %c1_9, %c0_10, %c0_11] : memref<4x2x128x128xbf16, #tpu.memory_space<vmem>>, vector<1x1x128x128xbf16>
    %7 = vector.shape_cast %6 : vector<1x1x128x128xbf16> to vector<128x128xbf16>
    %cst = arith.constant dense<0.000000e+00> : vector<256x128xf32>
    %8 = tpu.matmul %1, %5, %cst {dimension_numbers = #tpu.dot_dimension_numbers<[1], [0], [0], [1], [0, 0, 1, 1], [], []>} : vector<256x128xbf16>, vector<128x128xbf16>, vector<256x128xf32> -> vector<256x128xf32>
    %cst_12 = arith.constant dense<0.000000e+00> : vector<256x128xf32>
    %9 = tpu.matmul %3, %7, %cst_12 {dimension_numbers = #tpu.dot_dimension_numbers<[1], [0], [0], [1], [0, 0, 1, 1], [], []>} : vector<256x128xbf16>, vector<128x128xbf16>, vector<256x128xf32> -> vector<256x128xf32>
    %10 = arith.subf %8, %9 : vector<256x128xf32>
    %11 = arith.truncf %10 : vector<256x128xf32> to vector<256x128xbf16>
    %c0_13 = arith.constant 0 : index
    %c0_14 = arith.constant 0 : index
    %12 = vector.load %arg5[%c0_13, %c0_14] : memref<256x128xbf16, #tpu.memory_space<vmem>>, vector<256x128xbf16>
    tpu.vector_store %arg5[%c0_13, %c0_14], %11 {strides = array<i32>} : memref<256x128xbf16, #tpu.memory_space<vmem>>, vector<256x128xbf16>,
    %cst_15 = arith.constant dense<0.000000e+00> : vector<256x128xf32>
    %13 = tpu.matmul %1, %7, %cst_15 {dimension_numbers = #tpu.dot_dimension_numbers<[1], [0], [0], [1], [0, 0, 1, 1], [], []>} : vector<256x128xbf16>, vector<128x128xbf16>, vector<256x128xf32> -> vector<256x128xf32>
    %cst_16 = arith.constant dense<0.000000e+00> : vector<256x128xf32>
    %14 = tpu.matmul %3, %5, %cst_16 {dimension_numbers = #tpu.dot_dimension_numbers<[1], [0], [0], [1], [0, 0, 1, 1], [], []>} : vector<256x128xbf16>, vector<128x128xbf16>, vector<256x128xf32> -> vector<256x128xf32>
    %15 = arith.addf %13, %14 : vector<256x128xf32>
    %16 = arith.truncf %15 : vector<256x128xf32> to vector<256x128xbf16>
    %c0_17 = arith.constant 0 : index
    %c0_18 = arith.constant 0 : index
    %17 = vector.load %arg6[%c0_17, %c0_18] : memref<256x128xbf16, #tpu.memory_space<vmem>>, vector<256x128xbf16>
    tpu.vector_store %arg6[%c0_17, %c0_18], %16 {strides = array<i32>} : memref<256x128xbf16, #tpu.memory_space<vmem>>, vector<256x128xbf16>,
    %c0_19 = arith.constant 0 : index
    %c0_20 = arith.constant 0 : index
    %c0_21 = arith.constant 0 : index
    %c0_22 = arith.constant 0 : index
    %18 = vector.load %arg2[%c0_19, %c0_20, %c0_21, %c0_22] : memref<4x2x128x128xbf16, #tpu.memory_space<vmem>>, vector<1x1x128x128xbf16>
    %19 = vector.shape_cast %18 : vector<1x1x128x128xbf16> to vector<128x128xbf16>
    %c0_23 = arith.constant 0 : index
    %c1_24 = arith.constant 1 : index
    %c0_25 = arith.constant 0 : index
    %c0_26 = arith.constant 0 : index
    %20 = vector.load %arg2[%c0_23, %c1_24, %c0_25, %c0_26] : memref<4x2x128x128xbf16, #tpu.memory_space<vmem>>, vector<1x1x128x128xbf16>
    %21 = vector.shape_cast %20 : vector<1x1x128x128xbf16> to vector<128x128xbf16>
    %c2 = arith.constant 2 : index
    %c0_27 = arith.constant 0 : index
    %c0_28 = arith.constant 0 : index
    %c0_29 = arith.constant 0 : index
    %22 = vector.load %arg2[%c2, %c0_27, %c0_28, %c0_29] : memref<4x2x128x128xbf16, #tpu.memory_space<vmem>>, vector<1x1x128x128xbf16>
    %23 = vector.shape_cast %22 : vector<1x1x128x128xbf16> to vector<128x128xbf16>
    %c2_30 = arith.constant 2 : index
    %c1_31 = arith.constant 1 : index
    %c0_32 = arith.constant 0 : index
    %c0_33 = arith.constant 0 : index
    %24 = vector.load %arg2[%c2_30, %c1_31, %c0_32, %c0_33] : memref<4x2x128x128xbf16, #tpu.memory_space<vmem>>, vector<1x1x128x128xbf16>
    %25 = vector.shape_cast %24 : vector<1x1x128x128xbf16> to vector<128x128xbf16>
    %c0_34 = arith.constant 0 : index
    %c0_35 = arith.constant 0 : index
    %c0_36 = arith.constant 0 : index
    %26 = vector.load %arg3[%c0_34, %c0_35, %c0_36] : memref<2x128x128xf32, #tpu.memory_space<vmem>>, vector<1x128x128xf32>
    %27 = vector.shape_cast %26 : vector<1x128x128xf32> to vector<128x128xf32>
    %c1_37 = arith.constant 1 : index
    %c0_38 = arith.constant 0 : index
    %c0_39 = arith.constant 0 : index
    %28 = vector.load %arg3[%c1_37, %c0_38, %c0_39] : memref<2x128x128xf32, #tpu.memory_space<vmem>>, vector<1x128x128xf32>
    %29 = vector.shape_cast %28 : vector<1x128x128xf32> to vector<128x128xf32>
    %c0_i32 = arith.constant 0 : i32
    %c128_i32 = arith.constant 128 : i32
    %30 = arith.muli %c0_i32, %c128_i32 : i32
    %31 = tpu.assume_multiple %30, 128 : i32
    %32 = arith.index_cast %31 : i32 to index
    %c0_40 = arith.constant 0 : index
    %33 = vector.load %arg5[%32, %c0_40] : memref<256x128xbf16, #tpu.memory_space<vmem>>, vector<128x128xbf16>
    %34 = arith.index_cast %31 : i32 to index
    %c0_41 = arith.constant 0 : index
    %35 = vector.load %arg6[%34, %c0_41] : memref<256x128xbf16, #tpu.memory_space<vmem>>, vector<128x128xbf16>
    %cst_42 = arith.constant dense<0.000000e+00> : vector<128x128xf32>
    %36 = tpu.matmul %19, %33, %cst_42 {dimension_numbers = #tpu.dot_dimension_numbers<[1], [0], [0], [1], [0, 0, 1, 1], [], []>} : vector<128x128xbf16>, vector<128x128xbf16>, vector<128x128xf32> -> vector<128x128xf32>
    %cst_43 = arith.constant dense<0.000000e+00> : vector<128x128xf32>
    %37 = tpu.matmul %21, %35, %cst_43 {dimension_numbers = #tpu.dot_dimension_numbers<[1], [0], [0], [1], [0, 0, 1, 1], [], []>} : vector<128x128xbf16>, vector<128x128xbf16>, vector<128x128xf32> -> vector<128x128xf32>
    %38 = arith.subf %36, %37 : vector<128x128xf32>
    %cst_44 = arith.constant dense<0.000000e+00> : vector<128x128xf32>
    %39 = tpu.matmul %19, %35, %cst_44 {dimension_numbers = #tpu.dot_dimension_numbers<[1], [0], [0], [1], [0, 0, 1, 1], [], []>} : vector<128x128xbf16>, vector<128x128xbf16>, vector<128x128xf32> -> vector<128x128xf32>
    %cst_45 = arith.constant dense<0.000000e+00> : vector<128x128xf32>
    %40 = tpu.matmul %21, %33, %cst_45 {dimension_numbers = #tpu.dot_dimension_numbers<[1], [0], [0], [1], [0, 0, 1, 1], [], []>} : vector<128x128xbf16>, vector<128x128xbf16>, vector<128x128xf32> -> vector<128x128xf32>
    %41 = arith.addf %39, %40 : vector<128x128xf32>
    %42 = arith.mulf %27, %38 : vector<128x128xf32>
    %43 = arith.mulf %29, %41 : vector<128x128xf32>
    %44 = arith.subf %42, %43 : vector<128x128xf32>
    %45 = arith.truncf %44 : vector<128x128xf32> to vector<128x128xbf16>
    %46 = arith.mulf %27, %41 : vector<128x128xf32>
    %47 = arith.mulf %29, %38 : vector<128x128xf32>
    %48 = arith.addf %46, %47 : vector<128x128xf32>
    %49 = arith.truncf %48 : vector<128x128xf32> to vector<128x128xbf16>
    %cst_46 = arith.constant dense<0.000000e+00> : vector<128x128xf32>
    %50 = tpu.matmul %23, %45, %cst_46 {dimension_numbers = #tpu.dot_dimension_numbers<[1], [0], [0], [1], [0, 0, 1, 1], [], []>} : vector<128x128xbf16>, vector<128x128xbf16>, vector<128x128xf32> -> vector<128x128xf32>
    %cst_47 = arith.constant dense<0.000000e+00> : vector<128x128xf32>
    %51 = tpu.matmul %25, %49, %cst_47 {dimension_numbers = #tpu.dot_dimension_numbers<[1], [0], [0], [1], [0, 0, 1, 1], [], []>} : vector<128x128xbf16>, vector<128x128xbf16>, vector<128x128xf32> -> vector<128x128xf32>
    %52 = arith.subf %50, %51 : vector<128x128xf32>
    %53 = arith.truncf %52 : vector<128x128xf32> to vector<128x128xbf16>
    %54 = arith.index_cast %31 : i32 to index
    %c0_48 = arith.constant 0 : index
    %55 = vector.load %arg7[%54, %c0_48] : memref<256x128xbf16, #tpu.memory_space<vmem>>, vector<128x128xbf16>
    tpu.vector_store %arg7[%54, %c0_48], %53 {strides = array<i32>} : memref<256x128xbf16, #tpu.memory_space<vmem>>, vector<128x128xbf16>,
    %cst_49 = arith.constant dense<0.000000e+00> : vector<128x128xf32>
    %56 = tpu.matmul %23, %49, %cst_49 {dimension_numbers = #tpu.dot_dimension_numbers<[1], [0], [0], [1], [0, 0, 1, 1], [], []>} : vector<128x128xbf16>, vector<128x128xbf16>, vector<128x128xf32> -> vector<128x128xf32>
    %cst_50 = arith.constant dense<0.000000e+00> : vector<128x128xf32>
    %57 = tpu.matmul %25, %45, %cst_50 {dimension_numbers = #tpu.dot_dimension_numbers<[1], [0], [0], [1], [0, 0, 1, 1], [], []>} : vector<128x128xbf16>, vector<128x128xbf16>, vector<128x128xf32> -> vector<128x128xf32>
    %58 = arith.addf %56, %57 : vector<128x128xf32>
    %59 = arith.truncf %58 : vector<128x128xf32> to vector<128x128xbf16>
    %60 = arith.index_cast %31 : i32 to index
    %c0_51 = arith.constant 0 : index
    %61 = vector.load %arg8[%60, %c0_51] : memref<256x128xbf16, #tpu.memory_space<vmem>>, vector<128x128xbf16>
    tpu.vector_store %arg8[%60, %c0_51], %59 {strides = array<i32>} : memref<256x128xbf16, #tpu.memory_space<vmem>>, vector<128x128xbf16>,
    %c1_i32 = arith.constant 1 : i32
    %c128_i32_52 = arith.constant 128 : i32
    %62 = arith.muli %c1_i32, %c128_i32_52 : i32
    %63 = tpu.assume_multiple %62, 128 : i32
    %64 = arith.index_cast %63 : i32 to index
    %c0_53 = arith.constant 0 : index
    %65 = vector.load %arg5[%64, %c0_53] : memref<256x128xbf16, #tpu.memory_space<vmem>>, vector<128x128xbf16>
    %66 = arith.index_cast %63 : i32 to index
    %c0_54 = arith.constant 0 : index
    %67 = vector.load %arg6[%66, %c0_54] : memref<256x128xbf16, #tpu.memory_space<vmem>>, vector<128x128xbf16>
    %cst_55 = arith.constant dense<0.000000e+00> : vector<128x128xf32>
    %68 = tpu.matmul %19, %65, %cst_55 {dimension_numbers = #tpu.dot_dimension_numbers<[1], [0], [0], [1], [0, 0, 1, 1], [], []>} : vector<128x128xbf16>, vector<128x128xbf16>, vector<128x128xf32> -> vector<128x128xf32>
    %cst_56 = arith.constant dense<0.000000e+00> : vector<128x128xf32>
    %69 = tpu.matmul %21, %67, %cst_56 {dimension_numbers = #tpu.dot_dimension_numbers<[1], [0], [0], [1], [0, 0, 1, 1], [], []>} : vector<128x128xbf16>, vector<128x128xbf16>, vector<128x128xf32> -> vector<128x128xf32>
    %70 = arith.subf %68, %69 : vector<128x128xf32>
    %cst_57 = arith.constant dense<0.000000e+00> : vector<128x128xf32>
    %71 = tpu.matmul %19, %67, %cst_57 {dimension_numbers = #tpu.dot_dimension_numbers<[1], [0], [0], [1], [0, 0, 1, 1], [], []>} : vector<128x128xbf16>, vector<128x128xbf16>, vector<128x128xf32> -> vector<128x128xf32>
    %cst_58 = arith.constant dense<0.000000e+00> : vector<128x128xf32>
    %72 = tpu.matmul %21, %65, %cst_58 {dimension_numbers = #tpu.dot_dimension_numbers<[1], [0], [0], [1], [0, 0, 1, 1], [], []>} : vector<128x128xbf16>, vector<128x128xbf16>, vector<128x128xf32> -> vector<128x128xf32>
    %73 = arith.addf %71, %72 : vector<128x128xf32>
    %74 = arith.mulf %27, %70 : vector<128x128xf32>
    %75 = arith.mulf %29, %73 : vector<128x128xf32>
    %76 = arith.subf %74, %75 : vector<128x128xf32>
    %77 = arith.truncf %76 : vector<128x128xf32> to vector<128x128xbf16>
    %78 = arith.mulf %27, %73 : vector<128x128xf32>
    %79 = arith.mulf %29, %70 : vector<128x128xf32>
    %80 = arith.addf %78, %79 : vector<128x128xf32>
    %81 = arith.truncf %80 : vector<128x128xf32> to vector<128x128xbf16>
    %cst_59 = arith.constant dense<0.000000e+00> : vector<128x128xf32>
    %82 = tpu.matmul %23, %77, %cst_59 {dimension_numbers = #tpu.dot_dimension_numbers<[1], [0], [0], [1], [0, 0, 1, 1], [], []>} : vector<128x128xbf16>, vector<128x128xbf16>, vector<128x128xf32> -> vector<128x128xf32>
    %cst_60 = arith.constant dense<0.000000e+00> : vector<128x128xf32>
    %83 = tpu.matmul %25, %81, %cst_60 {dimension_numbers = #tpu.dot_dimension_numbers<[1], [0], [0], [1], [0, 0, 1, 1], [], []>} : vector<128x128xbf16>, vector<128x128xbf16>, vector<128x128xf32> -> vector<128x128xf32>
    %84 = arith.subf %82, %83 : vector<128x128xf32>
    %85 = arith.truncf %84 : vector<128x128xf32> to vector<128x128xbf16>
    %86 = arith.index_cast %63 : i32 to index
    %c0_61 = arith.constant 0 : index
    %87 = vector.load %arg7[%86, %c0_61] : memref<256x128xbf16, #tpu.memory_space<vmem>>, vector<128x128xbf16>
    tpu.vector_store %arg7[%86, %c0_61], %85 {strides = array<i32>} : memref<256x128xbf16, #tpu.memory_space<vmem>>, vector<128x128xbf16>,
    %cst_62 = arith.constant dense<0.000000e+00> : vector<128x128xf32>
    %88 = tpu.matmul %23, %81, %cst_62 {dimension_numbers = #tpu.dot_dimension_numbers<[1], [0], [0], [1], [0, 0, 1, 1], [], []>} : vector<128x128xbf16>, vector<128x128xbf16>, vector<128x128xf32> -> vector<128x128xf32>
    %cst_63 = arith.constant dense<0.000000e+00> : vector<128x128xf32>
    %89 = tpu.matmul %25, %77, %cst_63 {dimension_numbers = #tpu.dot_dimension_numbers<[1], [0], [0], [1], [0, 0, 1, 1], [], []>} : vector<128x128xbf16>, vector<128x128xbf16>, vector<128x128xf32> -> vector<128x128xf32>
    %90 = arith.addf %88, %89 : vector<128x128xf32>
    %91 = arith.truncf %90 : vector<128x128xf32> to vector<128x128xbf16>
    %92 = arith.index_cast %63 : i32 to index
    %c0_64 = arith.constant 0 : index
    %93 = vector.load %arg8[%92, %c0_64] : memref<256x128xbf16, #tpu.memory_space<vmem>>, vector<128x128xbf16>
    tpu.vector_store %arg8[%92, %c0_64], %91 {strides = array<i32>} : memref<256x128xbf16, #tpu.memory_space<vmem>>, vector<128x128xbf16>,
    %c2_i32 = arith.constant 2 : i32
    %c0_65 = arith.constant 0 : index
    %c0_66 = arith.constant 0 : index
    %94 = vector.load %arg7[%c0_65, %c0_66] : memref<256x128xbf16, #tpu.memory_space<vmem>>, vector<256x128xbf16>
    %c0_67 = arith.constant 0 : index
    %c0_68 = arith.constant 0 : index
    %95 = vector.load %arg8[%c0_67, %c0_68] : memref<256x128xbf16, #tpu.memory_space<vmem>>, vector<256x128xbf16>
    %c3 = arith.constant 3 : index
    %c0_69 = arith.constant 0 : index
    %c0_70 = arith.constant 0 : index
    %c0_71 = arith.constant 0 : index
    %96 = vector.load %arg2[%c3, %c0_69, %c0_70, %c0_71] : memref<4x2x128x128xbf16, #tpu.memory_space<vmem>>, vector<1x1x128x128xbf16>
    %97 = vector.shape_cast %96 : vector<1x1x128x128xbf16> to vector<128x128xbf16>
    %c3_72 = arith.constant 3 : index
    %c1_73 = arith.constant 1 : index
    %c0_74 = arith.constant 0 : index
    %c0_75 = arith.constant 0 : index
    %98 = vector.load %arg2[%c3_72, %c1_73, %c0_74, %c0_75] : memref<4x2x128x128xbf16, #tpu.memory_space<vmem>>, vector<1x1x128x128xbf16>
    %99 = vector.shape_cast %98 : vector<1x1x128x128xbf16> to vector<128x128xbf16>
    %cst_76 = arith.constant dense<0.000000e+00> : vector<256x128xf32>
    %100 = tpu.matmul %94, %97, %cst_76 {dimension_numbers = #tpu.dot_dimension_numbers<[1], [0], [0], [1], [0, 0, 1, 1], [], []>} : vector<256x128xbf16>, vector<128x128xbf16>, vector<256x128xf32> -> vector<256x128xf32>
    %cst_77 = arith.constant dense<0.000000e+00> : vector<256x128xf32>
    %101 = tpu.matmul %95, %99, %cst_77 {dimension_numbers = #tpu.dot_dimension_numbers<[1], [0], [0], [1], [0, 0, 1, 1], [], []>} : vector<256x128xbf16>, vector<128x128xbf16>, vector<256x128xf32> -> vector<256x128xf32>
    %102 = arith.subf %100, %101 : vector<256x128xf32>
    %103 = arith.truncf %102 : vector<256x128xf32> to vector<256x128xbf16>
    %c0_78 = arith.constant 0 : index
    %c0_79 = arith.constant 0 : index
    %c0_80 = arith.constant 0 : index
    %104 = vector.load %arg4[%c0_78, %c0_79, %c0_80] : memref<2x256x128xbf16, #tpu.memory_space<vmem>>, vector<1x256x128xbf16>
    %105 = vector.shape_cast %104 : vector<1x256x128xbf16> to vector<256x128xbf16>
    %106 = vector.shape_cast %103 : vector<256x128xbf16> to vector<1x256x128xbf16>
    tpu.vector_store %arg4[%c0_78, %c0_79, %c0_80], %106 {strides = array<i32>} : memref<2x256x128xbf16, #tpu.memory_space<vmem>>, vector<1x256x128xbf16>,
    %cst_81 = arith.constant dense<0.000000e+00> : vector<256x128xf32>
    %107 = tpu.matmul %94, %99, %cst_81 {dimension_numbers = #tpu.dot_dimension_numbers<[1], [0], [0], [1], [0, 0, 1, 1], [], []>} : vector<256x128xbf16>, vector<128x128xbf16>, vector<256x128xf32> -> vector<256x128xf32>
    %cst_82 = arith.constant dense<0.000000e+00> : vector<256x128xf32>
    %108 = tpu.matmul %95, %97, %cst_82 {dimension_numbers = #tpu.dot_dimension_numbers<[1], [0], [0], [1], [0, 0, 1, 1], [], []>} : vector<256x128xbf16>, vector<128x128xbf16>, vector<256x128xf32> -> vector<256x128xf32>
    %109 = arith.addf %107, %108 : vector<256x128xf32>
    %110 = arith.truncf %109 : vector<256x128xf32> to vector<256x128xbf16>
    %c1_83 = arith.constant 1 : index
    %c0_84 = arith.constant 0 : index
    %c0_85 = arith.constant 0 : index
    %111 = vector.load %arg4[%c1_83, %c0_84, %c0_85] : memref<2x256x128xbf16, #tpu.memory_space<vmem>>, vector<1x256x128xbf16>
    %112 = vector.shape_cast %111 : vector<1x256x128xbf16> to vector<256x128xbf16>
    %113 = vector.shape_cast %110 : vector<256x128xbf16> to vector<1x256x128xbf16>
    tpu.vector_store %arg4[%c1_83, %c0_84, %c0_85], %113 {strides = array<i32>} : memref<2x256x128xbf16, #tpu.memory_space<vmem>>, vector<1x256x128xbf16>,
    return
  }
  func.func @transform_0(%arg0: i32) -> (i32, i32, i32) {
    %c0_i32 = arith.constant 0 : i32
    %c0_i32_0 = arith.constant 0 : i32
    %c0_i32_1 = arith.constant 0 : i32
    return %c0_i32, %arg0, %c0_i32_0 : i32, i32, i32
  }
  func.func @transform_1(%arg0: i32) -> (i32, i32, i32, i32) {
    %c0_i32 = arith.constant 0 : i32
    %c0_i32_0 = arith.constant 0 : i32
    %c0_i32_1 = arith.constant 0 : i32
    %c0_i32_2 = arith.constant 0 : i32
    %c0_i32_3 = arith.constant 0 : i32
    return %c0_i32, %c0_i32_0, %c0_i32_1, %c0_i32_2 : i32, i32, i32, i32
  }
  func.func @transform_2(%arg0: i32) -> (i32, i32, i32) {
    %c0_i32 = arith.constant 0 : i32
    %c0_i32_0 = arith.constant 0 : i32
    %c0_i32_1 = arith.constant 0 : i32
    %c0_i32_2 = arith.constant 0 : i32
    return %c0_i32, %c0_i32_0, %c0_i32_1 : i32, i32, i32
  }
  func.func @transform_3(%arg0: i32) -> (i32, i32, i32) {
    %c0_i32 = arith.constant 0 : i32
    %c0_i32_0 = arith.constant 0 : i32
    %c0_i32_1 = arith.constant 0 : i32
    return %c0_i32, %arg0, %c0_i32_0 : i32, i32, i32
  }
}

</mosaic_0001>

<bundles_post_ra>
// kernel: tpu_custom_call.1
= control target key start
LH: loop header
LB: loop body
LE: loop exit
PB: predicated region body
PF: predicated region fallthrough
CT: control target
= control target key end

     0   :  { %8 = vsyncpa [#allocation7], 0  ;;  %s6308_s0 = inlined_call_operand.hbm [shape: bf16[2,512,128], index: 0, kind: input, shape index: {}]   ;;  %s6309_s1 = inlined_call_operand.hbm [shape: bf16[4,2,128,128], index: 1, kind: input, shape index: {}]   ;;  %s6310_s2 = inlined_call_operand.hbm [shape: f32[2,128,128], index: 2, kind: input, shape index: {}]   ;;  %s6311_s3 = inlined_call_operand.hbm [shape: bf16[2,512,128], index: 3, kind: output, shape index: {}]  }
   0x1   :  { %10 = vsyncpa [#allocation7 + $0x1], 0 }
   0x2   :  { %11 = vsyncpa [#allocation10], 0 }
   0x3   :  { %12 = vsyncpa [#allocation8], 0 }
   0x4   :  { %14 = vsyncpa [#allocation8 + $0x1], 0  ;;  %s5671_s12 = smov 0   ;;  %s5673_s13 = smov 0  }
   0x5   :  { %s5675_s14 = smov 0   ;;  %s5677_s15 = smov 0  }
   0x6 LB: > { %s5692_s16 = sadd.s32 4294967295, %s5630_s15   ;;  %s3940_s17 = sadd.s32 4294967294, %s5630_s15   ;;  %s5630_s15 = sphi %s5677_s15, %s6501_s15   ;;  %s5626_s14 = sphi %s5675_s14, %s6500_s14   ;;  %s5622_s13 = sphi %s5673_s13, %s6499_s13   ;;  %s5618_s12 = sphi %s5671_s12, %s6498_s12  }
   0x7   : > { %s5696_s18 = sadd.s32 1, %s5630_s15   ;;  %s27_s19 = sadd.s32 1, %s5626_s14 }
   0x8   : > { %s24_s20 = ssub.s32 %s5630_s15, %s5696_s18  ;;  %p34_p0 = scmp.ne.s32.totalorder %s5626_s14, %s5622_s13 }
   0x9   : > { %p25_p1 = scmp.eq.s32.totalorder %s24_s20, 0  ;;  %p35_p2 = scmp.eq.s32.totalorder %s5630_s15, 0 }
   0xa   : > { %p40_p3 = scmp.ne.s32.totalorder %s5622_s13, %s5618_s12  ;;  %p41_p4 = scmp.eq.s32.totalorder %s5692_s16, 0 }
   0xb   : > { %s5708_s21 = scalar_select %p25_p1, %s5626_s14, %s27_s19  }
   0xc   : > { %p5710_p5 = por %p35_p2, %p34_p0  ;;  %p5716_p6 = por %p41_p4, %p40_p3 }
   0xd   : > { %p106_p7 = scmp.eq.s32.totalorder %s5692_s16, 1  ;;  %p112_p8 = scmp.eq.s32.totalorder %s3940_s17, 1 }
   0xe   : > { %p3941_p9 = scmp.ge.s32.totalorder %s5630_s15, 1  ;;  %p119_p10 = scmp.lt.s32.totalorder %s5630_s15, 3 }
   0xf   : > { %p5723_p11 = por %p106_p7, %p34_p0  ;;  %p5727_p12 = por %p112_p8, %p40_p3 }
  0x10   : > { %p5731_p13 = pnand %p3941_p9, %p119_p10  ;;  %s130_s29 = sshll.u32 %s6309_s1, 4  ;;  %s131_s29 = int_to_ptr.hbm [resolvable:$true] %s130_s29 }
  0x11   : > { %s5632_s30 = smov [#allocation9]   ;;  %s144_s7 = sshll.u32 %s6310_s2, 4  ;;  %s145_s7 = int_to_ptr.hbm [resolvable:$true] %s144_s7 }
  0x12   : > { %p5420_p1 = pneg %p5731_p13  ;;  %s132_s4 = sshll.u32 %s5632_s30, 4  ;;  %s133_s4 = int_to_ptr.vmem [resolvable:$true] %s132_s4 }
  0x13   : > { %s5633_s8 = smov 64   ;;  %s5634_s9 = smov 4  }
  0x14   : > { %p5421_p0 = pnand %p5420_p1, %p41_p4  ;;  %s5635_s10 = smov [#allocation11]  }
  0x15   : > { %s146_s11 = sshll.u32 %s5635_s10, 4  ;;  %s5636_s17 = smov 128   ;;  %s147_s11 = int_to_ptr.vmem [resolvable:$true] %s146_s11 }
  0x16   : > { %5423 = dma.hbm_to_vmem [thread:$0]  (!%p5421_p0), %s131_s29, 8192, %s133_s4, [#allocation10], %s5633_s8, %s5633_s8, %s5634_s9  }
  0x17   : > { %s5637_s19 = smov 8   ;;  %p3944_p2 = scmp.ge.s32.totalorder %s5630_s15, 2 }
  0x18   : > { %5426 = dma.hbm_to_vmem [thread:$0]  (!%p5421_p0), %s145_s7, 4096, %s147_s11, [#allocation10], %s5636_s17, %s5636_s17, %s5637_s19  }
  0x19   : > { %156 = sbr.rel (%p3944_p2) target bundleno = 44 (0x2c), region = 24 }
  0x1e   : > { %s160_s20 = sand.u32 1, %s5626_s14   ;;  %s4664_s27 = sshll.u32 %s5630_s15, 7 }
  0x1f   : > { %s3945_s28 = sshll.u32 %s160_s20, 8  ;;  %s169_s4 = scalar_lea.hbm %s6308_s0, %s4664_s27 }
  0x20   : > { %s5399_s5 = scalar_select %p5710_p5, [#allocation0], [#allocation17] }
  0x21   : > { %s182_s6 = sshll.u32 %s169_s4, 4  ;;  %s164_s7 = scalar_lea.vmem [#allocation6], %s3945_s28  ;;  %s183_s6 = int_to_ptr.hbm [resolvable:$true] %s182_s6 }
  0x22   : > { %s184_s8 = sshll.u32 %s164_s7, 4  ;;  %s174_s9 = sld [smem:[%s5399_s5]]   ;;  %s185_s8 = int_to_ptr.vmem [resolvable:$true] %s184_s8 }
  0x23   : > { %s5638_s10 = smov 4096   ;;  %s5639_s11 = smov 2048  }
  0x24   : > { %5400 = sst [smem:[#allocation14]] (%p5710_p5), %s5638_s10  ;;  %s5640_s17 = smov 32  }
  0x25   : > { %5401 = sst [smem:[#allocation14 + $0x1]] (%p5710_p5), %s5639_s11  ;;  %s5641_s19 = smov 64  }
  0x26   : > { %5402 = sst [smem:[#allocation14 + $0x2]] (%p5710_p5), %s5640_s17  ;;  %s5642_s29 = smov 4  }
  0x27   : > { %5403 = sst [smem:[#allocation14 + $0x3]] (%p5710_p5), %s5641_s19  ;;  %s161_s30 = scalar_lea.sflag [#allocation7], %s160_s20 }
  0x28   : > { %s3948_s27 = sshll.u32 %s174_s9, 26  ;;  %5404 = sst [smem:[#allocation14 + $0x4]] (%p5710_p5), %s5641_s19 }
  0x29   : > { %s3949_s28 = sadd.s32 134217728, %s3948_s27  ;;  %5405 = sst [smem:[#allocation14 + $0x5]] (%p5710_p5), %s5642_s29 }
  0x2a   : > { %s5643_s4 = smov [#allocation13]  }
  0x2b   : > { %5406 = dma.general (%p5710_p5), %s183_s6, 4096, %s185_s8, %s161_s30, %s5643_s4, [#allocation14], %s3949_s28, 0  }
  0x2c PF: > { %209 = sbr.rel (%p5731_p13) target bundleno = 1620 (0x654), region = 32 }
  0x31   : > { %s5772_s5 = sand.u32 1, %s5622_s13  }
  0x32   : > { %s3951_s7 = sshll.u32 %s5772_s5, 8  ;;  %s212_s9 = scalar_lea.sflag [#allocation7], %s5772_s5 }
  0x33   : > { %s5778_s10 = scalar_lea.vmem [#allocation6], %s3951_s7 }
  0x34   : > { %5605 = dma.done.wait (%p5716_p6), %s212_s9, 4096  }
  0x35   : > { %5607 = vsyncadd (%p5716_p6), %s212_s9, 4294963200 }
  0x36   : > { %5609 = dma.done.wait (%p41_p4), [#allocation10], 12288  }
  0x37   : > { %5611 = vsyncadd (%p41_p4), [#allocation10], 4294955008  ;;  %v4704_v0 = vld [vmem:[#allocation9 + $0xb8] sm:$0xff]  ;;  %v4703_v2 = vld [vmem:[#allocation9 + $0xb0] sm:$0xff]  ;;  %s6236_s22 = scalar_lea.vmem [#allocation12], %s3951_s7  ;;  %s3810_s23 = scalar_lea.sflag [#allocation8], %s5772_s5 }
  0x38   : > { %v4712_v1 = vld [vmem:[#allocation9 + $0xf8] sm:$0xff]  ;;  %494 = vmatpush.bf16.msra.mxu0 %v4704_v0  ;;  %v4711_v3 = vld [vmem:[#allocation9 + $0xf0] sm:$0xff]  ;;  %912 = vmatpush.bf16.msra.mxu2 %v4704_v0  ;;  %v4702_v4 = vld [vmem:[#allocation9 + $0xa8] sm:$0xff] }
  0x39   : > { %727 = vmatpush.bf16.msra.mxu1 %v4712_v1  ;;  %1001 = vmatpush.bf16.msra.mxu3 %v4712_v1  ;;  %v4710_v5 = vld [vmem:[#allocation9 + $0xe8] sm:$0xff]  ;;  %v4701_v6 = vld [vmem:[#allocation9 + $0xa0] sm:$0xff]  ;;  %v4700_v8 = vld [vmem:[#allocation9 + $0x98] sm:$0xff] }
  0x3a   : > { %v4709_v7 = vld [vmem:[#allocation9 + $0xe0] sm:$0xff]  ;;  %v4708_v9 = vld [vmem:[#allocation9 + $0xd8] sm:$0xff]  ;;  %v4699_v10 = vld [vmem:[#allocation9 + $0x90] sm:$0xff] }
  0x3b   : > { %v4707_v11 = vld [vmem:[#allocation9 + $0xd0] sm:$0xff]  ;;  %v4698_v12 = vld [vmem:[#allocation9 + $0x88] sm:$0xff]  ;;  %v4697_v14 = vld [vmem:[#allocation9 + $0x80] sm:$0xff] }
  0x3c   : > { %495 = vmatpush.bf16.msra.mxu0 %v4703_v2  ;;  %913 = vmatpush.bf16.msra.mxu2 %v4703_v2  ;;  %v4706_v13 = vld [vmem:[#allocation9 + $0xc8] sm:$0xff]  ;;  %v4705_v15 = vld [vmem:[#allocation9 + $0xc0] sm:$0xff]  ;;  %v4667_v20 = vld [vmem:[%s5778_s10 + $0x10] sm:$0xff] }
  0x3d   : > { %728 = vmatpush.bf16.msra.mxu1 %v4711_v3  ;;  %1002 = vmatpush.bf16.msra.mxu3 %v4711_v3  ;;  %v4665_v16 = vld [vmem:[%s5778_s10] sm:$0xff]  ;;  %v4666_v18 = vld [vmem:[%s5778_s10 + $0x8] sm:$0xff]  ;;  %v4683_v21 = vld [vmem:[%s5778_s10 + $0x90] sm:$0xff] }
  0x3e   : > { %v4681_v17 = vld [vmem:[%s5778_s10 + $0x80] sm:$0xff]  ;;  %v4682_v19 = vld [vmem:[%s5778_s10 + $0x88] sm:$0xff]  ;;  %v4668_v22 = vld [vmem:[%s5778_s10 + $0x18] sm:$0xff] }
  0x3f   : > { %v4684_v23 = vld [vmem:[%s5778_s10 + $0x98] sm:$0xff]  ;;  %v4669_v24 = vld [vmem:[%s5778_s10 + $0x20] sm:$0xff]  ;;  %v4670_v26 = vld [vmem:[%s5778_s10 + $0x28] sm:$0xff] }
  0x40   : > { %496 = vmatpush.bf16.msra.mxu0 %v4702_v4  ;;  %914 = vmatpush.bf16.msra.mxu2 %v4702_v4  ;;  %v4685_v25 = vld [vmem:[%s5778_s10 + $0xa0] sm:$0xff]  ;;  %v4686_v27 = vld [vmem:[%s5778_s10 + $0xa8] sm:$0xff]  ;;  %v4671_v28 = vld [vmem:[%s5778_s10 + $0x30] sm:$0xff] }
  0x41   : > { %729 = vmatpush.bf16.msra.mxu1 %v4710_v5  ;;  %1003 = vmatpush.bf16.msra.mxu3 %v4710_v5  ;;  %v4687_v29 = vld [vmem:[%s5778_s10 + $0xb0] sm:$0xff]  ;;  %v4672_v30 = vld [vmem:[%s5778_s10 + $0x38] sm:$0xff]  ;;  %v4689_v34 = vld [vmem:[%s5778_s10 + $0xc0] sm:$0xff] }
  0x42   : > { %v4688_v31 = vld [vmem:[%s5778_s10 + $0xb8] sm:$0xff]  ;;  %v4673_v35 = vld [vmem:[%s5778_s10 + $0x40] sm:$0xff]  ;;  %v4690_v50 = vld [vmem:[%s5778_s10 + $0xc8] sm:$0xff] }
  0x43   : > { %v4674_v51 = vld [vmem:[%s5778_s10 + $0x48] sm:$0xff]  ;;  %v4691_v2 = vld [vmem:[%s5778_s10 + $0xd0] sm:$0xff] }
  0x44   : > { %497 = vmatpush.bf16.msra.mxu0 %v4701_v6  ;;  %915 = vmatpush.bf16.msra.mxu2 %v4701_v6  ;;  %v4675_v3 = vld [vmem:[%s5778_s10 + $0x50] sm:$0xff] }
  0x45   : > { %730 = vmatpush.bf16.msra.mxu1 %v4709_v7  ;;  %1004 = vmatpush.bf16.msra.mxu3 %v4709_v7 }
  0x48   : > { %498 = vmatpush.bf16.msra.mxu0 %v4700_v8  ;;  %916 = vmatpush.bf16.msra.mxu2 %v4700_v8 }
  0x49   : > { %731 = vmatpush.bf16.msra.mxu1 %v4708_v9  ;;  %1005 = vmatpush.bf16.msra.mxu3 %v4708_v9 }
  0x4c   : > { %499 = vmatpush.bf16.msra.mxu0 %v4699_v10  ;;  %917 = vmatpush.bf16.msra.mxu2 %v4699_v10 }
  0x4d   : > { %732 = vmatpush.bf16.msra.mxu1 %v4707_v11  ;;  %1006 = vmatpush.bf16.msra.mxu3 %v4707_v11 }
  0x50   : > { %500 = vmatpush.bf16.msra.mxu0 %v4698_v12  ;;  %918 = vmatpush.bf16.msra.mxu2 %v4698_v12 }
  0x51   : > { %733 = vmatpush.bf16.msra.mxu1 %v4706_v13  ;;  %1007 = vmatpush.bf16.msra.mxu3 %v4706_v13 }
  0x54   : > { %501 = vmatpush.bf16.msra.mxu0 %v4697_v14  ;;  %919 = vmatpush.bf16.msra.mxu2 %v4697_v14 }
  0x55   : > { %734 = vmatpush.bf16.msra.mxu1 %v4705_v15  ;;  %1008 = vmatpush.bf16.msra.mxu3 %v4705_v15 }
  0x57   : > { %502 = vmatmul.bf16.vlgmr.msra.gmra.mxu0 %v4665_v16  ;;  %920 = vmatmul.bf16.vlgmr.msra.gmra.mxu2 %v4681_v17 }
  0x58   : > { %735 = vmatmul.bf16.vlgmr.msra.gmra.mxu1 %v4681_v17  ;;  %1009 = vmatmul.bf16.vlgmr.msra.gmra.mxu3 %v4665_v16 }
  0x67   : > { %507 = vmatmul.bf16.gmra.mxu0 %v4666_v18  ;;  %925 = vmatmul.bf16.gmra.mxu2 %v4682_v19 }
  0x68   : > { %740 = vmatmul.bf16.gmra.mxu1 %v4682_v19  ;;  %1014 = vmatmul.bf16.gmra.mxu3 %v4666_v18  ;;  %v4692_v18 = vld [vmem:[%s5778_s10 + $0xd8] sm:$0xff] }
  0x69   : > { %v4676_v19 = vld [vmem:[%s5778_s10 + $0x58] sm:$0xff] }
  0x77   : > { %512 = vmatmul.bf16.gmra.mxu0 %v4667_v20  ;;  %930 = vmatmul.bf16.gmra.mxu2 %v4683_v21 }
  0x78   : > { %745 = vmatmul.bf16.gmra.mxu1 %v4683_v21  ;;  %1019 = vmatmul.bf16.gmra.mxu3 %v4667_v20 }
  0x87   : > { %517 = vmatmul.bf16.gmra.mxu0 %v4668_v22  ;;  %935 = vmatmul.bf16.gmra.mxu2 %v4684_v23 }
  0x88   : > { %750 = vmatmul.bf16.gmra.mxu1 %v4684_v23  ;;  %1024 = vmatmul.bf16.gmra.mxu3 %v4668_v22 }
  0x97   : > { %522 = vmatmul.bf16.gmra.mxu0 %v4669_v24  ;;  %940 = vmatmul.bf16.gmra.mxu2 %v4685_v25 }
  0x98   : > { %755 = vmatmul.bf16.gmra.mxu1 %v4685_v25  ;;  %1029 = vmatmul.bf16.gmra.mxu3 %v4669_v24 }
  0xa7   : > { %527 = vmatmul.bf16.gmra.mxu0 %v4670_v26  ;;  %945 = vmatmul.bf16.gmra.mxu2 %v4686_v27 }
  0xa8   : > { %760 = vmatmul.bf16.gmra.mxu1 %v4686_v27  ;;  %1034 = vmatmul.bf16.gmra.mxu3 %v4670_v26 }
  0xb7   : > { %532 = vmatmul.bf16.gmra.mxu0 %v4671_v28  ;;  %950 = vmatmul.bf16.gmra.mxu2 %v4687_v29 }
  0xb8   : > { %765 = vmatmul.bf16.gmra.mxu1 %v4687_v29  ;;  %1039 = vmatmul.bf16.gmra.mxu3 %v4671_v28 }
  0xc7   : > { %537 = vmatmul.bf16.gmra.mxu0 %v4672_v30  ;;  %955 = vmatmul.bf16.gmra.mxu2 %v4688_v31 }
  0xc8   : > { %770 = vmatmul.bf16.gmra.mxu1 %v4688_v31  ;;  %1044 = vmatmul.bf16.gmra.mxu3 %v4672_v30 }
  0xd4   : > { %v503_v32 = vpop.f32.mrf.mxu0 }
  0xd5   : > { %v736_v33 = vpop.f32.mrf.mxu1 }
  0xd6   : > { %v816_v40 = vsub.f32 %v503_v32, %v736_v33 }
  0xd7   : > { %960 = vmatmul.bf16.gmra.mxu2 %v4689_v34  ;;  %542 = vmatmul.bf16.gmra.mxu0 %v4673_v35 }
  0xd8   : > { %1049 = vmatmul.bf16.gmra.mxu3 %v4673_v35  ;;  %775 = vmatmul.bf16.gmra.mxu1 %v4689_v34  ;;  %v4693_v34 = vld [vmem:[%s5778_s10 + $0xe0] sm:$0xff] }
  0xd9   : > { %v4677_v35 = vld [vmem:[%s5778_s10 + $0x60] sm:$0xff] }
  0xda   : > { %v921_v36 = vpop.f32.mrf.mxu2 }
  0xdb   : > { %v1010_v37 = vpop.f32.mrf.mxu3 }
  0xdc   : > { %v505_v38 = vpop.f32.mrf.mxu0  ;;  %v1011_v45 = vadd.f32 %v1010_v37, %v921_v36 }
  0xdd   : > { %v738_v39 = vpop.f32.mrf.mxu1 }
  0xde   : > { %v817_v41 = vsub.f32 %v505_v38, %v738_v39 }
  0xe0   : > { %v4829_v42 = vpack.c.bf16 %v817_v41, %v816_v40 }
  0xe2   : > { %4830 = vst [vmem:[#allocation2 + $0x30] sm:$0xff] %v4829_v42   ;;  %v923_v43 = vpop.f32.mrf.mxu2 }
  0xe3   : > { %v1012_v44 = vpop.f32.mrf.mxu3 }
  0xe4   : > { %v1013_v46 = vadd.f32 %v1012_v44, %v923_v43  ;;  %v508_v47 = vpop.f32.mrf.mxu0 }
  0xe5   : > { %v741_v48 = vpop.f32.mrf.mxu1 }
  0xe6   : > { %v4909_v49 = vpack.c.bf16 %v1013_v46, %v1011_v45  ;;  %v818_v56 = vsub.f32 %v508_v47, %v741_v48 }
  0xe7   : > { %965 = vmatmul.bf16.gmra.mxu2 %v4690_v50  ;;  %547 = vmatmul.bf16.gmra.mxu0 %v4674_v51 }
  0xe8   : > { %4910 = vst [vmem:[#allocation3 + $0x28] sm:$0xff] %v4909_v49   ;;  %1054 = vmatmul.bf16.gmra.mxu3 %v4674_v51  ;;  %780 = vmatmul.bf16.gmra.mxu1 %v4690_v50  ;;  %v4694_v50 = vld [vmem:[%s5778_s10 + $0xe8] sm:$0xff] }
  0xe9   : > { %v4678_v51 = vld [vmem:[%s5778_s10 + $0x68] sm:$0xff] }
  0xea   : > { %v926_v52 = vpop.f32.mrf.mxu2 }
  0xeb   : > { %v1015_v53 = vpop.f32.mrf.mxu3 }
  0xec   : > { %v510_v54 = vpop.f32.mrf.mxu0  ;;  %v1016_v61 = vadd.f32 %v1015_v53, %v926_v52 }
  0xed   : > { %v743_v55 = vpop.f32.mrf.mxu1 }
  0xee   : > { %v819_v57 = vsub.f32 %v510_v54, %v743_v55 }
  0xf0   : > { %v4834_v58 = vpack.c.bf16 %v819_v57, %v818_v56 }
  0xf2   : > { %5306 = vst [vmem:[#allocation2] sm:$0xff] %v4834_v58   ;;  %v928_v59 = vpop.f32.mrf.mxu2 }
  0xf3   : > { %v1017_v60 = vpop.f32.mrf.mxu3 }
  0xf4   : > { %v1018_v62 = vadd.f32 %v1017_v60, %v928_v59  ;;  %v513_v63 = vpop.f32.mrf.mxu0 }
  0xf5   : > { %v746_v0 = vpop.f32.mrf.mxu1 }
  0xf6   : > { %v4914_v1 = vpack.c.bf16 %v1018_v62, %v1016_v61  ;;  %v820_v8 = vsub.f32 %v513_v63, %v746_v0 }
  0xf7   : > { %970 = vmatmul.bf16.gmra.mxu2 %v4691_v2  ;;  %552 = vmatmul.bf16.gmra.mxu0 %v4675_v3 }
  0xf8   : > { %5321 = vst [vmem:[#allocation3 + $0x68] sm:$0xff] %v4914_v1   ;;  %1059 = vmatmul.bf16.gmra.mxu3 %v4675_v3  ;;  %785 = vmatmul.bf16.gmra.mxu1 %v4691_v2  ;;  %v4695_v2 = vld [vmem:[%s5778_s10 + $0xf0] sm:$0xff] }
  0xf9   : > { %v4679_v3 = vld [vmem:[%s5778_s10 + $0x70] sm:$0xff] }
  0xfa   : > { %v931_v4 = vpop.f32.mrf.mxu2 }
  0xfb   : > { %v1020_v5 = vpop.f32.mrf.mxu3 }
  0xfc   : > { %v515_v6 = vpop.f32.mrf.mxu0  ;;  %v1021_v13 = vadd.f32 %v1020_v5, %v931_v4 }
  0xfd   : > { %v748_v7 = vpop.f32.mrf.mxu1 }
  0xfe   : > { %v821_v9 = vsub.f32 %v515_v6, %v748_v7 }
 0x100   : > { %v4839_v10 = vpack.c.bf16 %v821_v9, %v820_v8 }
 0x102   : > { %5307 = vst [vmem:[#allocation2 + $0x58] sm:$0xff] %v4839_v10   ;;  %v933_v11 = vpop.f32.mrf.mxu2 }
 0x103   : > { %v1022_v12 = vpop.f32.mrf.mxu3 }
 0x104   : > { %v1023_v14 = vadd.f32 %v1022_v12, %v933_v11  ;;  %v518_v15 = vpop.f32.mrf.mxu0 }
 0x105   : > { %v751_v16 = vpop.f32.mrf.mxu1 }
 0x106   : > { %v4919_v17 = vpack.c.bf16 %v1023_v14, %v1021_v13  ;;  %v822_v24 = vsub.f32 %v518_v15, %v751_v16 }
 0x107   : > { %975 = vmatmul.bf16.gmra.mxu2 %v4692_v18  ;;  %557 = vmatmul.bf16.gmra.mxu0 %v4676_v19 }
 0x108   : > { %5322 = vst [vmem:[#allocation3 + $0x10] sm:$0xff] %v4919_v17   ;;  %1064 = vmatmul.bf16.gmra.mxu3 %v4676_v19  ;;  %790 = vmatmul.bf16.gmra.mxu1 %v4692_v18  ;;  %v4696_v18 = vld [vmem:[%s5778_s10 + $0xf8] sm:$0xff] }
 0x109   : > { %v4680_v19 = vld [vmem:[%s5778_s10 + $0x78] sm:$0xff] }
 0x10a   : > { %v936_v20 = vpop.f32.mrf.mxu2 }
 0x10b   : > { %v1025_v21 = vpop.f32.mrf.mxu3 }
 0x10c   : > { %v520_v22 = vpop.f32.mrf.mxu0  ;;  %v1026_v29 = vadd.f32 %v1025_v21, %v936_v20 }
 0x10d   : > { %v753_v23 = vpop.f32.mrf.mxu1 }
 0x10e   : > { %v823_v25 = vsub.f32 %v520_v22, %v753_v23 }
 0x110   : > { %v4844_v26 = vpack.c.bf16 %v823_v25, %v822_v24 }
 0x112   : > { %5308 = vst [vmem:[#allocation2 + $0x18] sm:$0xff] %v4844_v26   ;;  %v938_v27 = vpop.f32.mrf.mxu2 }
 0x113   : > { %v1027_v28 = vpop.f32.mrf.mxu3 }
 0x114   : > { %v1028_v30 = vadd.f32 %v1027_v28, %v938_v27  ;;  %v523_v31 = vpop.f32.mrf.mxu0 }
 0x115   : > { %v756_v32 = vpop.f32.mrf.mxu1 }
 0x116   : > { %v4924_v33 = vpack.c.bf16 %v1028_v30, %v1026_v29  ;;  %v824_v40 = vsub.f32 %v523_v31, %v756_v32 }
 0x117   : > { %980 = vmatmul.bf16.gmra.mxu2 %v4693_v34  ;;  %562 = vmatmul.bf16.gmra.mxu0 %v4677_v35 }
 0x118   : > { %5323 = vst [vmem:[#allocation3 + $0x40] sm:$0xff] %v4924_v33   ;;  %1069 = vmatmul.bf16.gmra.mxu3 %v4677_v35  ;;  %795 = vmatmul.bf16.gmra.mxu1 %v4693_v34 }
 0x11a   : > { %v941_v36 = vpop.f32.mrf.mxu2 }
 0x11b   : > { %v1030_v37 = vpop.f32.mrf.mxu3 }
 0x11c   : > { %v525_v38 = vpop.f32.mrf.mxu0  ;;  %v1031_v45 = vadd.f32 %v1030_v37, %v941_v36 }
 0x11d   : > { %v758_v39 = vpop.f32.mrf.mxu1 }
 0x11e   : > { %v825_v41 = vsub.f32 %v525_v38, %v758_v39 }
 0x120   : > { %v4849_v42 = vpack.c.bf16 %v825_v41, %v824_v40 }
 0x122   : > { %5309 = vst [vmem:[#allocation2 + $0x50] sm:$0xff] %v4849_v42   ;;  %v943_v43 = vpop.f32.mrf.mxu2 }
 0x123   : > { %v1032_v44 = vpop.f32.mrf.mxu3 }
 0x124   : > { %v1033_v46 = vadd.f32 %v1032_v44, %v943_v43  ;;  %v528_v47 = vpop.f32.mrf.mxu0 }
 0x125   : > { %v761_v48 = vpop.f32.mrf.mxu1 }
 0x126   : > { %v4929_v49 = vpack.c.bf16 %v1033_v46, %v1031_v45  ;;  %v826_v56 = vsub.f32 %v528_v47, %v761_v48 }
 0x127   : > { %985 = vmatmul.bf16.gmra.mxu2 %v4694_v50  ;;  %567 = vmatmul.bf16.gmra.mxu0 %v4678_v51 }
 0x128   : > { %5324 = vst [vmem:[#allocation3 + $0x48] sm:$0xff] %v4929_v49   ;;  %1074 = vmatmul.bf16.gmra.mxu3 %v4678_v51  ;;  %800 = vmatmul.bf16.gmra.mxu1 %v4694_v50 }
 0x129   : > { %v4749_v45 = vld [vmem:[#allocation2 + $0x50] sm:$0xff] }
 0x12a   : > { %v946_v52 = vpop.f32.mrf.mxu2 }
 0x12b   : > { %v1035_v53 = vpop.f32.mrf.mxu3 }
 0x12c   : > { %v530_v54 = vpop.f32.mrf.mxu0  ;;  %v1036_v61 = vadd.f32 %v1035_v53, %v946_v52  ;;  %v4748_v53 = vld [vmem:[#allocation2 + $0x18] sm:$0xff] }
 0x12d   : > { %v763_v55 = vpop.f32.mrf.mxu1 }
 0x12e   : > { %v827_v57 = vsub.f32 %v530_v54, %v763_v55 }
 0x12f   : > { %v4757_v54 = vld [vmem:[#allocation3 + $0x48] sm:$0xff] }
 0x130   : > { %v4854_v58 = vpack.c.bf16 %v827_v57, %v826_v56  ;;  %v4747_v57 = vld [vmem:[#allocation2 + $0x58] sm:$0xff] }
 0x132   : > { %5310 = vst [vmem:[#allocation2 + $0x68] sm:$0xff] %v4854_v58   ;;  %v948_v59 = vpop.f32.mrf.mxu2 }
 0x133   : > { %v1037_v60 = vpop.f32.mrf.mxu3 }
 0x134   : > { %v1038_v62 = vadd.f32 %v1037_v60, %v948_v59  ;;  %v533_v63 = vpop.f32.mrf.mxu0  ;;  %v4756_v60 = vld [vmem:[#allocation3 + $0x40] sm:$0xff] }
 0x135   : > { %v766_v0 = vpop.f32.mrf.mxu1 }
 0x136   : > { %v4934_v1 = vpack.c.bf16 %v1038_v62, %v1036_v61  ;;  %v828_v8 = vsub.f32 %v533_v63, %v766_v0  ;;  %v4746_v61 = vld [vmem:[#allocation2] sm:$0xff]  ;;  %v4755_v63 = vld [vmem:[#allocation3 + $0x10] sm:$0xff] }
 0x137   : > { %990 = vmatmul.bf16.gmra.mxu2 %v4695_v2  ;;  %572 = vmatmul.bf16.gmra.mxu0 %v4679_v3 }
 0x138   : > { %5325 = vst [vmem:[#allocation3 + $0x30] sm:$0xff] %v4934_v1   ;;  %1079 = vmatmul.bf16.gmra.mxu3 %v4679_v3  ;;  %805 = vmatmul.bf16.gmra.mxu1 %v4695_v2  ;;  %v4745_v3 = vld [vmem:[#allocation2 + $0x30] sm:$0xff] }
 0x139   : > { %v4750_v39 = vld [vmem:[#allocation2 + $0x68] sm:$0xff] }
 0x13a   : > { %v951_v4 = vpop.f32.mrf.mxu2 }
 0x13b   : > { %v1040_v5 = vpop.f32.mrf.mxu3 }
 0x13c   : > { %v535_v6 = vpop.f32.mrf.mxu0  ;;  %v1041_v13 = vadd.f32 %v1040_v5, %v951_v4 }
 0x13d   : > { %v768_v7 = vpop.f32.mrf.mxu1 }
 0x13e   : > { %v829_v9 = vsub.f32 %v535_v6, %v768_v7 }
 0x13f   : > { %v4758_v51 = vld [vmem:[#allocation3 + $0x30] sm:$0xff] }
 0x140   : > { %v4859_v10 = vpack.c.bf16 %v829_v9, %v828_v8  ;;  %v4721_v8 = vld [vmem:[#allocation9 + $0x40] sm:$0xff] }
 0x141   : > { %v4713_v9 = vld [vmem:[#allocation9] sm:$0xff] }
 0x142   : > { %5311 = vst [vmem:[#allocation2 + $0x8] sm:$0xff] %v4859_v10   ;;  %v953_v11 = vpop.f32.mrf.mxu2 }
 0x143   : > { %v1042_v12 = vpop.f32.mrf.mxu3 }
 0x144   : > { %v1043_v14 = vadd.f32 %v1042_v12, %v953_v11  ;;  %v538_v15 = vpop.f32.mrf.mxu0  ;;  %v4754_v11 = vld [vmem:[#allocation3 + $0x68] sm:$0xff] }
 0x145   : > { %v771_v16 = vpop.f32.mrf.mxu1 }
 0x146   : > { %v4939_v17 = vpack.c.bf16 %v1043_v14, %v1041_v13  ;;  %v830_v24 = vsub.f32 %v538_v15, %v771_v16  ;;  %v4753_v13 = vld [vmem:[#allocation3 + $0x28] sm:$0xff] }
 0x147   : > { %995 = vmatmul.bf16.gmra.mxu2 %v4696_v18  ;;  %577 = vmatmul.bf16.gmra.mxu0 %v4680_v19 }
 0x148   : > { %5326 = vst [vmem:[#allocation3 + $0x70] sm:$0xff] %v4939_v17   ;;  %1084 = vmatmul.bf16.gmra.mxu3 %v4680_v19  ;;  %810 = vmatmul.bf16.gmra.mxu1 %v4696_v18 }
 0x149   : > { %v4751_v35 = vld [vmem:[#allocation2 + $0x8] sm:$0xff] }
 0x14a   : > { %v956_v20 = vpop.f32.mrf.mxu2 }
 0x14b   : > { %v1045_v21 = vpop.f32.mrf.mxu3 }
 0x14c   : > { %v540_v22 = vpop.f32.mrf.mxu0  ;;  %v1046_v29 = vadd.f32 %v1045_v21, %v956_v20 }
 0x14d   : > { %v773_v23 = vpop.f32.mrf.mxu1 }
 0x14e   : > { %v831_v25 = vsub.f32 %v540_v22, %v773_v23 }
 0x14f   : > { %v4759_v41 = vld [vmem:[#allocation3 + $0x70] sm:$0xff] }
 0x150   : > { %v4864_v26 = vpack.c.bf16 %v831_v25, %v830_v24 }
 0x152   : > { %5312 = vst [vmem:[#allocation2 + $0x48] sm:$0xff] %v4864_v26   ;;  %v958_v27 = vpop.f32.mrf.mxu2  ;;  %v4722_v26 = vld [vmem:[#allocation9 + $0x48] sm:$0xff] }
 0x153   : > { %v1047_v28 = vpop.f32.mrf.mxu3 }
 0x154   : > { %v1048_v30 = vadd.f32 %v1047_v28, %v958_v27  ;;  %v543_v33 = vpop.f32.mrf.mxu0  ;;  %v4714_v27 = vld [vmem:[#allocation9 + $0x8] sm:$0xff] }
 0x155   : > { %v776_v34 = vpop.f32.mrf.mxu1 }
 0x156   : > { %v4944_v31 = vpack.c.bf16 %v1048_v30, %v1046_v29  ;;  %v832_v40 = vsub.f32 %v543_v33, %v776_v34 }
 0x158   : > { %5327 = vst [vmem:[#allocation3 + $0x38] sm:$0xff] %v4944_v31  }
 0x159   : > { %v4752_v32 = vld [vmem:[#allocation2 + $0x48] sm:$0xff] }
 0x15a   : > { %1382 = vmatpush.bf16.msrb.mxu0 %v4752_v32  ;;  %1592 = vmatpush.bf16.msrb.mxu2 %v4752_v32  ;;  %v961_v36 = vpop.f32.mrf.mxu2 }
 0x15b   : > { %v1050_v37 = vpop.f32.mrf.mxu3 }
 0x15c   : > { %v1051_v42 = vadd.f32 %v1050_v37, %v961_v36  ;;  %v545_v43 = vpop.f32.mrf.mxu0 }
 0x15d   : > { %v778_v44 = vpop.f32.mrf.mxu1 }
 0x15e   : > { %1383 = vmatpush.bf16.msrb.mxu0 %v4751_v35  ;;  %1593 = vmatpush.bf16.msrb.mxu2 %v4751_v35  ;;  %v833_v46 = vsub.f32 %v545_v43, %v778_v44  ;;  %v4715_v43 = vld [vmem:[#allocation9 + $0x10] sm:$0xff] }
 0x15f   : > { %v4760_v38 = vld [vmem:[#allocation3 + $0x38] sm:$0xff] }
 0x160   : > { %1527 = vmatpush.bf16.msrb.mxu1 %v4760_v38  ;;  %1641 = vmatpush.bf16.msrb.mxu3 %v4760_v38  ;;  %v4869_v50 = vpack.c.bf16 %v833_v46, %v832_v40 }
 0x162   : > { %1384 = vmatpush.bf16.msrb.mxu0 %v4750_v39  ;;  %1594 = vmatpush.bf16.msrb.mxu2 %v4750_v39  ;;  %v963_v47 = vpop.f32.mrf.mxu2  ;;  %5313 = vst [vmem:[#allocation2 + $0x40] sm:$0xff] %v4869_v50  }
 0x163   : > { %v1052_v48 = vpop.f32.mrf.mxu3 }
 0x164   : > { %1528 = vmatpush.bf16.msrb.mxu1 %v4759_v41  ;;  %1642 = vmatpush.bf16.msrb.mxu3 %v4759_v41  ;;  %v1053_v49 = vadd.f32 %v1052_v48, %v963_v47  ;;  %v548_v55 = vpop.f32.mrf.mxu0 }
 0x165   : > { %v781_v56 = vpop.f32.mrf.mxu1 }
 0x166   : > { %1385 = vmatpush.bf16.msrb.mxu0 %v4749_v45  ;;  %1595 = vmatpush.bf16.msrb.mxu2 %v4749_v45  ;;  %v4949_v52 = vpack.c.bf16 %v1053_v49, %v1051_v42  ;;  %v834_v62 = vsub.f32 %v548_v55, %v781_v56  ;;  %v4723_v42 = vld [vmem:[#allocation9 + $0x50] sm:$0xff] }
 0x168   : > { %1529 = vmatpush.bf16.msrb.mxu1 %v4758_v51  ;;  %1643 = vmatpush.bf16.msrb.mxu3 %v4758_v51  ;;  %5328 = vst [vmem:[#allocation3 + $0x20] sm:$0xff] %v4949_v52  }
 0x16a   : > { %1386 = vmatpush.bf16.msrb.mxu0 %v4748_v53  ;;  %1596 = vmatpush.bf16.msrb.mxu2 %v4748_v53  ;;  %v966_v58 = vpop.f32.mrf.mxu2 }
 0x16b   : > { %v1055_v59 = vpop.f32.mrf.mxu3 }
 0x16c   : > { %1530 = vmatpush.bf16.msrb.mxu1 %v4757_v54  ;;  %1644 = vmatpush.bf16.msrb.mxu3 %v4757_v54  ;;  %v1056_v0 = vadd.f32 %v1055_v59, %v966_v58  ;;  %v550_v1 = vpop.f32.mrf.mxu0  ;;  %v4724_v58 = vld [vmem:[#allocation9 + $0x58] sm:$0xff] }
 0x16d   : > { %v783_v2 = vpop.f32.mrf.mxu1  ;;  %v4716_v59 = vld [vmem:[#allocation9 + $0x18] sm:$0xff] }
 0x16e   : > { %1387 = vmatpush.bf16.msrb.mxu0 %v4747_v57  ;;  %1597 = vmatpush.bf16.msrb.mxu2 %v4747_v57  ;;  %v835_v4 = vsub.f32 %v550_v1, %v783_v2 }
 0x170   : > { %1531 = vmatpush.bf16.msrb.mxu1 %v4756_v60  ;;  %1645 = vmatpush.bf16.msrb.mxu3 %v4756_v60  ;;  %v4874_v10 = vpack.c.bf16 %v835_v4, %v834_v62 }
 0x172   : > { %1388 = vmatpush.bf16.msrb.mxu0 %v4746_v61  ;;  %1598 = vmatpush.bf16.msrb.mxu2 %v4746_v61  ;;  %v968_v5 = vpop.f32.mrf.mxu2  ;;  %5314 = vst [vmem:[#allocation2 + $0x20] sm:$0xff] %v4874_v10   ;;  %v5820_v10 = vld [vmem:[#allocation9 + $0x60] sm:$0xff] }
 0x173   : > { %v1057_v6 = vpop.f32.mrf.mxu3  ;;  %6380 = vst [vmem:[#allocation21_spill] sm:$0xff] %v5820_v10 }
 0x174   : > { %1532 = vmatpush.bf16.msrb.mxu1 %v4755_v63  ;;  %1646 = vmatpush.bf16.msrb.mxu3 %v4755_v63  ;;  %v1058_v7 = vadd.f32 %v1057_v6, %v968_v5  ;;  %v553_v14 = vpop.f32.mrf.mxu0 }
 0x175   : > { %v786_v15 = vpop.f32.mrf.mxu1 }
 0x176   : > { %1389 = vmatpush.bf16.msrb.mxu0 %v4745_v3  ;;  %1599 = vmatpush.bf16.msrb.mxu2 %v4745_v3  ;;  %v4954_v12 = vpack.c.bf16 %v1058_v7, %v1056_v0  ;;  %v836_v18 = vsub.f32 %v553_v14, %v786_v15 }
 0x178   : > { %1533 = vmatpush.bf16.msrb.mxu1 %v4754_v11  ;;  %1647 = vmatpush.bf16.msrb.mxu3 %v4754_v11  ;;  %5329 = vst [vmem:[#allocation3 + $0x78] sm:$0xff] %v4954_v12   ;;  %v5822_v11 = vld [vmem:[#allocation9 + $0x20] sm:$0xff] }
 0x179   : > { %1600 = vmatmul.bf16.vlgmr.msrb.gmra.mxu2 %v4721_v8  ;;  %1390 = vmatmul.bf16.vlgmr.msrb.gmra.mxu0 %v4713_v9  ;;  %6381 = vst [vmem:[#allocation22_spill] sm:$0xff] %v5822_v11 }
 0x17a   : > { %v971_v16 = vpop.f32.mrf.mxu2 }
 0x17b   : > { %v1060_v17 = vpop.f32.mrf.mxu3 }
 0x17c   : > { %1534 = vmatpush.bf16.msrb.mxu1 %v4753_v13  ;;  %1648 = vmatpush.bf16.msrb.mxu3 %v4753_v13  ;;  %v1061_v19 = vadd.f32 %v1060_v17, %v971_v16  ;;  %v555_v20 = vpop.f32.mrf.mxu0 }
 0x17d   : > { %v788_v21 = vpop.f32.mrf.mxu1 }
 0x17e   : > { %v837_v22 = vsub.f32 %v555_v20, %v788_v21 }
 0x17f   : > { %1649 = vmatmul.bf16.vlgmr.msrb.gmra.mxu3 %v4713_v9  ;;  %1535 = vmatmul.bf16.vlgmr.msrb.gmra.mxu1 %v4721_v8 }
 0x180   : > { %v4879_v28 = vpack.c.bf16 %v837_v22, %v836_v18 }
 0x182   : > { %v973_v23 = vpop.f32.mrf.mxu2  ;;  %5315 = vst [vmem:[#allocation2 + $0x10] sm:$0xff] %v4879_v28  }
 0x183   : > { %v1062_v24 = vpop.f32.mrf.mxu3 }
 0x184   : > { %v1063_v25 = vadd.f32 %v1062_v24, %v973_v23  ;;  %v558_v30 = vpop.f32.mrf.mxu0 }
 0x185   : > { %v791_v31 = vpop.f32.mrf.mxu1 }
 0x186   : > { %v4959_v29 = vpack.c.bf16 %v1063_v25, %v1061_v19  ;;  %v838_v34 = vsub.f32 %v558_v30, %v791_v31 }
 0x188   : > { %5330 = vst [vmem:[#allocation3 + $0x18] sm:$0xff] %v4959_v29  }
 0x189   : > { %1605 = vmatmul.bf16.gmra.mxu2 %v4722_v26  ;;  %1395 = vmatmul.bf16.gmra.mxu0 %v4714_v27 }
 0x18a   : > { %v976_v32 = vpop.f32.mrf.mxu2 }
 0x18b   : > { %v1065_v33 = vpop.f32.mrf.mxu3 }
 0x18c   : > { %v1066_v35 = vadd.f32 %v1065_v33, %v976_v32  ;;  %v560_v36 = vpop.f32.mrf.mxu0 }
 0x18d   : > { %v793_v37 = vpop.f32.mrf.mxu1 }
 0x18e   : > { %v839_v38 = vsub.f32 %v560_v36, %v793_v37 }
 0x18f   : > { %1654 = vmatmul.bf16.gmra.mxu3 %v4714_v27  ;;  %1540 = vmatmul.bf16.gmra.mxu1 %v4722_v26  ;;  %v5828_v26 = vld [vmem:[#allocation9 + $0x68] sm:$0xff] }
 0x190   : > { %v4884_v44 = vpack.c.bf16 %v839_v38, %v838_v34  ;;  %6382 = vst [vmem:[#allocation23_spill] sm:$0xff] %v5828_v26  ;;  %v5830_v27 = vld [vmem:[#allocation9 + $0x28] sm:$0xff] }
 0x191   : > { %6383 = vst [vmem:[#allocation24_spill] sm:$0xff] %v5830_v27 }
 0x192   : > { %v978_v39 = vpop.f32.mrf.mxu2  ;;  %5316 = vst [vmem:[#allocation2 + $0x38] sm:$0xff] %v4884_v44  }
 0x193   : > { %v1067_v40 = vpop.f32.mrf.mxu3 }
 0x194   : > { %v1068_v41 = vadd.f32 %v1067_v40, %v978_v39  ;;  %v563_v46 = vpop.f32.mrf.mxu0 }
 0x195   : > { %v796_v47 = vpop.f32.mrf.mxu1 }
 0x196   : > { %v4964_v45 = vpack.c.bf16 %v1068_v41, %v1066_v35  ;;  %v840_v50 = vsub.f32 %v563_v46, %v796_v47  ;;  %v4728_v46 = vld [vmem:[#allocation9 + $0x78] sm:$0xff] }
 0x197   : > { %v4720_v47 = vld [vmem:[#allocation9 + $0x38] sm:$0xff] }
 0x198   : > { %5331 = vst [vmem:[#allocation3 + $0x58] sm:$0xff] %v4964_v45  }
 0x199   : > { %1610 = vmatmul.bf16.gmra.mxu2 %v4723_v42  ;;  %1400 = vmatmul.bf16.gmra.mxu0 %v4715_v43 }
 0x19a   : > { %v981_v48 = vpop.f32.mrf.mxu2 }
 0x19b   : > { %v1070_v49 = vpop.f32.mrf.mxu3 }
 0x19c   : > { %v1071_v51 = vadd.f32 %v1070_v49, %v981_v48  ;;  %v565_v52 = vpop.f32.mrf.mxu0 }
 0x19d   : > { %v798_v53 = vpop.f32.mrf.mxu1 }
 0x19e   : > { %v841_v54 = vsub.f32 %v565_v52, %v798_v53  ;;  %v1221_v53 = vld [vmem:[#allocation11] sm:$0xff] }
 0x19f   : > { %1659 = vmatmul.bf16.gmra.mxu3 %v4715_v43  ;;  %1545 = vmatmul.bf16.gmra.mxu1 %v4723_v42  ;;  %v5836_v42 = vld [vmem:[#allocation9 + $0x70] sm:$0xff] }
 0x1a0   : > { %v4889_v60 = vpack.c.bf16 %v841_v54, %v840_v50  ;;  %6384 = vst [vmem:[#allocation25_spill] sm:$0xff] %v5836_v42  ;;  %v5838_v43 = vld [vmem:[#allocation9 + $0x30] sm:$0xff]  ;;  %v1238_v54 = vld [vmem:[#allocation11 + $0x80] sm:$0xff] }
 0x1a1   : > { %6385 = vst [vmem:[#allocation26_spill] sm:$0xff] %v5838_v43 }
 0x1a2   : > { %v983_v55 = vpop.f32.mrf.mxu2  ;;  %5317 = vst [vmem:[#allocation2 + $0x60] sm:$0xff] %v4889_v60  }
 0x1a3   : > { %v1072_v56 = vpop.f32.mrf.mxu3 }
 0x1a4   : > { %v1073_v57 = vadd.f32 %v1072_v56, %v983_v55  ;;  %v568_v62 = vpop.f32.mrf.mxu0 }
 0x1a5   : > { %v801_v63 = vpop.f32.mrf.mxu1 }
 0x1a6   : > { %v4969_v61 = vpack.c.bf16 %v1073_v57, %v1071_v51  ;;  %v842_v2 = vsub.f32 %v568_v62, %v801_v63 }
 0x1a8   : > { %5332 = vst [vmem:[#allocation3] sm:$0xff] %v4969_v61  }
 0x1a9   : > { %1615 = vmatmul.bf16.gmra.mxu2 %v4724_v58  ;;  %1405 = vmatmul.bf16.gmra.mxu0 %v4716_v59 }
 0x1aa   : > { %v986_v0 = vpop.f32.mrf.mxu2 }
 0x1ab   : > { %v1075_v1 = vpop.f32.mrf.mxu3 }
 0x1ac   : > { %v1076_v3 = vadd.f32 %v1075_v1, %v986_v0  ;;  %v570_v4 = vpop.f32.mrf.mxu0 }
 0x1ad   : > { %v803_v5 = vpop.f32.mrf.mxu1 }
 0x1ae   : > { %v843_v6 = vsub.f32 %v570_v4, %v803_v5 }
 0x1af   : > { %1664 = vmatmul.bf16.gmra.mxu3 %v4716_v59  ;;  %1550 = vmatmul.bf16.gmra.mxu1 %v4724_v58 }
 0x1b0   : > { %v4894_v12 = vpack.c.bf16 %v843_v6, %v842_v2 }
 0x1b2   : > { %v988_v7 = vpop.f32.mrf.mxu2  ;;  %5318 = vst [vmem:[#allocation2 + $0x70] sm:$0xff] %v4894_v12  }
 0x1b3   : > { %v1077_v8 = vpop.f32.mrf.mxu3 }
 0x1b4   : > { %v1078_v9 = vadd.f32 %v1077_v8, %v988_v7  ;;  %v573_v14 = vpop.f32.mrf.mxu0  ;;  %v1223_v7 = vld [vmem:[#allocation11 + $0x10] sm:$0xff] }
 0x1b5   : > { %v806_v15 = vpop.f32.mrf.mxu1  ;;  %v1240_v8 = vld [vmem:[#allocation11 + $0x90] sm:$0xff] }
 0x1b6   : > { %v4974_v13 = vpack.c.bf16 %v1078_v9, %v1076_v3  ;;  %v844_v18 = vsub.f32 %v573_v14, %v806_v15 }
 0x1b8   : > { %5333 = vst [vmem:[#allocation3 + $0x8] sm:$0xff] %v4974_v13  }
 0x1b9   : > { %1620 = vmatmul.bf16.gmra.mxu2 %v5820_v10  ;;  %1410 = vmatmul.bf16.gmra.mxu0 %v5822_v11 }
 0x1ba   : > { %v991_v16 = vpop.f32.mrf.mxu2 }
 0x1bb   : > { %v1080_v17 = vpop.f32.mrf.mxu3 }
 0x1bc   : > { %v1081_v19 = vadd.f32 %v1080_v17, %v991_v16  ;;  %v575_v20 = vpop.f32.mrf.mxu0 }
 0x1bd   : > { %v808_v21 = vpop.f32.mrf.mxu1 }
 0x1be   : > { %v845_v22 = vsub.f32 %v575_v20, %v808_v21 }
 0x1bf   : > { %1669 = vmatmul.bf16.gmra.mxu3 %v5822_v11  ;;  %1555 = vmatmul.bf16.gmra.mxu1 %v5820_v10  ;;  %v1252_v11 = vld [vmem:[#allocation11 + $0xf0] sm:$0xff] }
 0x1c0   : > { %v4899_v28 = vpack.c.bf16 %v845_v22, %v844_v18 }
 0x1c2   : > { %v993_v23 = vpop.f32.mrf.mxu2  ;;  %5319 = vst [vmem:[#allocation2 + $0x78] sm:$0xff] %v4899_v28  }
 0x1c3   : > { %v1082_v24 = vpop.f32.mrf.mxu3 }
 0x1c4   : > { %v1083_v25 = vadd.f32 %v1082_v24, %v993_v23  ;;  %v578_v30 = vpop.f32.mrf.mxu0 }
 0x1c5   : > { %v811_v31 = vpop.f32.mrf.mxu1 }
 0x1c6   : > { %v4979_v29 = vpack.c.bf16 %v1083_v25, %v1081_v19  ;;  %v846_v34 = vsub.f32 %v578_v30, %v811_v31  ;;  %v1242_v30 = vld [vmem:[#allocation11 + $0xa0] sm:$0xff] }
 0x1c8   : > { %5334 = vst [vmem:[#allocation3 + $0x60] sm:$0xff] %v4979_v29   ;;  %v1225_v29 = vld [vmem:[#allocation11 + $0x20] sm:$0xff] }
 0x1c9   : > { %1625 = vmatmul.bf16.gmra.mxu2 %v5828_v26  ;;  %1415 = vmatmul.bf16.gmra.mxu0 %v5830_v27 }
 0x1ca   : > { %v996_v32 = vpop.f32.mrf.mxu2 }
 0x1cb   : > { %v1085_v33 = vpop.f32.mrf.mxu3 }
 0x1cc   : > { %v1086_v35 = vadd.f32 %v1085_v33, %v996_v32  ;;  %v580_v36 = vpop.f32.mrf.mxu0 }
 0x1cd   : > { %v813_v37 = vpop.f32.mrf.mxu1 }
 0x1ce   : > { %v847_v38 = vsub.f32 %v580_v36, %v813_v37 }
 0x1cf   : > { %1674 = vmatmul.bf16.gmra.mxu3 %v5830_v27  ;;  %1560 = vmatmul.bf16.gmra.mxu1 %v5828_v26 }
 0x1d0   : > { %v4904_v44 = vpack.c.bf16 %v847_v38, %v846_v34 }
 0x1d2   : > { %v998_v39 = vpop.f32.mrf.mxu2  ;;  %5320 = vst [vmem:[#allocation2 + $0x28] sm:$0xff] %v4904_v44  }
 0x1d3   : > { %v1087_v40 = vpop.f32.mrf.mxu3 }
 0x1d4   : > { %v1088_v41 = vadd.f32 %v1087_v40, %v998_v39 }
 0x1d6   : > { %v4984_v45 = vpack.c.bf16 %v1088_v41, %v1086_v35 }
 0x1d8   : > { %5335 = vst [vmem:[#allocation3 + $0x50] sm:$0xff] %v4984_v45  }
 0x1d9   : > { %1630 = vmatmul.bf16.gmra.mxu2 %v5836_v42  ;;  %1420 = vmatmul.bf16.gmra.mxu0 %v5838_v43 }
 0x1df   : > { %1679 = vmatmul.bf16.gmra.mxu3 %v5838_v43  ;;  %1565 = vmatmul.bf16.gmra.mxu1 %v5836_v42 }
 0x1e9   : > { %1635 = vmatmul.bf16.gmra.mxu2 %v4728_v46  ;;  %1425 = vmatmul.bf16.gmra.mxu0 %v4720_v47 }
 0x1ef   : > { %1684 = vmatmul.bf16.gmra.mxu3 %v4720_v47  ;;  %1570 = vmatmul.bf16.gmra.mxu1 %v4728_v46 }
 0x1f6   : > { %v1391_v48 = vpop.f32.mrf.mxu0 }
 0x1fc   : > { %v1536_v49 = vpop.f32.mrf.mxu1  ;;  %v1601_v50 = vpop.f32.mrf.mxu2 }
 0x1fd   : > { %v1576_v51 = vsub.f32 %v1391_v48, %v1536_v49  ;;  %v1227_v49 = vld [vmem:[#allocation11 + $0x30] sm:$0xff] }
 0x1fe   : > { %v5844_v52 = vpop.f32.mrf.mxu0 }
 0x1ff   : > { %6386 = vst [vmem:[#allocation27_spill] sm:$0xff] %v5844_v52  ;;  %v5846_v56 = vmul.f32 %v1576_v51, %v1221_v53  ;;  %v1762_v57 = vmul.f32 %v1576_v51, %v1238_v54 }
 0x201   : > { %6387 = vst [vmem:[#allocation28_spill] sm:$0xff] %v5846_v56 }
 0x202   : > { %v1650_v55 = vpop.f32.mrf.mxu3 }
 0x203   : > { %v1651_v58 = vadd.f32 %v1650_v55, %v1601_v50  ;;  %v1244_v50 = vld [vmem:[#allocation11 + $0xb0] sm:$0xff] }
 0x204   : > { %v5848_v59 = vpop.f32.mrf.mxu1  ;;  %v5850_v60 = vpop.f32.mrf.mxu2 }
 0x205   : > { %6388 = vst [vmem:[#allocation29_spill] sm:$0xff] %v5848_v59  ;;  %v5852_v61 = vmul.f32 %v1651_v58, %v1238_v54  ;;  %v1746_v62 = vmul.f32 %v1651_v58, %v1221_v53 }
 0x206   : > { %v1396_v63 = vpop.f32.mrf.mxu0 }
 0x207   : > { %6389 = vst [vmem:[#allocation30_spill] sm:$0xff] %v5852_v61  ;;  %v5856_v1 = vadd.f32 %v1762_v57, %v1746_v62 }
 0x209   : > { %6390 = vst [vmem:[#allocation31_spill] sm:$0xff] %v5856_v1 }
 0x20a   : > { %v5858_v2 = vpop.f32.mrf.mxu3 }
 0x20c   : > { %v1541_v3 = vpop.f32.mrf.mxu1  ;;  %v1606_v4 = vpop.f32.mrf.mxu2 }
 0x20d   : > { %v1578_v5 = vsub.f32 %v1396_v63, %v1541_v3 }
 0x20e   : > { %v5860_v6 = vpop.f32.mrf.mxu0 }
 0x20f   : > { %v5862_v12 = vmul.f32 %v1578_v5, %v1223_v7  ;;  %v1764_v13 = vmul.f32 %v1578_v5, %v1240_v8 }
 0x211   : > { %6391 = vst [vmem:[#allocation32_spill] sm:$0xff] %v5862_v12 }
 0x212   : > { %v1655_v9 = vpop.f32.mrf.mxu3 }
 0x213   : > { %v1656_v14 = vadd.f32 %v1655_v9, %v1606_v4 }
 0x214   : > { %v5864_v15 = vpop.f32.mrf.mxu1  ;;  %v5866_v16 = vpop.f32.mrf.mxu2 }
 0x215   : > { %v5868_v17 = vmul.f32 %v1656_v14, %v1240_v8  ;;  %v1748_v18 = vmul.f32 %v1656_v14, %v1223_v7 }
 0x216   : > { %v1401_v19 = vpop.f32.mrf.mxu0 }
 0x217   : > { %6392 = vst [vmem:[#allocation33_spill] sm:$0xff] %v5868_v17  ;;  %v5872_v21 = vadd.f32 %v1764_v13, %v1748_v18  ;;  %v1229_v18 = vld [vmem:[#allocation11 + $0x40] sm:$0xff] }
 0x218   : > { %v1250_v17 = vld [vmem:[#allocation11 + $0xe0] sm:$0xff] }
 0x219   : > { %6393 = vst [vmem:[#allocation34_spill] sm:$0xff] %v5872_v21  ;;  %v1233_v21 = vld [vmem:[#allocation11 + $0x60] sm:$0xff] }
 0x21a   : > { %v5874_v22 = vpop.f32.mrf.mxu3 }
 0x21c   : > { %v1546_v23 = vpop.f32.mrf.mxu1  ;;  %v1611_v24 = vpop.f32.mrf.mxu2 }
 0x21d   : > { %v1580_v25 = vsub.f32 %v1401_v19, %v1546_v23  ;;  %v1246_v19 = vld [vmem:[#allocation11 + $0xc0] sm:$0xff] }
 0x21e   : > { %v5876_v28 = vpop.f32.mrf.mxu0 }
 0x21f   : > { %v5878_v32 = vmul.f32 %v1580_v25, %v1225_v29  ;;  %v1766_v33 = vmul.f32 %v1580_v25, %v1242_v30 }
 0x221   : > { %6394 = vst [vmem:[#allocation35_spill] sm:$0xff] %v5878_v32 }
 0x222   : > { %v1660_v31 = vpop.f32.mrf.mxu3 }
 0x223   : > { %v1661_v34 = vadd.f32 %v1660_v31, %v1611_v24 }
 0x224   : > { %v5880_v35 = vpop.f32.mrf.mxu1  ;;  %v5882_v36 = vpop.f32.mrf.mxu2 }
 0x225   : > { %v5884_v37 = vmul.f32 %v1661_v34, %v1242_v30  ;;  %v1750_v38 = vmul.f32 %v1661_v34, %v1225_v29 }
 0x226   : > { %v1406_v39 = vpop.f32.mrf.mxu0 }
 0x227   : > { %6395 = vst [vmem:[#allocation36_spill] sm:$0xff] %v5884_v37  ;;  %v5888_v41 = vadd.f32 %v1766_v33, %v1750_v38 }
 0x229   : > { %6396 = vst [vmem:[#allocation37_spill] sm:$0xff] %v5888_v41 }
 0x22a   : > { %v5890_v44 = vpop.f32.mrf.mxu3 }
 0x22c   : > { %v1551_v45 = vpop.f32.mrf.mxu1  ;;  %v1616_v46 = vpop.f32.mrf.mxu2 }
 0x22d   : > { %v1582_v47 = vsub.f32 %v1406_v39, %v1551_v45  ;;  %v1235_v39 = vld [vmem:[#allocation11 + $0x70] sm:$0xff] }
 0x22e   : > { %v5892_v48 = vpop.f32.mrf.mxu0 }
 0x22f   : > { %v5894_v53 = vmul.f32 %v1582_v47, %v1227_v49  ;;  %v1768_v54 = vmul.f32 %v1582_v47, %v1244_v50 }
 0x232   : > { %v1665_v51 = vpop.f32.mrf.mxu3 }
 0x233   : > { %v1666_v55 = vadd.f32 %v1665_v51, %v1616_v46 }
 0x234   : > { %v5896_v57 = vpop.f32.mrf.mxu1  ;;  %v5898_v58 = vpop.f32.mrf.mxu2 }
 0x235   : > { %v5900_v62 = vmul.f32 %v1666_v55, %v1244_v50  ;;  %v1752_v63 = vmul.f32 %v1666_v55, %v1227_v49 }
 0x236   : > { %v1411_v3 = vpop.f32.mrf.mxu0 }
 0x237   : > { %v5904_v5 = vadd.f32 %v1768_v54, %v1752_v63 }
 0x239   : > { %6397 = vst [vmem:[#allocation38_spill] sm:$0xff] %v5904_v5  ;;  %v1249_v5 = vld [vmem:[#allocation11 + $0xd8] sm:$0xff] }
 0x23a   : > { %v5906_v7 = vpop.f32.mrf.mxu3 }
 0x23c   : > { %v1556_v8 = vpop.f32.mrf.mxu1  ;;  %v1621_v9 = vpop.f32.mrf.mxu2 }
 0x23d   : > { %v1584_v13 = vsub.f32 %v1411_v3, %v1556_v8 }
 0x23e   : > { %v1413_v14 = vpop.f32.mrf.mxu0 }
 0x23f   : > { %v5908_v24 = vmul.f32 %v1584_v13, %v1229_v18  ;;  %v1770_v25 = vmul.f32 %v1584_v13, %v1246_v19 }
 0x242   : > { %v1670_v23 = vpop.f32.mrf.mxu3 }
 0x243   : > { %v1671_v29 = vadd.f32 %v1670_v23, %v1621_v9 }
 0x244   : > { %v1558_v30 = vpop.f32.mrf.mxu1  ;;  %v5910_v31 = vpop.f32.mrf.mxu2 }
 0x245   : > { %v5912_v33 = vmul.f32 %v1671_v29, %v1246_v19  ;;  %v1754_v34 = vmul.f32 %v1671_v29, %v1229_v18  ;;  %v5920_v42 = vsub.f32 %v1413_v14, %v1558_v30  ;;  %v1234_v14 = vld [vmem:[#allocation11 + $0x68] sm:$0xff] }
 0x246   : > { %v1416_v38 = vpop.f32.mrf.mxu0  ;;  %v1251_v30 = vld [vmem:[#allocation11 + $0xe8] sm:$0xff] }
 0x247   : > { %v5916_v45 = vadd.f32 %v1770_v25, %v1754_v34 }
 0x24a   : > { %v5918_v46 = vpop.f32.mrf.mxu3 }
 0x24c   : > { %v1561_v47 = vpop.f32.mrf.mxu1  ;;  %v1626_v49 = vpop.f32.mrf.mxu2 }
 0x24d   : > { %v1586_v1 = vsub.f32 %v1416_v38, %v1561_v47 }
 0x24e   : > { %v1418_v50 = vpop.f32.mrf.mxu0 }
 0x252   : > { %v1675_v51 = vpop.f32.mrf.mxu3 }
 0x253   : > { %v1676_v61 = vadd.f32 %v1675_v51, %v1626_v49  ;;  %v1231_v51 = vld [vmem:[#allocation11 + $0x50] sm:$0xff] }
 0x254   : > { %v1563_v54 = vpop.f32.mrf.mxu1  ;;  %v1628_v55 = vpop.f32.mrf.mxu2 }
 0x255   : > { %v1587_v56 = vsub.f32 %v1418_v50, %v1563_v54 }
 0x256   : > { %v1421_v3 = vpop.f32.mrf.mxu0 }
 0x25a   : > { %v1677_v63 = vpop.f32.mrf.mxu3 }
 0x25b   : > { %v1678_v41 = vadd.f32 %v1677_v63, %v1628_v55 }
 0x25c   : > { %v1566_v8 = vpop.f32.mrf.mxu1  ;;  %v1631_v9 = vpop.f32.mrf.mxu2 }
 0x25d   : > { %v1588_v27 = vsub.f32 %v1421_v3, %v1566_v8 }
 0x25e   : > { %v1423_v18 = vpop.f32.mrf.mxu0 }
 0x25f   : > { %v1702_v38 = vmul.f32 %v1588_v27, %v1233_v21  ;;  %v1774_v47 = vmul.f32 %v1588_v27, %v1250_v17  ;;  %v1673_v27 = vadd.f32 %v5918_v46, %v5910_v31  ;;  %v1668_v31 = vadd.f32 %v5906_v7, %v5898_v58 }
 0x262   : > { %v1680_v13 = vpop.f32.mrf.mxu3 }
 0x263   : > { %v1681_v37 = vadd.f32 %v1680_v13, %v1631_v9 }
 0x264   : > { %v1568_v19 = vpop.f32.mrf.mxu1  ;;  %v1633_v23 = vpop.f32.mrf.mxu2 }
 0x265   : > { %v1589_v32 = vsub.f32 %v1423_v18, %v1568_v19  ;;  %v1718_v63 = vmul.f32 %v1681_v37, %v1250_v17  ;;  %v1758_v9 = vmul.f32 %v1681_v37, %v1233_v21  ;;  %v1248_v19 = vld [vmem:[#allocation11 + $0xd0] sm:$0xff] }
 0x266   : > { %v1426_v25 = vpop.f32.mrf.mxu0  ;;  %v1772_v21 = vmul.f32 %v1586_v1, %v1248_v19  ;;  %v1716_v37 = vmul.f32 %v1676_v61, %v1248_v19 }
 0x267   : > { %v1703_v13 = vmul.f32 %v1589_v32, %v1234_v14  ;;  %v1775_v18 = vmul.f32 %v1589_v32, %v1251_v30  ;;  %v1756_v32 = vmul.f32 %v1676_v61, %v1231_v51 }
 0x26a   : > { %v1682_v29 = vpop.f32.mrf.mxu3 }
 0x26b   : > { %v1683_v26 = vadd.f32 %v1682_v29, %v1633_v23 }
 0x26c   : > { %v1571_v0 = vpop.f32.mrf.mxu1  ;;  %v1636_v34 = vpop.f32.mrf.mxu2 }
 0x26d   : > { %v1590_v40 = vsub.f32 %v1426_v25, %v1571_v0  ;;  %v1236_v0 = vld [vmem:[#allocation11 + $0x78] sm:$0xff]  ;;  %v1719_v49 = vmul.f32 %v1683_v26, %v1251_v30  ;;  %v1759_v50 = vmul.f32 %v1683_v26, %v1234_v14  ;;  %v1700_v26 = vmul.f32 %v1586_v1, %v1231_v51  ;;  %v1230_v30 = vld [vmem:[#allocation11 + $0x48] sm:$0xff] }
 0x26e   : > { %v1428_v10 = vpop.f32.mrf.mxu0  ;;  %v1253_v25 = vld [vmem:[#allocation11 + $0xf8] sm:$0xff]  ;;  %v1755_v46 = vmul.f32 %v1673_v27, %v1230_v30  ;;  %v1663_v51 = vadd.f32 %v5890_v44, %v5882_v36  ;;  %v1658_v44 = vadd.f32 %v5874_v22, %v5866_v16  ;;  %v1579_v16 = vsub.f32 %v5860_v6, %v5864_v15 }
 0x26f   : > { %v1704_v52 = vmul.f32 %v1590_v40, %v1235_v39  ;;  %v1776_v3 = vmul.f32 %v1590_v40, %v1252_v11  ;;  %v1732_v7 = vsub.f32 %v1700_v26, %v1716_v37  ;;  %v1653_v26 = vadd.f32 %v5858_v2, %v5850_v60  ;;  %v6406_v60 = vld [vmem:[#allocation27_spill] sm:$0xff] }
 0x270   : > { %v6401_v6 = vsub.f32 %v5894_v53, %v5900_v62 }
 0x272   : > { %v1685_v20 = vpop.f32.mrf.mxu3 }
 0x273   : > { %v1686_v43 = vadd.f32 %v1685_v20, %v1636_v34  ;;  %v1232_v34 = vld [vmem:[#allocation11 + $0x58] sm:$0xff] }
 0x274   : > { %v1573_v4 = vpop.f32.mrf.mxu1  ;;  %v1638_v59 = vpop.f32.mrf.mxu2  ;;  %v1701_v14 = vmul.f32 %v1587_v56, %v1232_v34 }
 0x275   : > { %v1591_v12 = vsub.f32 %v1428_v10, %v1573_v4  ;;  %v1720_v8 = vmul.f32 %v1686_v43, %v1252_v11  ;;  %v1760_v23 = vmul.f32 %v1686_v43, %v1235_v39  ;;  %v1717_v39 = vmul.f32 %v1678_v41, %v1249_v5 }
 0x277   : > { %v1705_v10 = vmul.f32 %v1591_v12, %v1236_v0  ;;  %v1777_v4 = vmul.f32 %v1591_v12, %v1253_v25  ;;  %v1736_v40 = vsub.f32 %v1704_v52, %v1720_v8  ;;  %v1792_v11 = vadd.f32 %v1776_v3, %v1760_v23 }
 0x278   : > { %v1735_v12 = vsub.f32 %v1703_v13, %v1719_v49  ;;  %v1773_v52 = vmul.f32 %v1587_v56, %v1249_v5  ;;  %v1734_v3 = vsub.f32 %v1702_v38, %v1718_v63  ;;  %v1790_v8 = vadd.f32 %v1774_v47, %v1758_v9  ;;  %v5932_v5 = vld [vmem:[#allocation11 + $0x38] sm:$0xff]  ;;  %v5942_v63 = vld [vmem:[#allocation11 + $0x28] sm:$0xff] }
 0x279   : > { %v1733_v1 = vsub.f32 %v1701_v14, %v1717_v39  ;;  %v1699_v56 = vmul.f32 %v5920_v42, %v1230_v30  ;;  %v5934_v38 = vld [vmem:[#allocation11 + $0xb8] sm:$0xff]  ;;  %v1788_v47 = vadd.f32 %v1772_v21, %v1756_v32  ;;  %v1581_v9 = vsub.f32 %v5876_v28, %v5880_v35  ;;  %v6407_v30 = vld [vmem:[#allocation35_spill] sm:$0xff] }
 0x27a   : > { %v1687_v20 = vpop.f32.mrf.mxu3  ;;  %v1744_v61 = vpack.c.bf16 %v1735_v12, %v1734_v3  ;;  %v1751_v19 = vmul.f32 %v1663_v51, %v5942_v63  ;;  %v6398_v28 = vsub.f32 %v5908_v24, %v5912_v33 }
 0x27b   : > { %v1688_v29 = vadd.f32 %v1687_v20, %v1638_v59  ;;  %v1757_v20 = vmul.f32 %v1678_v41, %v1232_v34  ;;  %v1695_v22 = vmul.f32 %v1581_v9, %v5942_v63 }
 0x27d   : > { %v1721_v54 = vmul.f32 %v1688_v29, %v1253_v25  ;;  %v1761_v55 = vmul.f32 %v1688_v29, %v1236_v0  ;;  %v1791_v25 = vadd.f32 %v1775_v18, %v1759_v50  ;;  %v5924_v29 = vld [vmem:[#allocation11 + $0xc8] sm:$0xff]  ;;  %v1789_v23 = vadd.f32 %v1773_v52, %v1757_v20  ;;  %v6408_v52 = vld [vmem:[#allocation36_spill] sm:$0xff] }
 0x27e   : > { %v1715_v41 = vmul.f32 %v1673_v27, %v5924_v29  ;;  %v1583_v50 = vsub.f32 %v5892_v48, %v5896_v57  ;;  %v1771_v58 = vmul.f32 %v5920_v42, %v5924_v29  ;;  %v1753_v48 = vmul.f32 %v1668_v31, %v5932_v5  ;;  %v5944_v42 = vld [vmem:[#allocation11 + $0xa8] sm:$0xff] }
 0x27f   : > { %v1737_v43 = vsub.f32 %v1705_v10, %v1721_v54  ;;  %v1793_v59 = vadd.f32 %v1777_v4, %v1761_v55  ;;  %v1800_v49 = vpack.c.bf16 %v1791_v25, %v1790_v8  ;;  %v1713_v10 = vmul.f32 %v1668_v31, %v5934_v38  ;;  %v6402_v20 = vld [vmem:[#allocation38_spill] sm:$0xff]  ;;  %v6410_v31 = vld [vmem:[#allocation37_spill] sm:$0xff] }
 0x280   : > { %v1731_v57 = vsub.f32 %v1699_v56, %v1715_v41  ;;  %v1787_v4 = vadd.f32 %v1771_v58, %v1755_v46  ;;  %v1743_v54 = vpack.c.bf16 %v1733_v1, %v1732_v7  ;;  %v1799_v55 = vpack.c.bf16 %v1789_v23, %v1788_v47  ;;  %v5974_v25 = vld [vmem:[#allocation11 + $0x8] sm:$0xff] }
 0x281   : > { %v1745_v0 = vpack.c.bf16 %v1737_v43, %v1736_v40  ;;  %v1801_v17 = vpack.c.bf16 %v1793_v59, %v1792_v11  ;;  %v1697_v13 = vmul.f32 %v1583_v50, %v5932_v5  ;;  %v1769_v36 = vmul.f32 %v1583_v50, %v5934_v38  ;;  %v5958_v43 = vld [vmem:[#allocation11 + $0x18] sm:$0xff]  ;;  %6403 = vst [vmem:[#allocation38_spill] sm:$0xff] %v5974_v25  ;;  %v6412_v50 = vld [vmem:[#allocation33_spill] sm:$0xff]  ;;  %v6414_v7 = vld [vmem:[#allocation34_spill] sm:$0xff] }
 0x282   : > { %v1711_v18 = vmul.f32 %v1663_v51, %v5944_v42  ;;  %v1742_v35 = vpack.c.bf16 %v1731_v57, %v6398_v28  ;;  %v1798_v11 = vpack.c.bf16 %v1787_v4, %v5916_v45  ;;  %6399 = vst [vmem:[#allocation39_spill] sm:$0xff] %v5958_v43  ;;  %v5960_v59 = vld [vmem:[#allocation11 + $0x98] sm:$0xff]  ;;  %v1767_v27 = vmul.f32 %v1581_v9, %v5944_v42  ;;  %v6418_v4 = vld [vmem:[#allocation31_spill] sm:$0xff]  ;;  %v4773_v28 = vld [vmem:[#allocation3] sm:$0xff] }
 0x283   : > { %1850 = vmatpush.bf16.msra.mxu0 %v1745_v0  ;;  %1947 = vmatpush.bf16.msra.mxu1 %v1801_v17  ;;  %v1729_v34 = vsub.f32 %v1697_v13, %v1713_v10  ;;  %v1785_v40 = vadd.f32 %v1769_v36, %v1753_v48  ;;  %6400 = vst [vmem:[#allocation40_spill] sm:$0xff] %v5960_v59  ;;  %v6415_v51 = vld [vmem:[#allocation28_spill] sm:$0xff]  ;;  %v6416_v10 = vld [vmem:[#allocation30_spill] sm:$0xff]  ;;  %v4776_v9 = vld [vmem:[#allocation3 + $0x50] sm:$0xff] }
 0x284   : > { %2044 = vmatpush.bf16.msra.mxu2 %v1745_v0  ;;  %2093 = vmatpush.bf16.msra.mxu3 %v1801_v17  ;;  %v1709_v24 = vmul.f32 %v1658_v44, %v5960_v59  ;;  %v1749_v33 = vmul.f32 %v1658_v44, %v5958_v43  ;;  %v1727_v45 = vsub.f32 %v1695_v22, %v1711_v18  ;;  %v5976_v0 = vld [vmem:[#allocation11 + $0x88] sm:$0xff]  ;;  %v6405_v17 = vld [vmem:[#allocation29_spill] sm:$0xff]  ;;  %v4767_v44 = vld [vmem:[#allocation2 + $0x78] sm:$0xff] }
 0x285   : > { %v1783_v39 = vadd.f32 %v1767_v27, %v1751_v19  ;;  %v1741_v15 = vpack.c.bf16 %v1729_v34, %v6401_v6  ;;  %v1797_v12 = vpack.c.bf16 %v1785_v40, %v6402_v20  ;;  %6404 = vst [vmem:[#allocation41_spill] sm:$0xff] %v5976_v0  ;;  %v1577_v2 = vsub.f32 %v6406_v60, %v6405_v17  ;;  %v5998_v13 = vld [vmem:[#allocation9 + $0x140] sm:$0xff]  ;;  %v4766_v19 = vld [vmem:[#allocation2 + $0x70] sm:$0xff]  ;;  %v4774_v34 = vld [vmem:[#allocation3 + $0x8] sm:$0xff] }
 0x286   : > { %v1693_v21 = vmul.f32 %v1579_v16, %v5958_v43  ;;  %v1765_v37 = vmul.f32 %v1579_v16, %v5960_v59  ;;  %v1707_v32 = vmul.f32 %v1653_v26, %v5976_v0  ;;  %v1747_v53 = vmul.f32 %v1653_v26, %v5974_v25  ;;  %6419 = vst [vmem:[#allocation29_spill] sm:$0xff] %v5998_v13  ;;  %v6000_v36 = vld [vmem:[#allocation9 + $0x100] sm:$0xff]  ;;  %v6006_v16 = vld [vmem:[#allocation9 + $0x148] sm:$0xff]  ;;  %v4763_v27 = vld [vmem:[#allocation2 + $0x10] sm:$0xff] }
 0x287   : > { %1851 = vmatpush.bf16.msra.mxu0 %v1744_v61  ;;  %1948 = vmatpush.bf16.msra.mxu1 %v1800_v49  ;;  %v6409_v3 = vsub.f32 %v6407_v30, %v6408_v52  ;;  %v1796_v41 = vpack.c.bf16 %v1783_v39, %v6410_v31  ;;  %v1691_v46 = vmul.f32 %v1577_v2, %v5974_v25  ;;  %v4775_v18 = vld [vmem:[#allocation3 + $0x60] sm:$0xff]  ;;  %v6008_v22 = vld [vmem:[#allocation9 + $0x108] sm:$0xff]  ;;  %v4771_v26 = vld [vmem:[#allocation3 + $0x18] sm:$0xff] }
 0x288   : > { %2045 = vmatpush.bf16.msra.mxu2 %v1744_v61  ;;  %2094 = vmatpush.bf16.msra.mxu3 %v1800_v49  ;;  %v1725_v62 = vsub.f32 %v1693_v21, %v1709_v24  ;;  %v1781_v14 = vadd.f32 %v1765_v37, %v1749_v33  ;;  %v1763_v1 = vmul.f32 %v1577_v2, %v5976_v0  ;;  %v6411_v49 = vld [vmem:[#allocation32_spill] sm:$0xff]  ;;  %v4765_v40 = vld [vmem:[#allocation2 + $0x60] sm:$0xff]  ;;  %v6014_v6 = vld [vmem:[#allocation9 + $0x150] sm:$0xff] }
 0x289   : > { %v1740_v8 = vpack.c.bf16 %v1727_v45, %v6409_v3  ;;  %v1723_v23 = vsub.f32 %v1691_v46, %v1707_v32  ;;  %v6413_v56 = vsub.f32 %v6411_v49, %v6412_v50  ;;  %v6417_v48 = vsub.f32 %v6415_v51, %v6416_v10  ;;  %6420 = vst [vmem:[#allocation27_spill] sm:$0xff] %v6000_v36  ;;  %v4762_v24 = vld [vmem:[#allocation2 + $0x20] sm:$0xff]  ;;  %v4770_v33 = vld [vmem:[#allocation3 + $0x78] sm:$0xff]  ;;  %v6038_v2 = vld [vmem:[#allocation9 + $0x168] sm:$0xff] }
 0x28a   : > { %v1779_v61 = vadd.f32 %v1763_v1, %v1747_v53  ;;  %v1795_v47 = vpack.c.bf16 %v1781_v14, %v6414_v7  ;;  %6421 = vst [vmem:[#allocation35_spill] sm:$0xff] %v6006_v16  ;;  %v4761_v45 = vld [vmem:[#allocation2 + $0x40] sm:$0xff]  ;;  %v6022_v20 = vld [vmem:[#allocation9 + $0x158] sm:$0xff]  ;;  %v6040_v21 = vld [vmem:[#allocation9 + $0x128] sm:$0xff] }
 0x28b   : > { %1852 = vmatpush.bf16.msra.mxu0 %v1743_v54  ;;  %1949 = vmatpush.bf16.msra.mxu1 %v1799_v55  ;;  %v1739_v58 = vpack.c.bf16 %v1725_v62, %v6413_v56  ;;  %v1738_v57 = vpack.c.bf16 %v1723_v23, %v6417_v48  ;;  %6422 = vst [vmem:[#allocation36_spill] sm:$0xff] %v6008_v22  ;;  %v4769_v39 = vld [vmem:[#allocation3 + $0x20] sm:$0xff]  ;;  %v6046_v37 = vld [vmem:[#allocation9 + $0x170] sm:$0xff]  ;;  %v6054_v53 = vld [vmem:[#allocation9 + $0x178] sm:$0xff] }
 0x28c   : > { %2046 = vmatpush.bf16.msra.mxu2 %v1743_v54  ;;  %2095 = vmatpush.bf16.msra.mxu3 %v1799_v55  ;;  %v1794_v54 = vpack.c.bf16 %v1779_v61, %v6418_v4  ;;  %v4768_v55 = vld [vmem:[#allocation2 + $0x28] sm:$0xff]  ;;  %6423 = vst [vmem:[#allocation37_spill] sm:$0xff] %v6014_v6  ;;  %v6030_v17 = vld [vmem:[#allocation9 + $0x160] sm:$0xff]  ;;  %v6048_v32 = vld [vmem:[#allocation9 + $0x130] sm:$0xff] }
 0x28d   : > { %6425 = vst [vmem:[#allocation33_spill] sm:$0xff] %v6022_v20  ;;  %v6032_v60 = vld [vmem:[#allocation9 + $0x120] sm:$0xff]  ;;  %v6056_v62 = vld [vmem:[#allocation9 + $0x138] sm:$0xff]  ;;  %v5489_v10 = vld [vmem:[#allocation9 + $0x48] sm:$0xff] }
 0x28e   : > { %6427 = vst [vmem:[#allocation28_spill] sm:$0xff] %v6030_v17  ;;  %v5487_v52 = vld [vmem:[#allocation9 + $0x40] sm:$0xff]  ;;  %v5490_v48 = vld [vmem:[#allocation9 + $0x8] sm:$0xff] }
 0x28f   : > { %1853 = vmatpush.bf16.msra.mxu0 %v1742_v35  ;;  %1950 = vmatpush.bf16.msra.mxu1 %v1798_v11  ;;  %6428 = vst [vmem:[#allocation30_spill] sm:$0xff] %v6032_v60  ;;  %v5488_v3 = vld [vmem:[#allocation9] sm:$0xff] }
 0x290   : > { %2047 = vmatpush.bf16.msra.mxu2 %v1742_v35  ;;  %2096 = vmatpush.bf16.msra.mxu3 %v1798_v11  ;;  %v4764_v35 = vld [vmem:[#allocation2 + $0x38] sm:$0xff]  ;;  %6429 = vst [vmem:[#allocation31_spill] sm:$0xff] %v6038_v2 }
 0x291   : > { %v4772_v11 = vld [vmem:[#allocation3 + $0x58] sm:$0xff]  ;;  %6430 = vst [vmem:[#allocation42_spill] sm:$0xff] %v6040_v21 }
 0x292   : > { %6431 = vst [vmem:[#allocation43_spill] sm:$0xff] %v6046_v37 }
 0x293   : > { %1854 = vmatpush.bf16.msra.mxu0 %v1741_v15  ;;  %1951 = vmatpush.bf16.msra.mxu1 %v1797_v12  ;;  %6432 = vst [vmem:[#allocation44_spill] sm:$0xff] %v6048_v32 }
 0x294   : > { %2048 = vmatpush.bf16.msra.mxu2 %v1741_v15  ;;  %2097 = vmatpush.bf16.msra.mxu3 %v1797_v12  ;;  %v6016_v15 = vld [vmem:[#allocation9 + $0x110] sm:$0xff]  ;;  %v6024_v12 = vld [vmem:[#allocation9 + $0x118] sm:$0xff]  ;;  %6433 = vst [vmem:[#allocation45_spill] sm:$0xff] %v6054_v53 }
 0x295   : > { %6424 = vst [vmem:[#allocation32_spill] sm:$0xff] %v6016_v15 }
 0x296   : > { %6426 = vst [vmem:[#allocation34_spill] sm:$0xff] %v6024_v12 }
 0x297   : > { %1855 = vmatpush.bf16.msra.mxu0 %v1740_v8  ;;  %1952 = vmatpush.bf16.msra.mxu1 %v1796_v41  ;;  %6434 = vst [vmem:[#allocation46_spill] sm:$0xff] %v6056_v62 }
 0x298   : > { %2049 = vmatpush.bf16.msra.mxu2 %v1740_v8  ;;  %2098 = vmatpush.bf16.msra.mxu3 %v1796_v41 }
 0x29b   : > { %1856 = vmatpush.bf16.msra.mxu0 %v1739_v58  ;;  %1953 = vmatpush.bf16.msra.mxu1 %v1795_v47 }
 0x29c   : > { %2050 = vmatpush.bf16.msra.mxu2 %v1739_v58  ;;  %2099 = vmatpush.bf16.msra.mxu3 %v1795_v47 }
 0x29f   : > { %1857 = vmatpush.bf16.msra.mxu0 %v1738_v57  ;;  %1954 = vmatpush.bf16.msra.mxu1 %v1794_v54 }
 0x2a0   : > { %2051 = vmatpush.bf16.msra.mxu2 %v1738_v57  ;;  %2100 = vmatpush.bf16.msra.mxu3 %v1794_v54 }
 0x2a2   : > { %1858 = vmatmul.bf16.vlgmr.msra.gmra.mxu0 %v6000_v36  ;;  %1955 = vmatmul.bf16.vlgmr.msra.gmra.mxu1 %v5998_v13 }
 0x2a3   : > { %2256 = vmatpush.bf16.msrb.mxu0 %v4768_v55  ;;  %2353 = vmatpush.bf16.msrb.mxu1 %v4776_v9 }
 0x2a4   : > { %2418 = vmatpush.bf16.msrb.mxu2 %v4768_v55  ;;  %2467 = vmatpush.bf16.msrb.mxu3 %v4776_v9 }
 0x2a5   : > { %2052 = vmatmul.bf16.vlgmr.msra.gmra.mxu2 %v5998_v13  ;;  %2101 = vmatmul.bf16.vlgmr.msra.gmra.mxu3 %v6000_v36 }
 0x2a7   : > { %2257 = vmatpush.bf16.msrb.mxu0 %v4767_v44  ;;  %2354 = vmatpush.bf16.msrb.mxu1 %v4775_v18 }
 0x2a8   : > { %2419 = vmatpush.bf16.msrb.mxu2 %v4767_v44  ;;  %2468 = vmatpush.bf16.msrb.mxu3 %v4775_v18 }
 0x2ab   : > { %2258 = vmatpush.bf16.msrb.mxu0 %v4766_v19  ;;  %2355 = vmatpush.bf16.msrb.mxu1 %v4774_v34 }
 0x2ac   : > { %2420 = vmatpush.bf16.msrb.mxu2 %v4766_v19  ;;  %2469 = vmatpush.bf16.msrb.mxu3 %v4774_v34 }
 0x2af   : > { %2259 = vmatpush.bf16.msrb.mxu0 %v4765_v40  ;;  %2356 = vmatpush.bf16.msrb.mxu1 %v4773_v28 }
 0x2b0   : > { %2421 = vmatpush.bf16.msrb.mxu2 %v4765_v40  ;;  %2470 = vmatpush.bf16.msrb.mxu3 %v4773_v28 }
 0x2b2   : > { %1863 = vmatmul.bf16.gmra.mxu0 %v6008_v22  ;;  %1960 = vmatmul.bf16.gmra.mxu1 %v6006_v16 }
 0x2b3   : > { %2260 = vmatpush.bf16.msrb.mxu0 %v4764_v35  ;;  %2357 = vmatpush.bf16.msrb.mxu1 %v4772_v11 }
 0x2b4   : > { %2422 = vmatpush.bf16.msrb.mxu2 %v4764_v35  ;;  %2471 = vmatpush.bf16.msrb.mxu3 %v4772_v11 }
 0x2b5   : > { %2057 = vmatmul.bf16.gmra.mxu2 %v6006_v16  ;;  %2106 = vmatmul.bf16.gmra.mxu3 %v6008_v22 }
 0x2b7   : > { %2261 = vmatpush.bf16.msrb.mxu0 %v4763_v27  ;;  %2358 = vmatpush.bf16.msrb.mxu1 %v4771_v26 }
 0x2b8   : > { %2423 = vmatpush.bf16.msrb.mxu2 %v4763_v27  ;;  %2472 = vmatpush.bf16.msrb.mxu3 %v4771_v26  ;;  %v5491_v26 = vld [vmem:[#allocation9 + $0x50] sm:$0xff] }
 0x2bb   : > { %2262 = vmatpush.bf16.msrb.mxu0 %v4762_v24  ;;  %2359 = vmatpush.bf16.msrb.mxu1 %v4770_v33 }
 0x2bc   : > { %2424 = vmatpush.bf16.msrb.mxu2 %v4762_v24  ;;  %2473 = vmatpush.bf16.msrb.mxu3 %v4770_v33  ;;  %v5492_v24 = vld [vmem:[#allocation9 + $0x10] sm:$0xff] }
 0x2bf   : > { %2263 = vmatpush.bf16.msrb.mxu0 %v4761_v45  ;;  %2360 = vmatpush.bf16.msrb.mxu1 %v4769_v39 }
 0x2c0   : > { %2425 = vmatpush.bf16.msrb.mxu2 %v4761_v45  ;;  %2474 = vmatpush.bf16.msrb.mxu3 %v4769_v39 }
 0x2c2   : > { %1868 = vmatmul.bf16.gmra.mxu0 %v6016_v15  ;;  %1965 = vmatmul.bf16.gmra.mxu1 %v6014_v6 }
 0x2c5   : > { %2062 = vmatmul.bf16.gmra.mxu2 %v6014_v6  ;;  %2111 = vmatmul.bf16.gmra.mxu3 %v6016_v15 }
 0x2d2   : > { %1873 = vmatmul.bf16.gmra.mxu0 %v6024_v12  ;;  %1970 = vmatmul.bf16.gmra.mxu1 %v6022_v20 }
 0x2d5   : > { %2067 = vmatmul.bf16.gmra.mxu2 %v6022_v20  ;;  %2116 = vmatmul.bf16.gmra.mxu3 %v6024_v12 }
 0x2e2   : > { %1878 = vmatmul.bf16.gmra.mxu0 %v6032_v60  ;;  %1975 = vmatmul.bf16.gmra.mxu1 %v6030_v17 }
 0x2e5   : > { %2072 = vmatmul.bf16.gmra.mxu2 %v6030_v17  ;;  %2121 = vmatmul.bf16.gmra.mxu3 %v6032_v60 }
 0x2f2   : > { %1883 = vmatmul.bf16.gmra.mxu0 %v6040_v21  ;;  %1980 = vmatmul.bf16.gmra.mxu1 %v6038_v2 }
 0x2f5   : > { %2077 = vmatmul.bf16.gmra.mxu2 %v6038_v2  ;;  %2126 = vmatmul.bf16.gmra.mxu3 %v6040_v21 }
 0x302   : > { %1888 = vmatmul.bf16.gmra.mxu0 %v6048_v32  ;;  %1985 = vmatmul.bf16.gmra.mxu1 %v6046_v37 }
 0x305   : > { %2082 = vmatmul.bf16.gmra.mxu2 %v6046_v37  ;;  %2131 = vmatmul.bf16.gmra.mxu3 %v6048_v32 }
 0x312   : > { %1893 = vmatmul.bf16.gmra.mxu0 %v6056_v62  ;;  %1990 = vmatmul.bf16.gmra.mxu1 %v6054_v53 }
 0x315   : > { %2087 = vmatmul.bf16.gmra.mxu2 %v6054_v53  ;;  %2136 = vmatmul.bf16.gmra.mxu3 %v6056_v62 }
 0x31f   : > { %v1859_v14 = vpop.f32.mrf.mxu0  ;;  %v1956_v30 = vpop.f32.mrf.mxu1 }
 0x320   : > { %v1996_v1 = vsub.f32 %v1859_v14, %v1956_v30 }
 0x322   : > { %2264 = vmatmul.bf16.vlgmr.msrb.gmra.mxu0 %v5488_v3  ;;  %2361 = vmatmul.bf16.vlgmr.msrb.gmra.mxu1 %v5487_v52 }
 0x325   : > { %2426 = vmatmul.bf16.vlgmr.msrb.gmra.mxu2 %v5487_v52  ;;  %2475 = vmatmul.bf16.vlgmr.msrb.gmra.mxu3 %v5488_v3 }
 0x327   : > { %v1861_v41 = vpop.f32.mrf.mxu0  ;;  %v1958_v46 = vpop.f32.mrf.mxu1 }
 0x328   : > { %v2053_v8 = vpop.f32.mrf.mxu2  ;;  %v2102_v31 = vpop.f32.mrf.mxu3  ;;  %v1997_v23 = vsub.f32 %v1861_v41, %v1958_v46 }
 0x329   : > { %v2103_v56 = vadd.f32 %v2102_v31, %v2053_v8 }
 0x32a   : > { %v4989_v61 = vpack.c.bf16 %v1997_v23, %v1996_v1 }
 0x32c   : > { %4990 = vst [vmem:[#allocation4 + $0x8] sm:$0xff] %v4989_v61  }
 0x32f   : > { %v1864_v47 = vpop.f32.mrf.mxu0  ;;  %v1961_v51 = vpop.f32.mrf.mxu1 }
 0x330   : > { %v2055_v49 = vpop.f32.mrf.mxu2  ;;  %v2104_v50 = vpop.f32.mrf.mxu3  ;;  %v1998_v9 = vsub.f32 %v1864_v47, %v1961_v51 }
 0x331   : > { %v2105_v58 = vadd.f32 %v2104_v50, %v2055_v49  ;;  %v5493_v49 = vld [vmem:[#allocation9 + $0x58] sm:$0xff] }
 0x332   : > { %2269 = vmatmul.bf16.gmra.mxu0 %v5490_v48  ;;  %2366 = vmatmul.bf16.gmra.mxu1 %v5489_v10  ;;  %v5494_v50 = vld [vmem:[#allocation9 + $0x18] sm:$0xff] }
 0x333   : > { %v5029_v7 = vpack.c.bf16 %v2105_v58, %v2103_v56 }
 0x335   : > { %5030 = vst [vmem:[#allocation5 + $0x18] sm:$0xff] %v5029_v7   ;;  %2431 = vmatmul.bf16.gmra.mxu2 %v5489_v10  ;;  %2480 = vmatmul.bf16.gmra.mxu3 %v5490_v48 }
 0x337   : > { %v1866_v54 = vpop.f32.mrf.mxu0  ;;  %v1963_v55 = vpop.f32.mrf.mxu1 }
 0x338   : > { %v2058_v57 = vpop.f32.mrf.mxu2  ;;  %v2107_v4 = vpop.f32.mrf.mxu3  ;;  %v1999_v44 = vsub.f32 %v1866_v54, %v1963_v55 }
 0x339   : > { %v2108_v40 = vadd.f32 %v2107_v4, %v2058_v57 }
 0x33a   : > { %v4994_v18 = vpack.c.bf16 %v1999_v44, %v1998_v9 }
 0x33c   : > { %5336 = vst [vmem:[#allocation4] sm:$0xff] %v4994_v18  }
 0x33f   : > { %v1869_v11 = vpop.f32.mrf.mxu0  ;;  %v1966_v27 = vpop.f32.mrf.mxu1 }
 0x340   : > { %v2060_v19 = vpop.f32.mrf.mxu2  ;;  %v2109_v34 = vpop.f32.mrf.mxu3  ;;  %v2000_v30 = vsub.f32 %v1869_v11, %v1966_v27 }
 0x341   : > { %v2110_v28 = vadd.f32 %v2109_v34, %v2060_v19  ;;  %v6435_v19 = vld [vmem:[#allocation21_spill] sm:$0xff]  ;;  %v6436_v34 = vld [vmem:[#allocation22_spill] sm:$0xff] }
 0x342   : > { %2274 = vmatmul.bf16.gmra.mxu0 %v5492_v24  ;;  %2371 = vmatmul.bf16.gmra.mxu1 %v5491_v26 }
 0x343   : > { %v5034_v35 = vpack.c.bf16 %v2110_v28, %v2108_v40  ;;  %v5495_v40 = vld [vmem:[#allocation9 + $0x60] sm:$0xff] }
 0x345   : > { %5343 = vst [vmem:[#allocation5 + $0x38] sm:$0xff] %v5034_v35   ;;  %2436 = vmatmul.bf16.gmra.mxu2 %v5491_v26  ;;  %2485 = vmatmul.bf16.gmra.mxu3 %v5492_v24 }
 0x347   : > { %v1871_v39 = vpop.f32.mrf.mxu0  ;;  %v1968_v14 = vpop.f32.mrf.mxu1 }
 0x348   : > { %v2063_v33 = vpop.f32.mrf.mxu2  ;;  %v2112_v45 = vpop.f32.mrf.mxu3  ;;  %v2001_v52 = vsub.f32 %v1871_v39, %v1968_v14 }
 0x349   : > { %v2113_v41 = vadd.f32 %v2112_v45, %v2063_v33 }
 0x34a   : > { %v4999_v3 = vpack.c.bf16 %v2001_v52, %v2000_v30 }
 0x34c   : > { %5337 = vst [vmem:[#allocation4 + $0x48] sm:$0xff] %v4999_v3  }
 0x34f   : > { %v1874_v23 = vpop.f32.mrf.mxu0  ;;  %v1971_v61 = vpop.f32.mrf.mxu1 }
 0x350   : > { %v2065_v8 = vpop.f32.mrf.mxu2  ;;  %v2114_v31 = vpop.f32.mrf.mxu3  ;;  %v2002_v51 = vsub.f32 %v1874_v23, %v1971_v61 }
 0x351   : > { %v2115_v46 = vadd.f32 %v2114_v31, %v2065_v8  ;;  %v6437_v31 = vld [vmem:[#allocation23_spill] sm:$0xff] }
 0x352   : > { %2279 = vmatmul.bf16.gmra.mxu0 %v5494_v50  ;;  %2376 = vmatmul.bf16.gmra.mxu1 %v5493_v49 }
 0x353   : > { %v5039_v1 = vpack.c.bf16 %v2115_v46, %v2113_v41  ;;  %v6438_v41 = vld [vmem:[#allocation24_spill] sm:$0xff] }
 0x355   : > { %5344 = vst [vmem:[#allocation5 + $0x48] sm:$0xff] %v5039_v1   ;;  %2441 = vmatmul.bf16.gmra.mxu2 %v5493_v49  ;;  %2490 = vmatmul.bf16.gmra.mxu3 %v5494_v50 }
 0x357   : > { %v1876_v7 = vpop.f32.mrf.mxu0  ;;  %v1973_v47 = vpop.f32.mrf.mxu1 }
 0x358   : > { %v2068_v56 = vpop.f32.mrf.mxu2  ;;  %v2117_v58 = vpop.f32.mrf.mxu3  ;;  %v2003_v10 = vsub.f32 %v1876_v7, %v1973_v47 }
 0x359   : > { %v2118_v54 = vadd.f32 %v2117_v58, %v2068_v56 }
 0x35a   : > { %v5004_v48 = vpack.c.bf16 %v2003_v10, %v2002_v51 }
 0x35c   : > { %5338 = vst [vmem:[#allocation4 + $0x60] sm:$0xff] %v5004_v48  }
 0x35f   : > { %v1879_v44 = vpop.f32.mrf.mxu0  ;;  %v1976_v18 = vpop.f32.mrf.mxu1 }
 0x360   : > { %v2070_v57 = vpop.f32.mrf.mxu2  ;;  %v2119_v4 = vpop.f32.mrf.mxu3  ;;  %v2004_v26 = vsub.f32 %v1879_v44, %v1976_v18 }
 0x361   : > { %v2120_v55 = vadd.f32 %v2119_v4, %v2070_v57  ;;  %v6439_v4 = vld [vmem:[#allocation25_spill] sm:$0xff] }
 0x362   : > { %2284 = vmatmul.bf16.gmra.mxu0 %v6436_v34  ;;  %2381 = vmatmul.bf16.gmra.mxu1 %v5495_v40 }
 0x363   : > { %v5044_v9 = vpack.c.bf16 %v2120_v55, %v2118_v54  ;;  %v6440_v54 = vld [vmem:[#allocation26_spill] sm:$0xff] }
 0x365   : > { %5345 = vst [vmem:[#allocation5 + $0x40] sm:$0xff] %v5044_v9   ;;  %2446 = vmatmul.bf16.gmra.mxu2 %v6435_v19  ;;  %2495 = vmatmul.bf16.gmra.mxu3 %v6436_v34 }
 0x367   : > { %v1881_v11 = vpop.f32.mrf.mxu0  ;;  %v1978_v27 = vpop.f32.mrf.mxu1 }
 0x368   : > { %v2073_v28 = vpop.f32.mrf.mxu2  ;;  %v2122_v35 = vpop.f32.mrf.mxu3  ;;  %v2005_v24 = vsub.f32 %v1881_v11, %v1978_v27 }
 0x369   : > { %v2123_v14 = vadd.f32 %v2122_v35, %v2073_v28 }
 0x36a   : > { %v5009_v33 = vpack.c.bf16 %v2005_v24, %v2004_v26 }
 0x36c   : > { %5339 = vst [vmem:[#allocation4 + $0x68] sm:$0xff] %v5009_v33  }
 0x36f   : > { %v1884_v3 = vpop.f32.mrf.mxu0  ;;  %v1981_v8 = vpop.f32.mrf.mxu1 }
 0x370   : > { %v2075_v45 = vpop.f32.mrf.mxu2  ;;  %v2124_v39 = vpop.f32.mrf.mxu3  ;;  %v2006_v49 = vsub.f32 %v1884_v3, %v1981_v8 }
 0x371   : > { %v2125_v30 = vadd.f32 %v2124_v39, %v2075_v45  ;;  %v5496_v45 = vld [vmem:[#allocation9 + $0x78] sm:$0xff] }
 0x372   : > { %2289 = vmatmul.bf16.gmra.mxu0 %v6438_v41  ;;  %2386 = vmatmul.bf16.gmra.mxu1 %v6437_v31  ;;  %v5497_v39 = vld [vmem:[#allocation9 + $0x38] sm:$0xff] }
 0x373   : > { %v5049_v52 = vpack.c.bf16 %v2125_v30, %v2123_v14 }
 0x375   : > { %5346 = vst [vmem:[#allocation5 + $0x28] sm:$0xff] %v5049_v52   ;;  %2451 = vmatmul.bf16.gmra.mxu2 %v6437_v31  ;;  %2500 = vmatmul.bf16.gmra.mxu3 %v6438_v41 }
 0x377   : > { %v1886_v23 = vpop.f32.mrf.mxu0  ;;  %v1983_v61 = vpop.f32.mrf.mxu1 }
 0x378   : > { %v2078_v46 = vpop.f32.mrf.mxu2  ;;  %v2127_v1 = vpop.f32.mrf.mxu3  ;;  %v2007_v50 = vsub.f32 %v1886_v23, %v1983_v61 }
 0x379   : > { %v2128_v47 = vadd.f32 %v2127_v1, %v2078_v46 }
 0x37a   : > { %v5014_v56 = vpack.c.bf16 %v2007_v50, %v2006_v49 }
 0x37c   : > { %5340 = vst [vmem:[#allocation4 + $0x18] sm:$0xff] %v5014_v56  }
 0x37f   : > { %v1889_v48 = vpop.f32.mrf.mxu0  ;;  %v1986_v57 = vpop.f32.mrf.mxu1 }
 0x380   : > { %v2080_v58 = vpop.f32.mrf.mxu2  ;;  %v2129_v7 = vpop.f32.mrf.mxu3  ;;  %v2008_v19 = vsub.f32 %v1889_v48, %v1986_v57  ;;  %v5499_v48 = vld [vmem:[#allocation11 + $0x80] sm:$0xff] }
 0x381   : > { %v2130_v51 = vadd.f32 %v2129_v7, %v2080_v58 }
 0x382   : > { %2294 = vmatmul.bf16.gmra.mxu0 %v6440_v54  ;;  %2391 = vmatmul.bf16.gmra.mxu1 %v6439_v4 }
 0x383   : > { %v5054_v10 = vpack.c.bf16 %v2130_v51, %v2128_v47  ;;  %v5498_v51 = vld [vmem:[#allocation11] sm:$0xff] }
 0x385   : > { %5347 = vst [vmem:[#allocation5] sm:$0xff] %v5054_v10   ;;  %2456 = vmatmul.bf16.gmra.mxu2 %v6439_v4  ;;  %2505 = vmatmul.bf16.gmra.mxu3 %v6440_v54 }
 0x387   : > { %v1891_v44 = vpop.f32.mrf.mxu0  ;;  %v1988_v18 = vpop.f32.mrf.mxu1 }
 0x388   : > { %v2083_v55 = vpop.f32.mrf.mxu2  ;;  %v2132_v9 = vpop.f32.mrf.mxu3  ;;  %v2009_v34 = vsub.f32 %v1891_v44, %v1988_v18 }
 0x389   : > { %v2133_v11 = vadd.f32 %v2132_v9, %v2083_v55 }
 0x38a   : > { %v5019_v40 = vpack.c.bf16 %v2009_v34, %v2008_v19 }
 0x38c   : > { %5341 = vst [vmem:[#allocation4 + $0x10] sm:$0xff] %v5019_v40  }
 0x38f   : > { %v1894_v24 = vpop.f32.mrf.mxu0  ;;  %v1991_v33 = vpop.f32.mrf.mxu1 }
 0x390   : > { %v2085_v28 = vpop.f32.mrf.mxu2  ;;  %v2134_v35 = vpop.f32.mrf.mxu3  ;;  %v2010_v8 = vsub.f32 %v1894_v24, %v1991_v33  ;;  %v5500_v24 = vld [vmem:[#allocation11 + $0x10] sm:$0xff] }
 0x391   : > { %v2135_v27 = vadd.f32 %v2134_v35, %v2085_v28 }
 0x392   : > { %2299 = vmatmul.bf16.gmra.mxu0 %v5497_v39  ;;  %2396 = vmatmul.bf16.gmra.mxu1 %v5496_v45 }
 0x393   : > { %v5059_v26 = vpack.c.bf16 %v2135_v27, %v2133_v11 }
 0x395   : > { %5348 = vst [vmem:[#allocation5 + $0x8] sm:$0xff] %v5059_v26   ;;  %2461 = vmatmul.bf16.gmra.mxu2 %v5496_v45  ;;  %2510 = vmatmul.bf16.gmra.mxu3 %v5497_v39  ;;  %v5501_v45 = vld [vmem:[#allocation11 + $0x90] sm:$0xff] }
 0x397   : > { %v1896_v52 = vpop.f32.mrf.mxu0  ;;  %v1993_v3 = vpop.f32.mrf.mxu1 }
 0x398   : > { %v2088_v14 = vpop.f32.mrf.mxu2  ;;  %v2137_v30 = vpop.f32.mrf.mxu3  ;;  %v2011_v31 = vsub.f32 %v1896_v52, %v1993_v3 }
 0x399   : > { %v2138_v23 = vadd.f32 %v2137_v30, %v2088_v14 }
 0x39a   : > { %v5024_v41 = vpack.c.bf16 %v2011_v31, %v2010_v8 }
 0x39c   : > { %5342 = vst [vmem:[#allocation4 + $0x38] sm:$0xff] %v5024_v41  }
 0x39f   : > { %v2265_v50 = vpop.f32.mrf.mxu0  ;;  %v2362_v56 = vpop.f32.mrf.mxu1 }
 0x3a0   : > { %v2090_v46 = vpop.f32.mrf.mxu2  ;;  %v2139_v1 = vpop.f32.mrf.mxu3  ;;  %v2402_v58 = vsub.f32 %v2265_v50, %v2362_v56 }
 0x3a1   : > { %v2140_v61 = vadd.f32 %v2139_v1, %v2090_v46 }
 0x3a2   : > { %v6073_v10 = vmul.f32 %v5498_v51, %v2402_v58  ;;  %v2588_v57 = vmul.f32 %v5499_v48, %v2402_v58  ;;  %v5502_v58 = vld [vmem:[#allocation11 + $0x20] sm:$0xff] }
 0x3a3   : > { %v5064_v49 = vpack.c.bf16 %v2140_v61, %v2138_v23 }
 0x3a4   : > { %6441 = vst [vmem:[#allocation21_spill] sm:$0xff] %v6073_v10 }
 0x3a5   : > { %5349 = vst [vmem:[#allocation5 + $0x70] sm:$0xff] %v5064_v49  }
 0x3a7   : > { %v6077_v9 = vpop.f32.mrf.mxu0  ;;  %v6079_v44 = vpop.f32.mrf.mxu1 }
 0x3a8   : > { %v2427_v7 = vpop.f32.mrf.mxu2  ;;  %v2476_v47 = vpop.f32.mrf.mxu3  ;;  %6443 = vst [vmem:[#allocation23_spill] sm:$0xff] %v6077_v9 }
 0x3a9   : > { %v2477_v4 = vadd.f32 %v2476_v47, %v2427_v7  ;;  %6444 = vst [vmem:[#allocation24_spill] sm:$0xff] %v6079_v44  ;;  %v5503_v47 = vld [vmem:[#allocation11 + $0xa0] sm:$0xff] }
 0x3ab   : > { %v6075_v54 = vmul.f32 %v5499_v48, %v2477_v4  ;;  %v2572_v55 = vmul.f32 %v5498_v51, %v2477_v4 }
 0x3ad   : > { %6442 = vst [vmem:[#allocation22_spill] sm:$0xff] %v6075_v54  ;;  %v6083_v19 = vadd.f32 %v2588_v57, %v2572_v55 }
 0x3af   : > { %6445 = vst [vmem:[#allocation25_spill] sm:$0xff] %v6083_v19  ;;  %v2270_v28 = vpop.f32.mrf.mxu0  ;;  %v2367_v35 = vpop.f32.mrf.mxu1 }
 0x3b0   : > { %v6085_v34 = vpop.f32.mrf.mxu2  ;;  %v6087_v40 = vpop.f32.mrf.mxu3  ;;  %v2404_v11 = vsub.f32 %v2270_v28, %v2367_v35 }
 0x3b1   : > { %6446 = vst [vmem:[#allocation26_spill] sm:$0xff] %v6085_v34 }
 0x3b2   : > { %6447 = vst [vmem:[#allocation47_spill] sm:$0xff] %v6087_v40  ;;  %v6089_v33 = vmul.f32 %v5500_v24, %v2404_v11  ;;  %v2590_v39 = vmul.f32 %v5501_v45, %v2404_v11  ;;  %v5509_v40 = vld [vmem:[#allocation11 + $0xf0] sm:$0xff] }
 0x3b4   : > { %6448 = vst [vmem:[#allocation48_spill] sm:$0xff] %v6089_v33 }
 0x3b7   : > { %v6093_v3 = vpop.f32.mrf.mxu0  ;;  %v6095_v8 = vpop.f32.mrf.mxu1 }
 0x3b8   : > { %v2432_v27 = vpop.f32.mrf.mxu2  ;;  %v2481_v26 = vpop.f32.mrf.mxu3 }
 0x3b9   : > { %v2482_v14 = vadd.f32 %v2481_v26, %v2432_v27 }
 0x3bb   : > { %v6091_v30 = vmul.f32 %v5501_v45, %v2482_v14  ;;  %v2574_v52 = vmul.f32 %v5500_v24, %v2482_v14 }
 0x3bd   : > { %6449 = vst [vmem:[#allocation49_spill] sm:$0xff] %v6091_v30  ;;  %v6099_v41 = vadd.f32 %v2590_v39, %v2574_v52 }
 0x3bf   : > { %6450 = vst [vmem:[#allocation50_spill] sm:$0xff] %v6099_v41  ;;  %v2275_v23 = vpop.f32.mrf.mxu0  ;;  %v2372_v61 = vpop.f32.mrf.mxu1 }
 0x3c0   : > { %v6101_v46 = vpop.f32.mrf.mxu2  ;;  %v6103_v1 = vpop.f32.mrf.mxu3  ;;  %v2406_v49 = vsub.f32 %v2275_v23, %v2372_v61  ;;  %v5504_v23 = vld [vmem:[#allocation11 + $0x30] sm:$0xff] }
 0x3c2   : > { %v6105_v7 = vmul.f32 %v5502_v58, %v2406_v49  ;;  %v2592_v51 = vmul.f32 %v5503_v47, %v2406_v49  ;;  %v5505_v49 = vld [vmem:[#allocation11 + $0xb0] sm:$0xff] }
 0x3c4   : > { %6451 = vst [vmem:[#allocation51_spill] sm:$0xff] %v6105_v7 }
 0x3c7   : > { %v6109_v55 = vpop.f32.mrf.mxu0  ;;  %v6111_v28 = vpop.f32.mrf.mxu1 }
 0x3c8   : > { %v2437_v50 = vpop.f32.mrf.mxu2  ;;  %v2486_v56 = vpop.f32.mrf.mxu3 }
 0x3c9   : > { %v2487_v48 = vadd.f32 %v2486_v56, %v2437_v50 }
 0x3cb   : > { %v6107_v57 = vmul.f32 %v5503_v47, %v2487_v48  ;;  %v2576_v4 = vmul.f32 %v5502_v58, %v2487_v48 }
 0x3cd   : > { %6452 = vst [vmem:[#allocation52_spill] sm:$0xff] %v6107_v57  ;;  %v6115_v11 = vadd.f32 %v2592_v51, %v2576_v4 }
 0x3cf   : > { %6453 = vst [vmem:[#allocation53_spill] sm:$0xff] %v6115_v11  ;;  %v2280_v24 = vpop.f32.mrf.mxu0  ;;  %v2377_v45 = vpop.f32.mrf.mxu1 }
 0x3d0   : > { %v6117_v27 = vpop.f32.mrf.mxu2  ;;  %v6119_v26 = vpop.f32.mrf.mxu3  ;;  %v2408_v39 = vsub.f32 %v2280_v24, %v2377_v45 }
 0x3d2   : > { %v6121_v61 = vmul.f32 %v5504_v23, %v2408_v39  ;;  %v2594_v50 = vmul.f32 %v5505_v49, %v2408_v39 }
 0x3d4   : > { %6454 = vst [vmem:[#allocation54_spill] sm:$0xff] %v6121_v61 }
 0x3d7   : > { %v6125_v51 = vpop.f32.mrf.mxu0  ;;  %v6127_v48 = vpop.f32.mrf.mxu1 }
 0x3d8   : > { %v2442_v14 = vpop.f32.mrf.mxu2  ;;  %v2491_v52 = vpop.f32.mrf.mxu3 }
 0x3d9   : > { %v2492_v56 = vadd.f32 %v2491_v52, %v2442_v14 }
 0x3db   : > { %v6123_v58 = vmul.f32 %v5505_v49, %v2492_v56  ;;  %v2578_v47 = vmul.f32 %v5504_v23, %v2492_v56  ;;  %v5506_v49 = vld [vmem:[#allocation11 + $0x40] sm:$0xff] }
 0x3dc   : > { %v5507_v56 = vld [vmem:[#allocation11 + $0xc0] sm:$0xff] }
 0x3dd   : > { %6455 = vst [vmem:[#allocation55_spill] sm:$0xff] %v6123_v58  ;;  %v6131_v18 = vadd.f32 %v2594_v50, %v2578_v47  ;;  %v5508_v58 = vld [vmem:[#allocation11 + $0x70] sm:$0xff] }
 0x3df   : > { %6456 = vst [vmem:[#allocation56_spill] sm:$0xff] %v6131_v18  ;;  %v2285_v31 = vpop.f32.mrf.mxu0  ;;  %v2382_v35 = vpop.f32.mrf.mxu1 }
 0x3e0   : > { %v6133_v24 = vpop.f32.mrf.mxu2  ;;  %v6135_v45 = vpop.f32.mrf.mxu3  ;;  %v2410_v39 = vsub.f32 %v2285_v31, %v2382_v35 }
 0x3e2   : > { %v6137_v23 = vmul.f32 %v5506_v49, %v2410_v39  ;;  %v2596_v53 = vmul.f32 %v5507_v56, %v2410_v39 }
 0x3e7   : > { %v2287_v50 = vpop.f32.mrf.mxu0  ;;  %v2384_v47 = vpop.f32.mrf.mxu1 }
 0x3e8   : > { %v2447_v14 = vpop.f32.mrf.mxu2  ;;  %v2496_v52 = vpop.f32.mrf.mxu3  ;;  %v6149_v30 = vsub.f32 %v2287_v50, %v2384_v47  ;;  %v5511_v47 = vld [vmem:[#allocation11 + $0xe0] sm:$0xff] }
 0x3e9   : > { %v2497_v62 = vadd.f32 %v2496_v52, %v2447_v14 }
 0x3eb   : > { %v6139_v37 = vmul.f32 %v5507_v56, %v2497_v62  ;;  %v2580_v4 = vmul.f32 %v5506_v49, %v2497_v62 }
 0x3ed   : > { %v6143_v2 = vadd.f32 %v2596_v53, %v2580_v4 }
 0x3ef   : > { %v2290_v35 = vpop.f32.mrf.mxu0  ;;  %v2387_v17 = vpop.f32.mrf.mxu1 }
 0x3f0   : > { %v6145_v21 = vpop.f32.mrf.mxu2  ;;  %v6147_v31 = vpop.f32.mrf.mxu3  ;;  %v2412_v57 = vsub.f32 %v2290_v35, %v2387_v17  ;;  %v5512_v17 = vld [vmem:[#allocation11 + $0xe8] sm:$0xff] }
 0x3f7   : > { %v2292_v39 = vpop.f32.mrf.mxu0  ;;  %v2389_v14 = vpop.f32.mrf.mxu1 }
 0x3f8   : > { %v2452_v60 = vpop.f32.mrf.mxu2  ;;  %v2501_v20 = vpop.f32.mrf.mxu3  ;;  %v2413_v25 = vsub.f32 %v2292_v39, %v2389_v14 }
 0x3f9   : > { %v2502_v7 = vadd.f32 %v2501_v20, %v2452_v60  ;;  %v5513_v60 = vld [vmem:[#allocation11 + $0x68] sm:$0xff] }
 0x3ff   : > { %v2295_v62 = vpop.f32.mrf.mxu0  ;;  %v2392_v49 = vpop.f32.mrf.mxu1 }
 0x400   : > { %v2454_v52 = vpop.f32.mrf.mxu2  ;;  %v2503_v56 = vpop.f32.mrf.mxu3  ;;  %v2414_v33 = vsub.f32 %v2295_v62, %v2392_v49 }
 0x401   : > { %v2504_v9 = vadd.f32 %v2503_v56, %v2454_v52  ;;  %v5516_v52 = vld [vmem:[#allocation11 + $0x50] sm:$0xff] }
 0x402   : > { %v2600_v62 = vmul.f32 %v5511_v47, %v2414_v33  ;;  %v2526_v56 = vmul.f32 %v5516_v52, %v2412_v57 }
 0x407   : > { %v2297_v15 = vpop.f32.mrf.mxu0  ;;  %v2394_v32 = vpop.f32.mrf.mxu1 }
 0x408   : > { %v2457_v12 = vpop.f32.mrf.mxu2  ;;  %v2506_v6 = vpop.f32.mrf.mxu3  ;;  %v2415_v18 = vsub.f32 %v2297_v15, %v2394_v32  ;;  %v5515_v15 = vld [vmem:[#allocation11 + $0xf8] sm:$0xff] }
 0x409   : > { %v2507_v44 = vadd.f32 %v2506_v6, %v2457_v12 }
 0x40b   : > { %v2544_v39 = vmul.f32 %v5511_v47, %v2507_v44 }
 0x40f   : > { %v2300_v16 = vpop.f32.mrf.mxu0  ;;  %v2397_v22 = vpop.f32.mrf.mxu1 }
 0x410   : > { %v2459_v53 = vpop.f32.mrf.mxu2  ;;  %v2508_v4 = vpop.f32.mrf.mxu3  ;;  %v2416_v19 = vsub.f32 %v2300_v16, %v2397_v22 }
 0x411   : > { %v2509_v11 = vadd.f32 %v2508_v4, %v2459_v53  ;;  %v5518_v53 = vld [vmem:[#allocation11 + $0x58] sm:$0xff] }
 0x412   : > { %v2530_v61 = vmul.f32 %v5508_v58, %v2416_v19  ;;  %v2602_v16 = vmul.f32 %v5509_v40, %v2416_v19  ;;  %v2529_v19 = vmul.f32 %v5513_v60, %v2415_v18  ;;  %v2583_v4 = vmul.f32 %v5518_v53, %v2504_v9 }
 0x413   : > { %v2545_v20 = vmul.f32 %v5512_v17, %v2509_v11 }
 0x417   : > { %v2302_v54 = vpop.f32.mrf.mxu0  ;;  %v2399_v10 = vpop.f32.mrf.mxu1 }
 0x418   : > { %v2462_v13 = vpop.f32.mrf.mxu2  ;;  %v2511_v36 = vpop.f32.mrf.mxu3  ;;  %v2417_v0 = vsub.f32 %v2302_v54, %v2399_v10  ;;  %v2585_v10 = vmul.f32 %v5513_v60, %v2509_v11  ;;  %v5514_v54 = vld [vmem:[#allocation11 + $0x78] sm:$0xff] }
 0x419   : > { %v2512_v41 = vadd.f32 %v2511_v36, %v2462_v13  ;;  %v5510_v36 = vld [vmem:[#allocation11 + $0x60] sm:$0xff]  ;;  %v5517_v11 = vld [vmem:[#allocation11 + $0xd8] sm:$0xff] }
 0x41a   : > { %v2528_v50 = vmul.f32 %v5510_v36, %v2414_v33  ;;  %v2531_v6 = vmul.f32 %v5514_v54, %v2417_v0  ;;  %v2603_v12 = vmul.f32 %v5515_v15, %v2417_v0  ;;  %v2584_v14 = vmul.f32 %v5510_v36, %v2507_v44  ;;  %v5519_v44 = vld [vmem:[#allocation11 + $0xd0] sm:$0xff] }
 0x41b   : > { %v2546_v22 = vmul.f32 %v5509_v40, %v2512_v41  ;;  %v2586_v34 = vmul.f32 %v5508_v58, %v2512_v41  ;;  %v2601_v40 = vmul.f32 %v5512_v17, %v2415_v18  ;;  %v2499_v33 = vadd.f32 %v6147_v31, %v6145_v21 }
 0x41c   : > { %v2543_v49 = vmul.f32 %v5517_v11, %v2504_v9  ;;  %v2561_v0 = vsub.f32 %v2529_v19, %v2545_v20  ;;  %v2598_v36 = vmul.f32 %v5519_v44, %v2412_v57  ;;  %v2542_v18 = vmul.f32 %v5519_v44, %v2502_v7  ;;  %v5520_v9 = vld [vmem:[#allocation11 + $0x48] sm:$0xff]  ;;  %v5523_v19 = vld [vmem:[#allocation11 + $0xb8] sm:$0xff] }
 0x41d   : > { %v2562_v41 = vsub.f32 %v2530_v61, %v2546_v22  ;;  %v2582_v61 = vmul.f32 %v5516_v52, %v2502_v7  ;;  %v2560_v22 = vsub.f32 %v2528_v50, %v2544_v39  ;;  %v2616_v17 = vadd.f32 %v2600_v62, %v2584_v14  ;;  %v5521_v50 = vld [vmem:[#allocation11 + $0xc8] sm:$0xff]  ;;  %v5522_v39 = vld [vmem:[#allocation11 + $0x38] sm:$0xff] }
 0x41e   : > { %v2494_v21 = vadd.f32 %v6135_v45, %v6133_v24  ;;  %v2541_v31 = vmul.f32 %v2499_v33, %v5924_v29  ;;  %v2581_v20 = vmul.f32 %v5520_v9, %v2499_v33  ;;  %v2525_v7 = vmul.f32 %v5520_v9, %v6149_v30 }
 0x41f   : > { %v2570_v57 = vpack.c.bf16 %v2561_v0, %v2560_v22  ;;  %v2597_v62 = vmul.f32 %v5521_v50, %v6149_v30  ;;  %v2614_v24 = vadd.f32 %v2598_v36, %v2582_v61  ;;  %v2489_v29 = vadd.f32 %v6119_v26, %v6117_v27  ;;  %v6465_v0 = vld [vmem:[#allocation56_spill] sm:$0xff] }
 0x420   : > { %v2464_v43 = vpop.f32.mrf.mxu2  ;;  %v2513_v59 = vpop.f32.mrf.mxu3  ;;  %v2539_v45 = vmul.f32 %v2494_v21, %v5934_v38  ;;  %v2407_v30 = vsub.f32 %v6109_v55, %v6111_v28  ;;  %v2484_v38 = vadd.f32 %v6103_v1, %v6101_v46  ;;  %v6457_v55 = vsub.f32 %v6137_v23, %v6139_v37  ;;  %v5525_v46 = vld [vmem:[#allocation11 + $0xa8] sm:$0xff]  ;;  %v5526_v36 = vld [vmem:[#allocation11 + $0x18] sm:$0xff] }
 0x421   : > { %v2514_v13 = vadd.f32 %v2513_v59, %v2464_v43  ;;  %v2618_v43 = vadd.f32 %v2602_v16, %v2586_v34  ;;  %v2527_v34 = vmul.f32 %v5518_v53, %v2413_v25  ;;  %v2599_v16 = vmul.f32 %v5517_v11, %v2413_v25  ;;  %v6462_v23 = vld [vmem:[#allocation54_spill] sm:$0xff]  ;;  %v5527_v61 = vld [vmem:[#allocation11 + $0x98] sm:$0xff] }
 0x422   : > { %v2409_v25 = vsub.f32 %v6125_v51, %v6127_v48  ;;  %v2613_v51 = vadd.f32 %v2597_v62, %v2581_v20  ;;  %v2577_v27 = vmul.f32 %v2489_v29, %v5942_v63  ;;  %v2593_v1 = vmul.f32 %v5525_v46, %v2407_v30  ;;  %v6458_v63 = vld [vmem:[#allocation26_spill] sm:$0xff]  ;;  %v6470_v20 = vld [vmem:[#allocation51_spill] sm:$0xff] }
 0x423   : > { %v2547_v32 = vmul.f32 %v5515_v15, %v2514_v13  ;;  %v2587_v35 = vmul.f32 %v5514_v54, %v2514_v13  ;;  %v2617_v15 = vadd.f32 %v2601_v40, %v2585_v10  ;;  %v2559_v60 = vsub.f32 %v2527_v34, %v2543_v49  ;;  %v6461_v49 = vld [vmem:[#allocation39_spill] sm:$0xff] }
 0x424   : > { %v2615_v10 = vadd.f32 %v2599_v16, %v2583_v4  ;;  %v2523_v14 = vmul.f32 %v5522_v39, %v2409_v25  ;;  %v2595_v40 = vmul.f32 %v5523_v19, %v2409_v25  ;;  %v2575_v53 = vmul.f32 %v2484_v38, %v6461_v49  ;;  %v6463_v4 = vld [vmem:[#allocation55_spill] sm:$0xff]  ;;  %v6468_v16 = vld [vmem:[#allocation41_spill] sm:$0xff] }
 0x425   : > { %v2563_v59 = vsub.f32 %v2531_v6, %v2547_v32  ;;  %v2619_v58 = vadd.f32 %v2603_v12, %v2587_v35  ;;  %v2626_v54 = vpack.c.bf16 %v2617_v15, %v2616_v17  ;;  %v2558_v6 = vsub.f32 %v2526_v56, %v2542_v18  ;;  %v6460_v56 = vld [vmem:[#allocation40_spill] sm:$0xff]  ;;  %v6469_v17 = vld [vmem:[#allocation38_spill] sm:$0xff]  ;;  %v4815_v46 = vld [vmem:[#allocation9 + $0x1b0] sm:$0xff] }
 0x426   : > { %v2579_v12 = vmul.f32 %v2494_v21, %v5932_v5  ;;  %v2557_v32 = vsub.f32 %v2525_v7, %v2541_v31  ;;  %v2625_v35 = vpack.c.bf16 %v2615_v10, %v2614_v24  ;;  %v2537_v5 = vmul.f32 %v2489_v29, %v5944_v42  ;;  %v6459_v42 = vld [vmem:[#allocation47_spill] sm:$0xff]  ;;  %v6474_v24 = vld [vmem:[#allocation48_spill] sm:$0xff]  ;;  %v6475_v29 = vld [vmem:[#allocation49_spill] sm:$0xff] }
 0x427   : > { %v2571_v13 = vpack.c.bf16 %v2563_v59, %v2562_v41  ;;  %v2627_v47 = vpack.c.bf16 %v2619_v58, %v2618_v43  ;;  %v2569_v48 = vpack.c.bf16 %v2559_v60, %v2558_v6  ;;  %v2555_v26 = vsub.f32 %v2523_v14, %v2539_v45  ;;  %v5524_v58 = vld [vmem:[#allocation11 + $0x28] sm:$0xff]  ;;  %v6471_v60 = vld [vmem:[#allocation52_spill] sm:$0xff]  ;;  %v6481_v14 = vld [vmem:[#allocation25_spill] sm:$0xff] }
 0x428   : > { %v2611_v41 = vadd.f32 %v2595_v40, %v2579_v12  ;;  %v2568_v28 = vpack.c.bf16 %v2557_v32, %v6457_v55  ;;  %v2624_v43 = vpack.c.bf16 %v2613_v51, %v6143_v2  ;;  %v2405_v59 = vsub.f32 %v6093_v3, %v6095_v8  ;;  %v6477_v32 = vld [vmem:[#allocation50_spill] sm:$0xff]  ;;  %v6482_v40 = vld [vmem:[#allocation27_spill] sm:$0xff] }
 0x429   : > { %2628 = vmatpush.bf16.msra.mxu0 %v2571_v13  ;;  %2677 = vmatpush.bf16.msra.mxu1 %v2627_v47  ;;  %v2521_v33 = vmul.f32 %v5524_v58, %v2407_v30  ;;  %v2479_v52 = vadd.f32 %v6459_v42, %v6458_v63  ;;  %v2535_v11 = vmul.f32 %v2484_v38, %v6460_v56  ;;  %v6483_v38 = vld [vmem:[#allocation29_spill] sm:$0xff]  ;;  %v6488_v55 = vld [vmem:[#allocation34_spill] sm:$0xff]  ;;  %v4816_v58 = vld [vmem:[#allocation9 + $0x1b8] sm:$0xff] }
 0x42a   : > { %2775 = vmatpush.bf16.msra.mxu2 %v2571_v13  ;;  %2824 = vmatpush.bf16.msra.mxu3 %v2627_v47  ;;  %v2609_v2 = vadd.f32 %v2593_v1, %v2577_v27  ;;  %v6464_v3 = vsub.f32 %v6462_v23, %v6463_v4  ;;  %v2623_v15 = vpack.c.bf16 %v2611_v41, %v6465_v0  ;;  %v6466_v13 = vld [vmem:[#allocation24_spill] sm:$0xff]  ;;  %v6467_v47 = vld [vmem:[#allocation23_spill] sm:$0xff]  ;;  %v6487_v41 = vld [vmem:[#allocation37_spill] sm:$0xff] }
 0x42b   : > { %v2553_v37 = vsub.f32 %v2521_v33, %v2537_v5  ;;  %v2403_v44 = vsub.f32 %v6467_v47, %v6466_v13  ;;  %v2519_v18 = vmul.f32 %v5526_v36, %v2405_v59  ;;  %v2591_v34 = vmul.f32 %v5527_v61, %v2405_v59  ;;  %v6484_v5 = vld [vmem:[#allocation36_spill] sm:$0xff]  ;;  %v6485_v27 = vld [vmem:[#allocation35_spill] sm:$0xff]  ;;  %v4814_v63 = vld [vmem:[#allocation9 + $0x1a8] sm:$0xff] }
 0x42c   : > { %v2567_v8 = vpack.c.bf16 %v2555_v26, %v6464_v3  ;;  %v2533_v22 = vmul.f32 %v2479_v52, %v6468_v16  ;;  %v2573_v21 = vmul.f32 %v2479_v52, %v6469_v17  ;;  %v6472_v10 = vsub.f32 %v6470_v20, %v6471_v60  ;;  %v6486_v26 = vld [vmem:[#allocation32_spill] sm:$0xff]  ;;  %v4823_v1 = vld [vmem:[#allocation9 + $0x1f0] sm:$0xff]  ;;  %v4822_v42 = vld [vmem:[#allocation9 + $0x1e8] sm:$0xff] }
 0x42d   : > { %2629 = vmatpush.bf16.msra.mxu0 %v2570_v57  ;;  %2678 = vmatpush.bf16.msra.mxu1 %v2626_v54  ;;  %v2551_v31 = vsub.f32 %v2519_v18, %v2535_v11  ;;  %v2607_v9 = vadd.f32 %v2591_v34, %v2575_v53  ;;  %v2517_v7 = vmul.f32 %v2403_v44, %v6469_v17  ;;  %v6491_v59 = vld [vmem:[#allocation28_spill] sm:$0xff]  ;;  %v4813_v52 = vld [vmem:[#allocation9 + $0x1a0] sm:$0xff]  ;;  %v6492_v11 = vld [vmem:[#allocation42_spill] sm:$0xff] }
 0x42e   : > { %2776 = vmatpush.bf16.msra.mxu2 %v2570_v57  ;;  %2825 = vmatpush.bf16.msra.mxu3 %v2626_v54  ;;  %v2566_v57 = vpack.c.bf16 %v2553_v37, %v6472_v10  ;;  %v6473_v54 = vld [vmem:[#allocation53_spill] sm:$0xff]  ;;  %v2589_v50 = vmul.f32 %v2403_v44, %v6468_v16  ;;  %v6476_v45 = vsub.f32 %v6474_v24, %v6475_v29  ;;  %v4824_v33 = vld [vmem:[#allocation9 + $0x1f8] sm:$0xff]  ;;  %v6493_v49 = vld [vmem:[#allocation31_spill] sm:$0xff] }
 0x42f   : > { %v2622_v25 = vpack.c.bf16 %v2609_v2, %v6473_v54  ;;  %v2549_v62 = vsub.f32 %v2517_v7, %v2533_v22  ;;  %v2621_v51 = vpack.c.bf16 %v2607_v9, %v6477_v32  ;;  %v4821_v56 = vld [vmem:[#allocation9 + $0x1e0] sm:$0xff]  ;;  %v4812_v53 = vld [vmem:[#allocation9 + $0x198] sm:$0xff]  ;;  %v4811_v2 = vld [vmem:[#allocation9 + $0x190] sm:$0xff] }
 0x430   : > { %v2605_v6 = vadd.f32 %v2589_v50, %v2573_v21  ;;  %v2565_v12 = vpack.c.bf16 %v2551_v31, %v6476_v45  ;;  %v4820_v37 = vld [vmem:[#allocation9 + $0x1d8] sm:$0xff]  ;;  %v4819_v23 = vld [vmem:[#allocation9 + $0x1d0] sm:$0xff]  ;;  %v4810_v4 = vld [vmem:[#allocation9 + $0x188] sm:$0xff] }
 0x431   : > { %2630 = vmatpush.bf16.msra.mxu0 %v2569_v48  ;;  %2679 = vmatpush.bf16.msra.mxu1 %v2625_v35  ;;  %v4818_v3 = vld [vmem:[#allocation9 + $0x1c8] sm:$0xff]  ;;  %v4817_v0 = vld [vmem:[#allocation9 + $0x1c0] sm:$0xff]  ;;  %v6495_v13 = vld [vmem:[#allocation43_spill] sm:$0xff] }
 0x432   : > { %2777 = vmatpush.bf16.msra.mxu2 %v2569_v48  ;;  %2826 = vmatpush.bf16.msra.mxu3 %v2625_v35  ;;  %v6478_v48 = vld [vmem:[#allocation21_spill] sm:$0xff]  ;;  %v6479_v35 = vld [vmem:[#allocation22_spill] sm:$0xff]  ;;  %v2620_v19 = vpack.c.bf16 %v2605_v6, %v6481_v14  ;;  %v4793_v34 = vld [vmem:[#allocation5 + $0x18] sm:$0xff] }
 0x433   : > { %v6480_v30 = vsub.f32 %v6478_v48, %v6479_v35  ;;  %v6496_v47 = vld [vmem:[#allocation46_spill] sm:$0xff]  ;;  %v6497_v44 = vld [vmem:[#allocation45_spill] sm:$0xff] }
 0x434   : > { %v4777_v61 = vld [vmem:[#allocation4 + $0x8] sm:$0xff]  ;;  %v4778_v50 = vld [vmem:[#allocation4] sm:$0xff] }
 0x435   : > { %2631 = vmatpush.bf16.msra.mxu0 %v2568_v28  ;;  %2680 = vmatpush.bf16.msra.mxu1 %v2624_v43  ;;  %v2564_v39 = vpack.c.bf16 %v2549_v62, %v6480_v30  ;;  %v4794_v62 = vld [vmem:[#allocation5 + $0x38] sm:$0xff] }
 0x436   : > { %2778 = vmatpush.bf16.msra.mxu2 %v2568_v28  ;;  %2827 = vmatpush.bf16.msra.mxu3 %v2624_v43  ;;  %v6489_v28 = vld [vmem:[#allocation33_spill] sm:$0xff]  ;;  %v6490_v43 = vld [vmem:[#allocation30_spill] sm:$0xff] }
 0x439   : > { %2632 = vmatpush.bf16.msra.mxu0 %v2567_v8  ;;  %2681 = vmatpush.bf16.msra.mxu1 %v2623_v15 }
 0x43a   : > { %2779 = vmatpush.bf16.msra.mxu2 %v2567_v8  ;;  %2828 = vmatpush.bf16.msra.mxu3 %v2623_v15  ;;  %v4809_v8 = vld [vmem:[#allocation9 + $0x180] sm:$0xff]  ;;  %v6494_v15 = vld [vmem:[#allocation44_spill] sm:$0xff] }
 0x43d   : > { %2633 = vmatpush.bf16.msra.mxu0 %v2566_v57  ;;  %2682 = vmatpush.bf16.msra.mxu1 %v2622_v25 }
 0x43e   : > { %2780 = vmatpush.bf16.msra.mxu2 %v2566_v57  ;;  %2829 = vmatpush.bf16.msra.mxu3 %v2622_v25 }
 0x441   : > { %2634 = vmatpush.bf16.msra.mxu0 %v2565_v12  ;;  %2683 = vmatpush.bf16.msra.mxu1 %v2621_v51 }
 0x442   : > { %2781 = vmatpush.bf16.msra.mxu2 %v2565_v12  ;;  %2830 = vmatpush.bf16.msra.mxu3 %v2621_v51 }
 0x445   : > { %2635 = vmatpush.bf16.msra.mxu0 %v2564_v39  ;;  %2684 = vmatpush.bf16.msra.mxu1 %v2620_v19 }
 0x446   : > { %2782 = vmatpush.bf16.msra.mxu2 %v2564_v39  ;;  %2831 = vmatpush.bf16.msra.mxu3 %v2620_v19 }
 0x448   : > { %2636 = vmatmul.bf16.vlgmr.msra.gmra.mxu0 %v6482_v40  ;;  %2685 = vmatmul.bf16.vlgmr.msra.gmra.mxu1 %v6483_v38 }
 0x449   : > { %2783 = vmatmul.bf16.vlgmr.msra.gmra.mxu2 %v6483_v38  ;;  %2832 = vmatmul.bf16.vlgmr.msra.gmra.mxu3 %v6482_v40  ;;  %v4779_v38 = vld [vmem:[#allocation4 + $0x48] sm:$0xff] }
 0x44a   : > { %3148 = vmatpush.bf16.msrb.mxu0 %v4816_v58  ;;  %3381 = vmatpush.bf16.msrb.mxu1 %v4824_v33 }
 0x44b   : > { %3566 = vmatpush.bf16.msrb.mxu2 %v4816_v58  ;;  %3655 = vmatpush.bf16.msrb.mxu3 %v4824_v33 }
 0x44e   : > { %3149 = vmatpush.bf16.msrb.mxu0 %v4815_v46  ;;  %3382 = vmatpush.bf16.msrb.mxu1 %v4823_v1 }
 0x44f   : > { %3567 = vmatpush.bf16.msrb.mxu2 %v4815_v46  ;;  %3656 = vmatpush.bf16.msrb.mxu3 %v4823_v1 }
 0x452   : > { %3150 = vmatpush.bf16.msrb.mxu0 %v4814_v63  ;;  %3383 = vmatpush.bf16.msrb.mxu1 %v4822_v42 }
 0x453   : > { %3568 = vmatpush.bf16.msrb.mxu2 %v4814_v63  ;;  %3657 = vmatpush.bf16.msrb.mxu3 %v4822_v42 }
 0x456   : > { %3151 = vmatpush.bf16.msrb.mxu0 %v4813_v52  ;;  %3384 = vmatpush.bf16.msrb.mxu1 %v4821_v56 }
 0x457   : > { %3569 = vmatpush.bf16.msrb.mxu2 %v4813_v52  ;;  %3658 = vmatpush.bf16.msrb.mxu3 %v4821_v56  ;;  %v4780_v56 = vld [vmem:[#allocation4 + $0x60] sm:$0xff] }
 0x458   : > { %2641 = vmatmul.bf16.gmra.mxu0 %v6484_v5  ;;  %2690 = vmatmul.bf16.gmra.mxu1 %v6485_v27 }
 0x459   : > { %2788 = vmatmul.bf16.gmra.mxu2 %v6485_v27  ;;  %2837 = vmatmul.bf16.gmra.mxu3 %v6484_v5  ;;  %v4795_v5 = vld [vmem:[#allocation5 + $0x48] sm:$0xff] }
 0x45a   : > { %3152 = vmatpush.bf16.msrb.mxu0 %v4812_v53  ;;  %3385 = vmatpush.bf16.msrb.mxu1 %v4820_v37 }
 0x45b   : > { %3570 = vmatpush.bf16.msrb.mxu2 %v4812_v53  ;;  %3659 = vmatpush.bf16.msrb.mxu3 %v4820_v37 }
 0x45e   : > { %3153 = vmatpush.bf16.msrb.mxu0 %v4811_v2  ;;  %3386 = vmatpush.bf16.msrb.mxu1 %v4819_v23 }
 0x45f   : > { %3571 = vmatpush.bf16.msrb.mxu2 %v4811_v2  ;;  %3660 = vmatpush.bf16.msrb.mxu3 %v4819_v23 }
 0x462   : > { %3154 = vmatpush.bf16.msrb.mxu0 %v4810_v4  ;;  %3387 = vmatpush.bf16.msrb.mxu1 %v4818_v3 }
 0x463   : > { %3572 = vmatpush.bf16.msrb.mxu2 %v4810_v4  ;;  %3661 = vmatpush.bf16.msrb.mxu3 %v4818_v3 }
 0x466   : > { %3155 = vmatpush.bf16.msrb.mxu0 %v4809_v8  ;;  %3388 = vmatpush.bf16.msrb.mxu1 %v4817_v0 }
 0x467   : > { %3573 = vmatpush.bf16.msrb.mxu2 %v4809_v8  ;;  %3662 = vmatpush.bf16.msrb.mxu3 %v4817_v0 }
 0x468   : > { %2646 = vmatmul.bf16.gmra.mxu0 %v6486_v26  ;;  %2695 = vmatmul.bf16.gmra.mxu1 %v6487_v41 }
 0x469   : > { %2793 = vmatmul.bf16.gmra.mxu2 %v6487_v41  ;;  %2842 = vmatmul.bf16.gmra.mxu3 %v6486_v26 }
 0x478   : > { %2651 = vmatmul.bf16.gmra.mxu0 %v6488_v55  ;;  %2700 = vmatmul.bf16.gmra.mxu1 %v6489_v28 }
 0x479   : > { %2798 = vmatmul.bf16.gmra.mxu2 %v6489_v28  ;;  %2847 = vmatmul.bf16.gmra.mxu3 %v6488_v55 }
 0x488   : > { %2656 = vmatmul.bf16.gmra.mxu0 %v6490_v43  ;;  %2705 = vmatmul.bf16.gmra.mxu1 %v6491_v59 }
 0x489   : > { %2803 = vmatmul.bf16.gmra.mxu2 %v6491_v59  ;;  %2852 = vmatmul.bf16.gmra.mxu3 %v6490_v43 }
 0x498   : > { %2661 = vmatmul.bf16.gmra.mxu0 %v6492_v11  ;;  %2710 = vmatmul.bf16.gmra.mxu1 %v6493_v49 }
 0x499   : > { %2808 = vmatmul.bf16.gmra.mxu2 %v6493_v49  ;;  %2857 = vmatmul.bf16.gmra.mxu3 %v6492_v11  ;;  %v4796_v11 = vld [vmem:[#allocation5 + $0x40] sm:$0xff] }
 0x4a8   : > { %2666 = vmatmul.bf16.gmra.mxu0 %v6494_v15  ;;  %2715 = vmatmul.bf16.gmra.mxu1 %v6495_v13 }
 0x4a9   : > { %2813 = vmatmul.bf16.gmra.mxu2 %v6495_v13  ;;  %2862 = vmatmul.bf16.gmra.mxu3 %v6494_v15 }
 0x4b8   : > { %2671 = vmatmul.bf16.gmra.mxu0 %v6496_v47  ;;  %2720 = vmatmul.bf16.gmra.mxu1 %v6497_v44 }
 0x4b9   : > { %2818 = vmatmul.bf16.gmra.mxu2 %v6497_v44  ;;  %2867 = vmatmul.bf16.gmra.mxu3 %v6496_v47 }
 0x4c5   : > { %v2637_v36 = vpop.f32.mrf.mxu0  ;;  %v2686_v18 = vpop.f32.mrf.mxu1 }
 0x4c6   : > { %v2726_v31 = vsub.f32 %v2637_v36, %v2686_v18  ;;  %v4781_v18 = vld [vmem:[#allocation4 + $0x68] sm:$0xff] }
 0x4c8   : > { %3156 = vmatmul.bf16.vlgmr.msrb.gmra.mxu0 %v4777_v61  ;;  %3389 = vmatmul.bf16.vlgmr.msrb.gmra.mxu1 %v4793_v34 }
 0x4c9   : > { %3574 = vmatmul.bf16.vlgmr.msrb.gmra.mxu2 %v4793_v34  ;;  %3663 = vmatmul.bf16.vlgmr.msrb.gmra.mxu3 %v4777_v61  ;;  %v4797_v61 = vld [vmem:[#allocation5 + $0x28] sm:$0xff] }
 0x4cc   : > { %v2784_v16 = vpop.f32.mrf.mxu2  ;;  %v2833_v22 = vpop.f32.mrf.mxu3 }
 0x4cd   : > { %v2639_v17 = vpop.f32.mrf.mxu0  ;;  %v2688_v21 = vpop.f32.mrf.mxu1  ;;  %v2834_v57 = vadd.f32 %v2833_v22, %v2784_v16 }
 0x4ce   : > { %v2727_v9 = vsub.f32 %v2639_v17, %v2688_v21 }
 0x4d0   : > { %v5069_v20 = vpack.c.bf16 %v2727_v9, %v2726_v31 }
 0x4d2   : > { %5070 = vst [vmem:[#allocation4 + $0x40] sm:$0xff] %v5069_v20  }
 0x4d4   : > { %v2786_v60 = vpop.f32.mrf.mxu2  ;;  %v2835_v10 = vpop.f32.mrf.mxu3 }
 0x4d5   : > { %v2836_v54 = vadd.f32 %v2835_v10, %v2786_v60  ;;  %v2642_v25 = vpop.f32.mrf.mxu0  ;;  %v2691_v7 = vpop.f32.mrf.mxu1 }
 0x4d6   : > { %v2728_v32 = vsub.f32 %v2642_v25, %v2691_v7 }
 0x4d7   : > { %v5109_v6 = vpack.c.bf16 %v2836_v54, %v2834_v57 }
 0x4d8   : > { %3161 = vmatmul.bf16.gmra.mxu0 %v4778_v50  ;;  %3394 = vmatmul.bf16.gmra.mxu1 %v4794_v62 }
 0x4d9   : > { %5110 = vst [vmem:[#allocation5 + $0x68] sm:$0xff] %v5109_v6   ;;  %3579 = vmatmul.bf16.gmra.mxu2 %v4794_v62  ;;  %3668 = vmatmul.bf16.gmra.mxu3 %v4778_v50  ;;  %v4782_v50 = vld [vmem:[#allocation4 + $0x18] sm:$0xff]  ;;  %v4798_v62 = vld [vmem:[#allocation5] sm:$0xff] }
 0x4dc   : > { %v2789_v24 = vpop.f32.mrf.mxu2  ;;  %v2838_v29 = vpop.f32.mrf.mxu3 }
 0x4dd   : > { %v2644_v45 = vpop.f32.mrf.mxu0  ;;  %v2693_v12 = vpop.f32.mrf.mxu1  ;;  %v2839_v39 = vadd.f32 %v2838_v29, %v2789_v24 }
 0x4de   : > { %v2729_v51 = vsub.f32 %v2644_v45, %v2693_v12 }
 0x4e0   : > { %v5074_v48 = vpack.c.bf16 %v2729_v51, %v2728_v32 }
 0x4e2   : > { %5350 = vst [vmem:[#allocation4 + $0x28] sm:$0xff] %v5074_v48  }
 0x4e4   : > { %v2791_v35 = vpop.f32.mrf.mxu2  ;;  %v2840_v30 = vpop.f32.mrf.mxu3 }
 0x4e5   : > { %v2841_v14 = vadd.f32 %v2840_v30, %v2791_v35  ;;  %v2647_v19 = vpop.f32.mrf.mxu0  ;;  %v2696_v40 = vpop.f32.mrf.mxu1 }
 0x4e6   : > { %v2730_v43 = vsub.f32 %v2647_v19, %v2696_v40 }
 0x4e7   : > { %v5114_v27 = vpack.c.bf16 %v2841_v14, %v2839_v39 }
 0x4e8   : > { %3166 = vmatmul.bf16.gmra.mxu0 %v4779_v38  ;;  %3399 = vmatmul.bf16.gmra.mxu1 %v4795_v5 }
 0x4e9   : > { %5357 = vst [vmem:[#allocation5 + $0x60] sm:$0xff] %v5114_v27   ;;  %3584 = vmatmul.bf16.gmra.mxu2 %v4795_v5  ;;  %3673 = vmatmul.bf16.gmra.mxu3 %v4779_v38  ;;  %v4783_v38 = vld [vmem:[#allocation4 + $0x10] sm:$0xff]  ;;  %v4799_v5 = vld [vmem:[#allocation5 + $0x8] sm:$0xff] }
 0x4ec   : > { %v2794_v26 = vpop.f32.mrf.mxu2  ;;  %v2843_v41 = vpop.f32.mrf.mxu3 }
 0x4ed   : > { %v2649_v55 = vpop.f32.mrf.mxu0  ;;  %v2698_v28 = vpop.f32.mrf.mxu1  ;;  %v2844_v1 = vadd.f32 %v2843_v41, %v2794_v26 }
 0x4ee   : > { %v2731_v59 = vsub.f32 %v2649_v55, %v2698_v28 }
 0x4f0   : > { %v5079_v58 = vpack.c.bf16 %v2731_v59, %v2730_v43 }
 0x4f2   : > { %5351 = vst [vmem:[#allocation4 + $0x70] sm:$0xff] %v5079_v58  }
 0x4f4   : > { %v2796_v33 = vpop.f32.mrf.mxu2  ;;  %v2845_v46 = vpop.f32.mrf.mxu3 }
 0x4f5   : > { %v2846_v63 = vadd.f32 %v2845_v46, %v2796_v33  ;;  %v2652_v42 = vpop.f32.mrf.mxu0  ;;  %v2701_v52 = vpop.f32.mrf.mxu1 }
 0x4f6   : > { %v2732_v4 = vsub.f32 %v2652_v42, %v2701_v52 }
 0x4f7   : > { %v5119_v49 = vpack.c.bf16 %v2846_v63, %v2844_v1 }
 0x4f8   : > { %3171 = vmatmul.bf16.gmra.mxu0 %v4780_v56  ;;  %3404 = vmatmul.bf16.gmra.mxu1 %v4796_v11 }
 0x4f9   : > { %5358 = vst [vmem:[#allocation5 + $0x78] sm:$0xff] %v5119_v49   ;;  %3589 = vmatmul.bf16.gmra.mxu2 %v4796_v11  ;;  %3678 = vmatmul.bf16.gmra.mxu3 %v4780_v56  ;;  %v4784_v56 = vld [vmem:[#allocation4 + $0x38] sm:$0xff]  ;;  %v4800_v11 = vld [vmem:[#allocation5 + $0x70] sm:$0xff] }
 0x4fc   : > { %v2799_v53 = vpop.f32.mrf.mxu2  ;;  %v2848_v37 = vpop.f32.mrf.mxu3 }
 0x4fd   : > { %v2654_v2 = vpop.f32.mrf.mxu0  ;;  %v2703_v23 = vpop.f32.mrf.mxu1  ;;  %v2849_v13 = vadd.f32 %v2848_v37, %v2799_v53 }
 0x4fe   : > { %v2733_v3 = vsub.f32 %v2654_v2, %v2703_v23 }
 0x500   : > { %v5084_v8 = vpack.c.bf16 %v2733_v3, %v2732_v4 }
 0x502   : > { %5352 = vst [vmem:[#allocation4 + $0x20] sm:$0xff] %v5084_v8  }
 0x504   : > { %v2801_v0 = vpop.f32.mrf.mxu2  ;;  %v2850_v15 = vpop.f32.mrf.mxu3 }
 0x505   : > { %v2851_v47 = vadd.f32 %v2850_v15, %v2801_v0  ;;  %v2657_v44 = vpop.f32.mrf.mxu0  ;;  %v2706_v36 = vpop.f32.mrf.mxu1 }
 0x506   : > { %v2734_v31 = vsub.f32 %v2657_v44, %v2706_v36 }
 0x507   : > { %v5124_v34 = vpack.c.bf16 %v2851_v47, %v2849_v13 }
 0x508   : > { %3176 = vmatmul.bf16.gmra.mxu0 %v4781_v18  ;;  %3409 = vmatmul.bf16.gmra.mxu1 %v4797_v61 }
 0x509   : > { %5359 = vst [vmem:[#allocation5 + $0x30] sm:$0xff] %v5124_v34   ;;  %3594 = vmatmul.bf16.gmra.mxu2 %v4797_v61  ;;  %3683 = vmatmul.bf16.gmra.mxu3 %v4781_v18  ;;  %v4785_v18 = vld [vmem:[#allocation4 + $0x40] sm:$0xff]  ;;  %v4801_v61 = vld [vmem:[#allocation5 + $0x68] sm:$0xff] }
 0x50c   : > { %v2804_v16 = vpop.f32.mrf.mxu2  ;;  %v2853_v22 = vpop.f32.mrf.mxu3 }
 0x50d   : > { %v2659_v17 = vpop.f32.mrf.mxu0  ;;  %v2708_v21 = vpop.f32.mrf.mxu1  ;;  %v2854_v57 = vadd.f32 %v2853_v22, %v2804_v16 }
 0x50e   : > { %v2735_v9 = vsub.f32 %v2659_v17, %v2708_v21 }
 0x510   : > { %v5089_v20 = vpack.c.bf16 %v2735_v9, %v2734_v31 }
 0x512   : > { %5353 = vst [vmem:[#allocation4 + $0x58] sm:$0xff] %v5089_v20  }
 0x514   : > { %v2806_v60 = vpop.f32.mrf.mxu2  ;;  %v2855_v10 = vpop.f32.mrf.mxu3 }
 0x515   : > { %v2856_v54 = vadd.f32 %v2855_v10, %v2806_v60  ;;  %v2662_v25 = vpop.f32.mrf.mxu0  ;;  %v2711_v7 = vpop.f32.mrf.mxu1 }
 0x516   : > { %v2736_v32 = vsub.f32 %v2662_v25, %v2711_v7 }
 0x517   : > { %v5129_v6 = vpack.c.bf16 %v2856_v54, %v2854_v57 }
 0x518   : > { %3181 = vmatmul.bf16.gmra.mxu0 %v4782_v50  ;;  %3414 = vmatmul.bf16.gmra.mxu1 %v4798_v62 }
 0x519   : > { %5360 = vst [vmem:[#allocation5 + $0x50] sm:$0xff] %v5129_v6   ;;  %3599 = vmatmul.bf16.gmra.mxu2 %v4798_v62  ;;  %3688 = vmatmul.bf16.gmra.mxu3 %v4782_v50  ;;  %v4786_v50 = vld [vmem:[#allocation4 + $0x28] sm:$0xff]  ;;  %v4802_v62 = vld [vmem:[#allocation5 + $0x60] sm:$0xff] }
 0x51c   : > { %v2809_v24 = vpop.f32.mrf.mxu2  ;;  %v2858_v29 = vpop.f32.mrf.mxu3 }
 0x51d   : > { %v2664_v45 = vpop.f32.mrf.mxu0  ;;  %v2713_v12 = vpop.f32.mrf.mxu1  ;;  %v2859_v39 = vadd.f32 %v2858_v29, %v2809_v24 }
 0x51e   : > { %v2737_v51 = vsub.f32 %v2664_v45, %v2713_v12 }
 0x520   : > { %v5094_v48 = vpack.c.bf16 %v2737_v51, %v2736_v32 }
 0x522   : > { %5354 = vst [vmem:[#allocation4 + $0x30] sm:$0xff] %v5094_v48  }
 0x524   : > { %v2811_v35 = vpop.f32.mrf.mxu2  ;;  %v2860_v30 = vpop.f32.mrf.mxu3 }
 0x525   : > { %v2861_v14 = vadd.f32 %v2860_v30, %v2811_v35  ;;  %v2667_v19 = vpop.f32.mrf.mxu0  ;;  %v2716_v40 = vpop.f32.mrf.mxu1 }
 0x526   : > { %v2738_v43 = vsub.f32 %v2667_v19, %v2716_v40 }
 0x527   : > { %v5134_v27 = vpack.c.bf16 %v2861_v14, %v2859_v39 }
 0x528   : > { %3186 = vmatmul.bf16.gmra.mxu0 %v4783_v38  ;;  %3419 = vmatmul.bf16.gmra.mxu1 %v4799_v5 }
 0x529   : > { %5361 = vst [vmem:[#allocation5 + $0x20] sm:$0xff] %v5134_v27   ;;  %3604 = vmatmul.bf16.gmra.mxu2 %v4799_v5  ;;  %3693 = vmatmul.bf16.gmra.mxu3 %v4783_v38  ;;  %v4787_v38 = vld [vmem:[#allocation4 + $0x70] sm:$0xff]  ;;  %v4803_v5 = vld [vmem:[#allocation5 + $0x78] sm:$0xff] }
 0x52c   : > { %v2814_v26 = vpop.f32.mrf.mxu2  ;;  %v2863_v41 = vpop.f32.mrf.mxu3 }
 0x52d   : > { %v2669_v55 = vpop.f32.mrf.mxu0  ;;  %v2718_v28 = vpop.f32.mrf.mxu1  ;;  %v2864_v1 = vadd.f32 %v2863_v41, %v2814_v26 }
 0x52e   : > { %v2739_v59 = vsub.f32 %v2669_v55, %v2718_v28 }
 0x530   : > { %v5099_v58 = vpack.c.bf16 %v2739_v59, %v2738_v43 }
 0x532   : > { %5355 = vst [vmem:[#allocation4 + $0x50] sm:$0xff] %v5099_v58  }
 0x534   : > { %v2816_v33 = vpop.f32.mrf.mxu2  ;;  %v2865_v46 = vpop.f32.mrf.mxu3 }
 0x535   : > { %v2866_v63 = vadd.f32 %v2865_v46, %v2816_v33  ;;  %v2672_v42 = vpop.f32.mrf.mxu0  ;;  %v2721_v52 = vpop.f32.mrf.mxu1 }
 0x536   : > { %v2740_v4 = vsub.f32 %v2672_v42, %v2721_v52 }
 0x537   : > { %v5139_v49 = vpack.c.bf16 %v2866_v63, %v2864_v1 }
 0x538   : > { %3191 = vmatmul.bf16.gmra.mxu0 %v4784_v56  ;;  %3424 = vmatmul.bf16.gmra.mxu1 %v4800_v11 }
 0x539   : > { %5362 = vst [vmem:[#allocation5 + $0x58] sm:$0xff] %v5139_v49   ;;  %3609 = vmatmul.bf16.gmra.mxu2 %v4800_v11  ;;  %3698 = vmatmul.bf16.gmra.mxu3 %v4784_v56  ;;  %v4788_v56 = vld [vmem:[#allocation4 + $0x20] sm:$0xff]  ;;  %v4804_v11 = vld [vmem:[#allocation5 + $0x30] sm:$0xff] }
 0x53c   : > { %v2819_v53 = vpop.f32.mrf.mxu2  ;;  %v2868_v37 = vpop.f32.mrf.mxu3 }
 0x53d   : > { %v2674_v2 = vpop.f32.mrf.mxu0  ;;  %v2723_v23 = vpop.f32.mrf.mxu1  ;;  %v2869_v13 = vadd.f32 %v2868_v37, %v2819_v53 }
 0x53e   : > { %v2741_v3 = vsub.f32 %v2674_v2, %v2723_v23 }
 0x540   : > { %v5104_v8 = vpack.c.bf16 %v2741_v3, %v2740_v4 }
 0x542   : > { %5356 = vst [vmem:[#allocation4 + $0x78] sm:$0xff] %v5104_v8  }
 0x544   : > { %v2821_v0 = vpop.f32.mrf.mxu2  ;;  %v2870_v15 = vpop.f32.mrf.mxu3 }
 0x545   : > { %v2871_v47 = vadd.f32 %v2870_v15, %v2821_v0  ;;  %v3157_v44 = vpop.f32.mrf.mxu0  ;;  %v3390_v36 = vpop.f32.mrf.mxu1 }
 0x546   : > { %v3470_v31 = vsub.f32 %v3157_v44, %v3390_v36 }
 0x547   : > { %v5144_v34 = vpack.c.bf16 %v2871_v47, %v2869_v13 }
 0x548   : > { %3196 = vmatmul.bf16.gmra.mxu0 %v4785_v18  ;;  %3429 = vmatmul.bf16.gmra.mxu1 %v4801_v61 }
 0x549   : > { %5363 = vst [vmem:[#allocation5 + $0x10] sm:$0xff] %v5144_v34   ;;  %3614 = vmatmul.bf16.gmra.mxu2 %v4801_v61  ;;  %3703 = vmatmul.bf16.gmra.mxu3 %v4785_v18  ;;  %v4789_v18 = vld [vmem:[#allocation4 + $0x58] sm:$0xff]  ;;  %v4805_v61 = vld [vmem:[#allocation5 + $0x50] sm:$0xff] }
 0x54c   : > { %v3575_v16 = vpop.f32.mrf.mxu2  ;;  %v3664_v22 = vpop.f32.mrf.mxu3 }
 0x54d   : > { %v3159_v17 = vpop.f32.mrf.mxu0  ;;  %v3392_v21 = vpop.f32.mrf.mxu1  ;;  %v3665_v57 = vadd.f32 %v3664_v22, %v3575_v16 }
 0x54e   : > { %v3471_v9 = vsub.f32 %v3159_v17, %v3392_v21 }
 0x550   : > { %v5149_v20 = vpack.c.bf16 %v3471_v9, %v3470_v31 }
 0x552   : > { %5150 = vst [vmem:[%s6236_s22] sm:$0xff] %v5149_v20  }
 0x554   : > { %v3577_v60 = vpop.f32.mrf.mxu2  ;;  %v3666_v10 = vpop.f32.mrf.mxu3 }
 0x555   : > { %v3667_v54 = vadd.f32 %v3666_v10, %v3577_v60  ;;  %v3162_v25 = vpop.f32.mrf.mxu0  ;;  %v3395_v7 = vpop.f32.mrf.mxu1 }
 0x556   : > { %v3472_v32 = vsub.f32 %v3162_v25, %v3395_v7 }
 0x557   : > { %v5229_v6 = vpack.c.bf16 %v3667_v54, %v3665_v57 }
 0x558   : > { %3201 = vmatmul.bf16.gmra.mxu0 %v4786_v50  ;;  %3434 = vmatmul.bf16.gmra.mxu1 %v4802_v62 }
 0x559   : > { %5379 = vst [vmem:[%s6236_s22 + $0x80] sm:$0xff] %v5229_v6   ;;  %3619 = vmatmul.bf16.gmra.mxu2 %v4802_v62  ;;  %3708 = vmatmul.bf16.gmra.mxu3 %v4786_v50  ;;  %v4790_v50 = vld [vmem:[#allocation4 + $0x30] sm:$0xff]  ;;  %v4806_v62 = vld [vmem:[#allocation5 + $0x20] sm:$0xff] }
 0x55c   : > { %v3580_v24 = vpop.f32.mrf.mxu2  ;;  %v3669_v29 = vpop.f32.mrf.mxu3 }
 0x55d   : > { %v3164_v45 = vpop.f32.mrf.mxu0  ;;  %v3397_v12 = vpop.f32.mrf.mxu1  ;;  %v3670_v39 = vadd.f32 %v3669_v29, %v3580_v24 }
 0x55e   : > { %v3473_v51 = vsub.f32 %v3164_v45, %v3397_v12 }
 0x560   : > { %v5154_v48 = vpack.c.bf16 %v3473_v51, %v3472_v32 }
 0x562   : > { %5364 = vst [vmem:[%s6236_s22 + $0x8] sm:$0xff] %v5154_v48  }
 0x564   : > { %v3582_v35 = vpop.f32.mrf.mxu2  ;;  %v3671_v30 = vpop.f32.mrf.mxu3 }
 0x565   : > { %v3672_v14 = vadd.f32 %v3671_v30, %v3582_v35  ;;  %v3167_v19 = vpop.f32.mrf.mxu0  ;;  %v3400_v40 = vpop.f32.mrf.mxu1 }
 0x566   : > { %v3474_v43 = vsub.f32 %v3167_v19, %v3400_v40 }
 0x567   : > { %v5234_v27 = vpack.c.bf16 %v3672_v14, %v3670_v39 }
 0x568   : > { %3206 = vmatmul.bf16.gmra.mxu0 %v4787_v38  ;;  %3439 = vmatmul.bf16.gmra.mxu1 %v4803_v5 }
 0x569   : > { %5380 = vst [vmem:[%s6236_s22 + $0x88] sm:$0xff] %v5234_v27   ;;  %3624 = vmatmul.bf16.gmra.mxu2 %v4803_v5  ;;  %3713 = vmatmul.bf16.gmra.mxu3 %v4787_v38  ;;  %v4791_v38 = vld [vmem:[#allocation4 + $0x50] sm:$0xff]  ;;  %v4807_v5 = vld [vmem:[#allocation5 + $0x58] sm:$0xff] }
 0x56c   : > { %v3585_v26 = vpop.f32.mrf.mxu2  ;;  %v3674_v41 = vpop.f32.mrf.mxu3 }
 0x56d   : > { %v3169_v55 = vpop.f32.mrf.mxu0  ;;  %v3402_v28 = vpop.f32.mrf.mxu1  ;;  %v3675_v1 = vadd.f32 %v3674_v41, %v3585_v26 }
 0x56e   : > { %v3475_v59 = vsub.f32 %v3169_v55, %v3402_v28 }
 0x570   : > { %v5159_v58 = vpack.c.bf16 %v3475_v59, %v3474_v43 }
 0x572   : > { %5365 = vst [vmem:[%s6236_s22 + $0x10] sm:$0xff] %v5159_v58  }
 0x574   : > { %v3587_v33 = vpop.f32.mrf.mxu2  ;;  %v3676_v46 = vpop.f32.mrf.mxu3 }
 0x575   : > { %v3677_v63 = vadd.f32 %v3676_v46, %v3587_v33  ;;  %v3172_v42 = vpop.f32.mrf.mxu0  ;;  %v3405_v52 = vpop.f32.mrf.mxu1 }
 0x576   : > { %v3476_v4 = vsub.f32 %v3172_v42, %v3405_v52 }
 0x577   : > { %v5239_v49 = vpack.c.bf16 %v3677_v63, %v3675_v1 }
 0x578   : > { %3211 = vmatmul.bf16.gmra.mxu0 %v4788_v56  ;;  %3444 = vmatmul.bf16.gmra.mxu1 %v4804_v11 }
 0x579   : > { %5381 = vst [vmem:[%s6236_s22 + $0x90] sm:$0xff] %v5239_v49   ;;  %3629 = vmatmul.bf16.gmra.mxu2 %v4804_v11  ;;  %3718 = vmatmul.bf16.gmra.mxu3 %v4788_v56  ;;  %v4792_v56 = vld [vmem:[#allocation4 + $0x78] sm:$0xff]  ;;  %v4808_v11 = vld [vmem:[#allocation5 + $0x10] sm:$0xff] }
 0x57c   : > { %v3590_v53 = vpop.f32.mrf.mxu2  ;;  %v3679_v37 = vpop.f32.mrf.mxu3 }
 0x57d   : > { %v3174_v2 = vpop.f32.mrf.mxu0  ;;  %v3407_v23 = vpop.f32.mrf.mxu1  ;;  %v3680_v13 = vadd.f32 %v3679_v37, %v3590_v53 }
 0x57e   : > { %v3477_v3 = vsub.f32 %v3174_v2, %v3407_v23 }
 0x580   : > { %v5164_v8 = vpack.c.bf16 %v3477_v3, %v3476_v4 }
 0x582   : > { %5366 = vst [vmem:[%s6236_s22 + $0x18] sm:$0xff] %v5164_v8  }
 0x584   : > { %v3592_v0 = vpop.f32.mrf.mxu2  ;;  %v3681_v15 = vpop.f32.mrf.mxu3 }
 0x585   : > { %v3682_v47 = vadd.f32 %v3681_v15, %v3592_v0  ;;  %v3177_v44 = vpop.f32.mrf.mxu0  ;;  %v3410_v36 = vpop.f32.mrf.mxu1 }
 0x586   : > { %v3478_v31 = vsub.f32 %v3177_v44, %v3410_v36 }
 0x587   : > { %v5244_v34 = vpack.c.bf16 %v3682_v47, %v3680_v13 }
 0x588   : > { %3216 = vmatmul.bf16.gmra.mxu0 %v4789_v18  ;;  %3449 = vmatmul.bf16.gmra.mxu1 %v4805_v61 }
 0x589   : > { %5382 = vst [vmem:[%s6236_s22 + $0x98] sm:$0xff] %v5244_v34   ;;  %3634 = vmatmul.bf16.gmra.mxu2 %v4805_v61  ;;  %3723 = vmatmul.bf16.gmra.mxu3 %v4789_v18 }
 0x58c   : > { %v3595_v16 = vpop.f32.mrf.mxu2  ;;  %v3684_v22 = vpop.f32.mrf.mxu3 }
 0x58d   : > { %v3179_v17 = vpop.f32.mrf.mxu0  ;;  %v3412_v21 = vpop.f32.mrf.mxu1  ;;  %v3685_v57 = vadd.f32 %v3684_v22, %v3595_v16 }
 0x58e   : > { %v3479_v9 = vsub.f32 %v3179_v17, %v3412_v21 }
 0x590   : > { %v5169_v20 = vpack.c.bf16 %v3479_v9, %v3478_v31 }
 0x592   : > { %5367 = vst [vmem:[%s6236_s22 + $0x20] sm:$0xff] %v5169_v20  }
 0x594   : > { %v3597_v60 = vpop.f32.mrf.mxu2  ;;  %v3686_v10 = vpop.f32.mrf.mxu3 }
 0x595   : > { %v3687_v54 = vadd.f32 %v3686_v10, %v3597_v60  ;;  %v3182_v25 = vpop.f32.mrf.mxu0  ;;  %v3415_v7 = vpop.f32.mrf.mxu1 }
 0x596   : > { %v3480_v32 = vsub.f32 %v3182_v25, %v3415_v7 }
 0x597   : > { %v5249_v6 = vpack.c.bf16 %v3687_v54, %v3685_v57 }
 0x598   : > { %3221 = vmatmul.bf16.gmra.mxu0 %v4790_v50  ;;  %3454 = vmatmul.bf16.gmra.mxu1 %v4806_v62 }
 0x599   : > { %5383 = vst [vmem:[%s6236_s22 + $0xa0] sm:$0xff] %v5249_v6   ;;  %3639 = vmatmul.bf16.gmra.mxu2 %v4806_v62  ;;  %3728 = vmatmul.bf16.gmra.mxu3 %v4790_v50 }
 0x59c   : > { %v3600_v24 = vpop.f32.mrf.mxu2  ;;  %v3689_v29 = vpop.f32.mrf.mxu3 }
 0x59d   : > { %v3184_v45 = vpop.f32.mrf.mxu0  ;;  %v3417_v12 = vpop.f32.mrf.mxu1  ;;  %v3690_v39 = vadd.f32 %v3689_v29, %v3600_v24 }
 0x59e   : > { %v3481_v51 = vsub.f32 %v3184_v45, %v3417_v12 }
 0x5a0   : > { %v5174_v48 = vpack.c.bf16 %v3481_v51, %v3480_v32 }
 0x5a2   : > { %5368 = vst [vmem:[%s6236_s22 + $0x28] sm:$0xff] %v5174_v48  }
 0x5a4   : > { %v3602_v35 = vpop.f32.mrf.mxu2  ;;  %v3691_v30 = vpop.f32.mrf.mxu3 }
 0x5a5   : > { %v3692_v14 = vadd.f32 %v3691_v30, %v3602_v35  ;;  %v3187_v19 = vpop.f32.mrf.mxu0  ;;  %v3420_v40 = vpop.f32.mrf.mxu1 }
 0x5a6   : > { %v3482_v43 = vsub.f32 %v3187_v19, %v3420_v40 }
 0x5a7   : > { %v5254_v27 = vpack.c.bf16 %v3692_v14, %v3690_v39 }
 0x5a8   : > { %3226 = vmatmul.bf16.gmra.mxu0 %v4791_v38  ;;  %3459 = vmatmul.bf16.gmra.mxu1 %v4807_v5 }
 0x5a9   : > { %5384 = vst [vmem:[%s6236_s22 + $0xa8] sm:$0xff] %v5254_v27   ;;  %3644 = vmatmul.bf16.gmra.mxu2 %v4807_v5  ;;  %3733 = vmatmul.bf16.gmra.mxu3 %v4791_v38 }
 0x5ac   : > { %v3605_v26 = vpop.f32.mrf.mxu2  ;;  %v3694_v41 = vpop.f32.mrf.mxu3 }
 0x5ad   : > { %v3189_v55 = vpop.f32.mrf.mxu0  ;;  %v3422_v28 = vpop.f32.mrf.mxu1  ;;  %v3695_v1 = vadd.f32 %v3694_v41, %v3605_v26 }
 0x5ae   : > { %v3483_v59 = vsub.f32 %v3189_v55, %v3422_v28 }
 0x5b0   : > { %v5179_v58 = vpack.c.bf16 %v3483_v59, %v3482_v43 }
 0x5b2   : > { %5369 = vst [vmem:[%s6236_s22 + $0x30] sm:$0xff] %v5179_v58  }
 0x5b4   : > { %v3607_v33 = vpop.f32.mrf.mxu2  ;;  %v3696_v46 = vpop.f32.mrf.mxu3 }
 0x5b5   : > { %v3697_v63 = vadd.f32 %v3696_v46, %v3607_v33  ;;  %v3192_v42 = vpop.f32.mrf.mxu0  ;;  %v3425_v52 = vpop.f32.mrf.mxu1 }
 0x5b6   : > { %v3484_v4 = vsub.f32 %v3192_v42, %v3425_v52 }
 0x5b7   : > { %v5259_v49 = vpack.c.bf16 %v3697_v63, %v3695_v1 }
 0x5b8   : > { %3231 = vmatmul.bf16.gmra.mxu0 %v4792_v56  ;;  %3464 = vmatmul.bf16.gmra.mxu1 %v4808_v11 }
 0x5b9   : > { %5385 = vst [vmem:[%s6236_s22 + $0xb0] sm:$0xff] %v5259_v49   ;;  %3649 = vmatmul.bf16.gmra.mxu2 %v4808_v11  ;;  %3738 = vmatmul.bf16.gmra.mxu3 %v4792_v56 }
 0x5bc   : > { %v3610_v53 = vpop.f32.mrf.mxu2  ;;  %v3699_v37 = vpop.f32.mrf.mxu3 }
 0x5bd   : > { %v3194_v2 = vpop.f32.mrf.mxu0  ;;  %v3427_v23 = vpop.f32.mrf.mxu1  ;;  %v3700_v13 = vadd.f32 %v3699_v37, %v3610_v53 }
 0x5be   : > { %v3485_v3 = vsub.f32 %v3194_v2, %v3427_v23 }
 0x5c0   : > { %v5184_v8 = vpack.c.bf16 %v3485_v3, %v3484_v4 }
 0x5c2   : > { %5370 = vst [vmem:[%s6236_s22 + $0x38] sm:$0xff] %v5184_v8  }
 0x5c4   : > { %v3612_v0 = vpop.f32.mrf.mxu2  ;;  %v3701_v15 = vpop.f32.mrf.mxu3 }
 0x5c5   : > { %v3702_v47 = vadd.f32 %v3701_v15, %v3612_v0  ;;  %v3197_v44 = vpop.f32.mrf.mxu0  ;;  %v3430_v36 = vpop.f32.mrf.mxu1 }
 0x5c6   : > { %v3486_v17 = vsub.f32 %v3197_v44, %v3430_v36 }
 0x5c7   : > { %v5264_v18 = vpack.c.bf16 %v3702_v47, %v3700_v13 }
 0x5c9   : > { %5386 = vst [vmem:[%s6236_s22 + $0xb8] sm:$0xff] %v5264_v18  }
 0x5cc   : > { %v3615_v61 = vpop.f32.mrf.mxu2  ;;  %v3704_v34 = vpop.f32.mrf.mxu3 }
 0x5cd   : > { %v3199_v16 = vpop.f32.mrf.mxu0  ;;  %v3432_v22 = vpop.f32.mrf.mxu1  ;;  %v3705_v60 = vadd.f32 %v3704_v34, %v3615_v61 }
 0x5ce   : > { %v3487_v21 = vsub.f32 %v3199_v16, %v3432_v22 }
 0x5d0   : > { %v5189_v31 = vpack.c.bf16 %v3487_v21, %v3486_v17 }
 0x5d2   : > { %5371 = vst [vmem:[%s6236_s22 + $0x40] sm:$0xff] %v5189_v31  }
 0x5d4   : > { %v3617_v9 = vpop.f32.mrf.mxu2  ;;  %v3706_v20 = vpop.f32.mrf.mxu3 }
 0x5d5   : > { %v3707_v10 = vadd.f32 %v3706_v20, %v3617_v9  ;;  %v3202_v57 = vpop.f32.mrf.mxu0  ;;  %v3435_v54 = vpop.f32.mrf.mxu1 }
 0x5d6   : > { %v3488_v24 = vsub.f32 %v3202_v57, %v3435_v54 }
 0x5d7   : > { %v5269_v25 = vpack.c.bf16 %v3707_v10, %v3705_v60 }
 0x5d9   : > { %5387 = vst [vmem:[%s6236_s22 + $0xc0] sm:$0xff] %v5269_v25  }
 0x5dc   : > { %v3620_v7 = vpop.f32.mrf.mxu2  ;;  %v3709_v50 = vpop.f32.mrf.mxu3 }
 0x5dd   : > { %v3204_v62 = vpop.f32.mrf.mxu0  ;;  %v3437_v6 = vpop.f32.mrf.mxu1  ;;  %v3710_v51 = vadd.f32 %v3709_v50, %v3620_v7 }
 0x5de   : > { %v3489_v29 = vsub.f32 %v3204_v62, %v3437_v6 }
 0x5e0   : > { %v5194_v45 = vpack.c.bf16 %v3489_v29, %v3488_v24 }
 0x5e2   : > { %5372 = vst [vmem:[%s6236_s22 + $0x48] sm:$0xff] %v5194_v45  }
 0x5e4   : > { %v3622_v12 = vpop.f32.mrf.mxu2  ;;  %v3711_v32 = vpop.f32.mrf.mxu3 }
 0x5e5   : > { %v3712_v48 = vadd.f32 %v3711_v32, %v3622_v12  ;;  %v3207_v35 = vpop.f32.mrf.mxu0  ;;  %v3440_v30 = vpop.f32.mrf.mxu1 }
 0x5e6   : > { %v3490_v5 = vsub.f32 %v3207_v35, %v3440_v30 }
 0x5e7   : > { %v5274_v39 = vpack.c.bf16 %v3712_v48, %v3710_v51 }
 0x5e9   : > { %5388 = vst [vmem:[%s6236_s22 + $0xc8] sm:$0xff] %v5274_v39  }
 0x5ec   : > { %v3625_v14 = vpop.f32.mrf.mxu2  ;;  %v3714_v19 = vpop.f32.mrf.mxu3 }
 0x5ed   : > { %v3209_v40 = vpop.f32.mrf.mxu0  ;;  %v3442_v38 = vpop.f32.mrf.mxu1  ;;  %v3715_v28 = vadd.f32 %v3714_v19, %v3625_v14 }
 0x5ee   : > { %v3491_v27 = vsub.f32 %v3209_v40, %v3442_v38 }
 0x5f0   : > { %v5199_v26 = vpack.c.bf16 %v3491_v27, %v3490_v5 }
 0x5f2   : > { %5373 = vst [vmem:[%s6236_s22 + $0x50] sm:$0xff] %v5199_v26  }
 0x5f4   : > { %v3627_v41 = vpop.f32.mrf.mxu2  ;;  %v3716_v55 = vpop.f32.mrf.mxu3 }
 0x5f5   : > { %v3717_v43 = vadd.f32 %v3716_v55, %v3627_v41  ;;  %v3212_v59 = vpop.f32.mrf.mxu0  ;;  %v3445_v58 = vpop.f32.mrf.mxu1 }
 0x5f6   : > { %v3492_v52 = vsub.f32 %v3212_v59, %v3445_v58 }
 0x5f7   : > { %v5279_v33 = vpack.c.bf16 %v3717_v43, %v3715_v28 }
 0x5f9   : > { %5389 = vst [vmem:[%s6236_s22 + $0xd0] sm:$0xff] %v5279_v33  }
 0x5fc   : > { %v3630_v46 = vpop.f32.mrf.mxu2  ;;  %v3719_v1 = vpop.f32.mrf.mxu3 }
 0x5fd   : > { %v3214_v63 = vpop.f32.mrf.mxu0  ;;  %v3447_v42 = vpop.f32.mrf.mxu1  ;;  %v3720_v37 = vadd.f32 %v3719_v1, %v3630_v46 }
 0x5fe   : > { %v3493_v56 = vsub.f32 %v3214_v63, %v3447_v42 }
 0x600   : > { %v5204_v11 = vpack.c.bf16 %v3493_v56, %v3492_v52 }
 0x602   : > { %5374 = vst [vmem:[%s6236_s22 + $0x58] sm:$0xff] %v5204_v11  }
 0x604   : > { %v3632_v49 = vpop.f32.mrf.mxu2  ;;  %v3721_v53 = vpop.f32.mrf.mxu3 }
 0x605   : > { %v3722_v2 = vadd.f32 %v3721_v53, %v3632_v49  ;;  %v3217_v23 = vpop.f32.mrf.mxu0  ;;  %v3450_v4 = vpop.f32.mrf.mxu1 }
 0x606   : > { %v3494_v47 = vsub.f32 %v3217_v23, %v3450_v4 }
 0x607   : > { %v5284_v3 = vpack.c.bf16 %v3722_v2, %v3720_v37 }
 0x609   : > { %5390 = vst [vmem:[%s6236_s22 + $0xd8] sm:$0xff] %v5284_v3  }
 0x60c   : > { %v3635_v8 = vpop.f32.mrf.mxu2  ;;  %v3724_v0 = vpop.f32.mrf.mxu3 }
 0x60d   : > { %v3219_v15 = vpop.f32.mrf.mxu0  ;;  %v3452_v13 = vpop.f32.mrf.mxu1  ;;  %v3725_v34 = vadd.f32 %v3724_v0, %v3635_v8 }
 0x60e   : > { %v3495_v44 = vsub.f32 %v3219_v15, %v3452_v13 }
 0x610   : > { %v5209_v36 = vpack.c.bf16 %v3495_v44, %v3494_v47 }
 0x612   : > { %5375 = vst [vmem:[%s6236_s22 + $0x60] sm:$0xff] %v5209_v36  }
 0x614   : > { %v3637_v18 = vpop.f32.mrf.mxu2  ;;  %v3726_v61 = vpop.f32.mrf.mxu3 }
 0x615   : > { %v3727_v16 = vadd.f32 %v3726_v61, %v3637_v18  ;;  %v3222_v22 = vpop.f32.mrf.mxu0  ;;  %v3455_v17 = vpop.f32.mrf.mxu1 }
 0x616   : > { %v3496_v10 = vsub.f32 %v3222_v22, %v3455_v17 }
 0x617   : > { %v5289_v21 = vpack.c.bf16 %v3727_v16, %v3725_v34 }
 0x619   : > { %5391 = vst [vmem:[%s6236_s22 + $0xe0] sm:$0xff] %v5289_v21  }
 0x61c   : > { %v3640_v31 = vpop.f32.mrf.mxu2  ;;  %v3729_v9 = vpop.f32.mrf.mxu3 }
 0x61d   : > { %v3224_v20 = vpop.f32.mrf.mxu0  ;;  %v3457_v60 = vpop.f32.mrf.mxu1  ;;  %v3730_v50 = vadd.f32 %v3729_v9, %v3640_v31 }
 0x61e   : > { %v3497_v57 = vsub.f32 %v3224_v20, %v3457_v60 }
 0x620   : > { %v5214_v54 = vpack.c.bf16 %v3497_v57, %v3496_v10 }
 0x622   : > { %5376 = vst [vmem:[%s6236_s22 + $0x68] sm:$0xff] %v5214_v54  }
 0x624   : > { %v3642_v25 = vpop.f32.mrf.mxu2  ;;  %v3731_v7 = vpop.f32.mrf.mxu3 }
 0x625   : > { %v3732_v62 = vadd.f32 %v3731_v7, %v3642_v25  ;;  %v3227_v6 = vpop.f32.mrf.mxu0  ;;  %v3460_v24 = vpop.f32.mrf.mxu1 }
 0x626   : > { %v3498_v48 = vsub.f32 %v3227_v6, %v3460_v24 }
 0x627   : > { %v5294_v29 = vpack.c.bf16 %v3732_v62, %v3730_v50 }
 0x629   : > { %5392 = vst [vmem:[%s6236_s22 + $0xe8] sm:$0xff] %v5294_v29  }
 0x62c   : > { %v3645_v45 = vpop.f32.mrf.mxu2  ;;  %v3734_v12 = vpop.f32.mrf.mxu3 }
 0x62d   : > { %v3229_v32 = vpop.f32.mrf.mxu0  ;;  %v3462_v51 = vpop.f32.mrf.mxu1  ;;  %v3735_v19 = vadd.f32 %v3734_v12, %v3645_v45 }
 0x62e   : > { %v3499_v35 = vsub.f32 %v3229_v32, %v3462_v51 }
 0x630   : > { %v5219_v30 = vpack.c.bf16 %v3499_v35, %v3498_v48 }
 0x632   : > { %5377 = vst [vmem:[%s6236_s22 + $0x70] sm:$0xff] %v5219_v30  }
 0x634   : > { %v3647_v39 = vpop.f32.mrf.mxu2  ;;  %v3736_v14 = vpop.f32.mrf.mxu3 }
 0x635   : > { %v3737_v40 = vadd.f32 %v3736_v14, %v3647_v39  ;;  %v3232_v38 = vpop.f32.mrf.mxu0  ;;  %v3465_v5 = vpop.f32.mrf.mxu1 }
 0x636   : > { %v3500_v43 = vsub.f32 %v3232_v38, %v3465_v5 }
 0x637   : > { %v5299_v27 = vpack.c.bf16 %v3737_v40, %v3735_v19 }
 0x639   : > { %5393 = vst [vmem:[%s6236_s22 + $0xf0] sm:$0xff] %v5299_v27  }
 0x63c   : > { %v3650_v26 = vpop.f32.mrf.mxu2  ;;  %v3739_v41 = vpop.f32.mrf.mxu3 }
 0x63d   : > { %v3234_v55 = vpop.f32.mrf.mxu0  ;;  %v3467_v28 = vpop.f32.mrf.mxu1  ;;  %v3740_v1 = vadd.f32 %v3739_v41, %v3650_v26 }
 0x63e   : > { %v3501_v59 = vsub.f32 %v3234_v55, %v3467_v28 }
 0x640   : > { %v5224_v58 = vpack.c.bf16 %v3501_v59, %v3500_v43 }
 0x642   : > { %5378 = vst [vmem:[%s6236_s22 + $0x78] sm:$0xff] %v5224_v58  }
 0x644   : > { %v3652_v33 = vpop.f32.mrf.mxu2  ;;  %v3741_v46 = vpop.f32.mrf.mxu3 }
 0x645   : > { %v3742_v63 = vadd.f32 %v3741_v46, %v3652_v33 }
 0x647   : > { %v5304_v42 = vpack.c.bf16 %v3742_v63, %v3740_v1 }
 0x649   : > { %5394 = vst [vmem:[%s6236_s22 + $0xf8] sm:$0xff] %v5304_v42  }
 0x64a   : > { %s4825_s26 = sshll.u32 %s5692_s16, 7  ;;  %s3832_s20 = sshll.u32 %s6236_s22, 4  ;;  %s3833_s20 = int_to_ptr.vmem [resolvable:$true] %s3832_s20 }
 0x64b   : > { %s3821_s11 = scalar_lea.hbm %s6311_s3, %s4825_s26  ;;  %s5644_s19 = smov 2048  }
 0x64c   : > { %s3834_s17 = sshll.u32 %s3821_s11, 4  ;;  %5412 = sst [smem:[#allocation16]] (%p5723_p11), %s5644_s19  ;;  %s3835_s17 = int_to_ptr.hbm [resolvable:$true] %s3834_s17 }
 0x64d   : > { %s5645_s27 = smov 4096   ;;  %s5646_s28 = smov 32  }
 0x64e   : > { %5413 = sst [smem:[#allocation16 + $0x1]] (%p5723_p11), %s5645_s27  ;;  %s5647_s16 = smov 64  }
 0x64f   : > { %5414 = sst [smem:[#allocation16 + $0x2]] (%p5723_p11), %s5646_s28  ;;  %s5648_s29 = smov 4  }
 0x650   : > { %5415 = sst [smem:[#allocation16 + $0x3]] (%p5723_p11), %s5647_s16  ;;  %s5649_s30 = smov [#allocation15]  }
 0x651   : > { %5416 = sst [smem:[#allocation16 + $0x4]] (%p5723_p11), %s5647_s16  ;;  %s5650_s4 = smov 0  }
 0x652   : > { %5417 = sst [smem:[#allocation16 + $0x5]] (%p5723_p11), %s5648_s29 }
 0x653   : > { %5418 = dma.general (%p5723_p11), %s3833_s20, 4096, %s3835_s17, %s3810_s23, %s5649_s30, [#allocation16], %s5650_s4, 0  }
 0x654 PF: > { %s3862_s5 = sand.u32 1, %s5618_s12   ;;  %p5428_p3 = pnand %p3944_p2, %p5727_p12 }
 0x655   : > { %s3863_s7 = scalar_lea.sflag [#allocation8], %s3862_s5 }
 0x656   : > { %p5429_p4 = pneg %p5428_p3 }
 0x658   : > { %5613 = dma.done.wait (%p5429_p4), %s3863_s7, 4096  }
 0x659   : > { %5615 = vsyncadd (%p5429_p4), %s3863_s7, 4294963200  ;;  %p17_p5 = scmp.ge.s32.totalorder %s5696_s18, 4   ;;  %s6498_s12 = smov %s5622_s13 }
 0x65a   : > { %s6499_s13 = smov %s5626_s14  ;;  %s6500_s14 = smov %s5708_s21 }
 0x65b   : > { %s6501_s15 = smov %s5696_s18  ;;  %19 = sbr.rel (!%p17_p5) target bundleno = 6 (0x6), region = 109 }
 0x660   :  { %3869 = vsyncpa [#allocation7], 1 }
 0x661   :  { %3871 = vsyncpa [#allocation7 + $0x1], 1 }
 0x662   :  { %3872 = vsyncpa [#allocation10], 1 }
 0x663   :  { %3873 = vsyncpa [#allocation8], 1 }
 0x664   :  { %3875 = vsyncpa [#allocation8 + $0x1], 1 }

</bundles_post_ra>
